<compile_context>
chip_gen: v5e
topology: v5e:2x2
jax: 0.10.0
libtpu: 0.0.40
codegen_flags: <defaults>
</compile_context>

<pallas_src>
import jax
import jax.numpy as jnp
from jax.experimental import pallas as pl
from jax.experimental.pallas import tpu as pltpu

EPS = 1e-5
LANE = 128                      # lane width == Cout tile
VMEM_LIMIT = 32 * 1024 * 1024   # explicit scoped-VMEM budget (safe on v5e/v6e/v7x)


def _round_up(x, m):
    return (x + m - 1) // m * m


def conv_block_forward(x_nchw, w_hwio, bias, gamma, beta):
    """ConvBlock forward: Conv2d(3x3, pad=1) -> BatchNorm2d(training) -> ReLU.

    `bias` is accepted for interface parity but intentionally unused: the BN
    mean-subtraction cancels a per-channel constant exactly (numerically exact).
    """
    del bias
    N, Cin, H, W = x_nchw.shape
    KH, KW, _, Cout = w_hwio.shape
    assert (KH, KW) == (3, 3)

    Wp = W + 2                       # padded width
    P = (H + 2) * Wp                 # rows of one flattened padded image
    P2 = P + 8                       # slack so shifted slices never go OOB
    OutP = H * Wp                    # rows kept per image (cols W, W+1 are junk)
    Cout_pad = _round_up(Cout, LANE)
    n_ct = Cout_pad // LANE
    count = float(N * H * W)         # BN reduction size (junk rows masked out)

    # ----------------- wrapper glue: layout only, no math ---------------------
    x = jnp.transpose(x_nchw, (0, 2, 3, 1))                        # [N,H,W,Cin]
    xp = jnp.pad(x, ((0, 0), (1, 1), (1, 1), (0, 0)))              # [N,H+2,W+2,Cin]
    a = xp.reshape(N, P, Cin)
    a = jnp.pad(a, ((0, 0), (0, P2 - P), (0, 0))).astype(jnp.bfloat16)

    w2 = w_hwio.reshape(KH * KW, Cin, Cout)                        # (kh,kw) x cin x cout
    w2 = jnp.pad(w2, ((0, 0), (0, 0), (0, Cout_pad - Cout))).astype(jnp.bfloat16)

    gamma_p = jnp.pad(gamma.astype(jnp.float32), (0, Cout_pad - Cout)).reshape(1, Cout_pad)
    beta_p = jnp.pad(beta.astype(jnp.float32), (0, Cout_pad - Cout)).reshape(1, Cout_pad)

    # validity mask over flattened rows: column-in-padded-row < W
    col = jnp.arange(OutP, dtype=jnp.int32) % Wp
    mask = (col < W).astype(jnp.float32).reshape(OutP, 1)

    shifts = tuple(kh * Wp + kw for kh in range(KH) for kw in range(KW))

    # ---------------- phase 1: conv (9 shifted matmuls) + channel sums --------
    def conv_stats_kernel(a_ref, w_ref, m_ref, conv_ref, sum_ref, sumsq_ref):
        i = pl.program_id(1)                          # image index (reduction axis)

        acc = None
        for k, sh in enumerate(shifts):
            a_k = a_ref[0, sh:sh + OutP, :]           # [OutP, Cin] bf16
            p = jnp.dot(a_k, w_ref[k], preferred_element_type=jnp.float32)
            acc = p if acc is None else acc + p       # [OutP, LANE] f32
        conv_ref[0] = acc

        @pl.when(i == 0)
        def _():
            sum_ref[...] = jnp.zeros_like(sum_ref)
            sumsq_ref[...] = jnp.zeros_like(sumsq_ref)

        masked = acc * m_ref[...]                     # zero junk padded-width rows
        sum_ref[...] += jnp.sum(masked, axis=0, keepdims=True)
        sumsq_ref[...] += jnp.sum(masked * masked, axis=0, keepdims=True)

    conv_out, csum, csumsq = pl.pallas_call(
        conv_stats_kernel,
        out_shape=(
            jax.ShapeDtypeStruct((N, OutP, Cout_pad), jnp.float32),
            jax.ShapeDtypeStruct((1, Cout_pad), jnp.float32),
            jax.ShapeDtypeStruct((1, Cout_pad), jnp.float32),
        ),
        grid=(n_ct, N),
        in_specs=[
            pl.BlockSpec((1, P2, Cin), lambda j, i: (i, 0, 0)),
            pl.BlockSpec((KH * KW, Cin, LANE), lambda j, i: (0, 0, j)),
            pl.BlockSpec((OutP, 1), lambda j, i: (0, 0)),
        ],
        out_specs=(
            pl.BlockSpec((1, OutP, LANE), lambda j, i: (i, 0, j)),
            pl.BlockSpec((1, LANE), lambda j, i: (0, j)),
            pl.BlockSpec((1, LANE), lambda j, i: (0, j)),
        ),
        compiler_params=pltpu.CompilerParams(
            dimension_semantics=("parallel", "arbitrary"),
            vmem_limit_bytes=VMEM_LIMIT,
        ),
    )(a, w2, mask)

    # ---------------- phase 2: normalize + affine + ReLU ----------------------
    def bn_relu_kernel(conv_ref, sum_ref, sumsq_ref, g_ref, b_ref, o_ref):
        inv_count = 1.0 / count
        mean = sum_ref[...] * inv_count                             # [1, C]
        var = jnp.maximum(sumsq_ref[...] * inv_count - mean * mean, 0.0)
        scale = g_ref[...] * jax.lax.rsqrt(var + EPS)
        shift = b_ref[...] - mean * scale
        y = conv_ref[0] * scale + shift
        o_ref[0] = jnp.maximum(y, 0.0).astype(o_ref.dtype)

    y = pl.pallas_call(
        bn_relu_kernel,
        out_shape=jax.ShapeDtypeStruct((N, OutP, Cout_pad), jnp.float32),
        grid=(n_ct, N),
        in_specs=[
            pl.BlockSpec((1, OutP, LANE), lambda j, i: (i, 0, j)),
            pl.BlockSpec((1, LANE), lambda j, i: (0, j)),
            pl.BlockSpec((1, LANE), lambda j, i: (0, j)),
            pl.BlockSpec((1, LANE), lambda j, i: (0, j)),
            pl.BlockSpec((1, LANE), lambda j, i: (0, j)),
        ],
        out_specs=pl.BlockSpec((1, OutP, LANE), lambda j, i: (i, 0, j)),
        compiler_params=pltpu.CompilerParams(
            dimension_semantics=("parallel", "parallel"),
            vmem_limit_bytes=VMEM_LIMIT,
        ),
    )(conv_out, csum, csumsq, gamma_p, beta_p)

    # back to NCHW, dropping padded-width columns and padded channels
    y = y.reshape(N, H, Wp, Cout_pad)[:, :, :W, :Cout]
    return jnp.transpose(y, (0, 3, 1, 2))


def conv_block_reference(x_nchw, w_hwio, bias, gamma, beta):
    """Pure-JAX f32 reference (includes the conv bias; BN cancels it exactly)."""
    x = jnp.transpose(x_nchw, (0, 2, 3, 1))
    y = jax.lax.conv_general_dilated(
        x, w_hwio, window_strides=(1, 1), padding=((1, 1), (1, 1)),
        dimension_numbers=("NHWC", "HWIO", "NHWC"))
    y = y + bias
    mean = jnp.mean(y, axis=(0, 1, 2), keepdims=True)
    var = jnp.mean((y - mean) ** 2, axis=(0, 1, 2), keepdims=True)
    y = (y - mean) * jax.lax.rsqrt(var + EPS) * gamma + beta
    y = jnp.maximum(y, 0.0)
    return jnp.transpose(y, (0, 3, 1, 2))


if __name__ == "__main__":
    # Deterministic synthetic parameters (matching nn.Conv2d / nn.BatchNorm2d shapes).
    N, Cin, Cout, H, W = 2, 4, 8, 16, 16
    KH = KW = 3

    key = jax.random.PRNGKey(0)
    kx, kw, kb = jax.random.split(key, 3)
    x = jax.random.normal(kx, (N, Cin, H, W), dtype=jnp.float32)
    w_hwio = 0.1 * jax.random.normal(kw, (KH, KW, Cin, Cout), dtype=jnp.float32)
    bias = 0.1 * jax.random.normal(kb, (Cout,), dtype=jnp.float32)
    gamma = jnp.ones((Cout,), dtype=jnp.float32)   # BatchNorm2d default weight init
    beta = jnp.zeros((Cout,), dtype=jnp.float32)   # BatchNorm2d default bias init

    fwd = jax.jit(conv_block_forward)
    out = jax.block_until_ready(fwd(x, w_hwio, bias, gamma, beta))
    ref = jax.block_until_ready(conv_block_reference(x, w_hwio, bias, gamma, beta))

    assert out.shape == (N, Cout, H, W), out.shape
    max_err = float(jnp.max(jnp.abs(out - ref)))
    # bf16 MXU operands -> looser tolerance vs the f32 reference (values are O(1)).
    assert jnp.allclose(out, ref, atol=5e-2, rtol=5e-2), max_err
    print("KERNEL_OK")
</pallas_src>

<mosaic_0001>
module attributes {stable_mosaic.version = 11 : i64} {
  func.func @bn_relu_kernel(%arg0: i32, %arg1: i32, %arg2: memref<1x288x128xf32, #tpu.memory_space<vmem>>, %arg3: memref<1x128xf32, #tpu.memory_space<vmem>>, %arg4: memref<1x128xf32, #tpu.memory_space<vmem>>, %arg5: memref<1x128xf32, #tpu.memory_space<vmem>>, %arg6: memref<1x128xf32, #tpu.memory_space<vmem>>, %arg7: memref<1x288x128xf32, #tpu.memory_space<vmem>>) attributes {dimension_semantics = [#tpu.dimension_semantics<parallel>, #tpu.dimension_semantics<parallel>], iteration_bounds = array<i64: 1, 2>, scalar_prefetch = 0 : i64, scratch_operands = 0 : i64, tpu.core_type = #tpu.core_type<tc>, window_params = [{transform_indices = @transform_0, window_bounds = array<i64: 1, 288, 128>}, {transform_indices = @transform_1, window_bounds = array<i64: 1, 128>}, {transform_indices = @transform_2, window_bounds = array<i64: 1, 128>}, {transform_indices = @transform_3, window_bounds = array<i64: 1, 128>}, {transform_indices = @transform_4, window_bounds = array<i64: 1, 128>}, {transform_indices = @transform_5, window_bounds = array<i64: 1, 288, 128>}]} {
    %c0 = arith.constant 0 : index
    %c0_0 = arith.constant 0 : index
    %0 = vector.load %arg3[%c0, %c0_0] : memref<1x128xf32, #tpu.memory_space<vmem>>, vector<1x128xf32>
    %cst = arith.constant 0.001953125 : f32
    %1 = vector.broadcast %cst : f32 to vector<1x128xf32>
    %2 = arith.mulf %0, %1 : vector<1x128xf32>
    %c0_1 = arith.constant 0 : index
    %c0_2 = arith.constant 0 : index
    %3 = vector.load %arg4[%c0_1, %c0_2] : memref<1x128xf32, #tpu.memory_space<vmem>>, vector<1x128xf32>
    %cst_3 = arith.constant 0.001953125 : f32
    %4 = vector.broadcast %cst_3 : f32 to vector<1x128xf32>
    %5 = arith.mulf %3, %4 : vector<1x128xf32>
    %6 = arith.mulf %2, %2 : vector<1x128xf32>
    %7 = arith.subf %5, %6 : vector<1x128xf32>
    %cst_4 = arith.constant 0.000000e+00 : f32
    %8 = vector.broadcast %cst_4 : f32 to vector<1x128xf32>
    %9 = arith.maximumf %7, %8 : vector<1x128xf32>
    %c0_5 = arith.constant 0 : index
    %c0_6 = arith.constant 0 : index
    %10 = vector.load %arg5[%c0_5, %c0_6] : memref<1x128xf32, #tpu.memory_space<vmem>>, vector<1x128xf32>
    %cst_7 = arith.constant 9.99999974E-6 : f32
    %11 = vector.broadcast %cst_7 : f32 to vector<1x128xf32>
    %12 = arith.addf %9, %11 : vector<1x128xf32>
    %13 = math.rsqrt %12 : vector<1x128xf32>
    %14 = arith.mulf %10, %13 : vector<1x128xf32>
    %c0_8 = arith.constant 0 : index
    %c0_9 = arith.constant 0 : index
    %15 = vector.load %arg6[%c0_8, %c0_9] : memref<1x128xf32, #tpu.memory_space<vmem>>, vector<1x128xf32>
    %16 = arith.mulf %2, %14 : vector<1x128xf32>
    %17 = arith.subf %15, %16 : vector<1x128xf32>
    %c0_10 = arith.constant 0 : index
    %c0_11 = arith.constant 0 : index
    %c0_12 = arith.constant 0 : index
    %18 = vector.load %arg2[%c0_10, %c0_11, %c0_12] : memref<1x288x128xf32, #tpu.memory_space<vmem>>, vector<1x288x128xf32>
    %19 = vector.shape_cast %18 : vector<1x288x128xf32> to vector<288x128xf32>
    %20 = vector.broadcast %14 : vector<1x128xf32> to vector<288x128xf32>
    %21 = arith.mulf %19, %20 : vector<288x128xf32>
    %22 = vector.broadcast %17 : vector<1x128xf32> to vector<288x128xf32>
    %23 = arith.addf %21, %22 : vector<288x128xf32>
    %cst_13 = arith.constant 0.000000e+00 : f32
    %24 = vector.broadcast %cst_13 : f32 to vector<288x128xf32>
    %25 = arith.maximumf %23, %24 : vector<288x128xf32>
    %c0_14 = arith.constant 0 : index
    %c0_15 = arith.constant 0 : index
    %c0_16 = arith.constant 0 : index
    %26 = vector.load %arg7[%c0_14, %c0_15, %c0_16] : memref<1x288x128xf32, #tpu.memory_space<vmem>>, vector<1x288x128xf32>
    %27 = vector.shape_cast %26 : vector<1x288x128xf32> to vector<288x128xf32>
    %28 = vector.shape_cast %25 : vector<288x128xf32> to vector<1x288x128xf32>
    tpu.vector_store %arg7[%c0_14, %c0_15, %c0_16], %28 {strides = array<i32>} : memref<1x288x128xf32, #tpu.memory_space<vmem>>, vector<1x288x128xf32>,
    return
  }
  func.func @transform_0(%arg0: i32, %arg1: i32) -> (i32, i32, i32) {
    %c0_i32 = arith.constant 0 : i32
    %c0_i32_0 = arith.constant 0 : i32
    return %arg1, %c0_i32, %arg0 : i32, i32, i32
  }
  func.func @transform_1(%arg0: i32, %arg1: i32) -> (i32, i32) {
    %c0_i32 = arith.constant 0 : i32
    %c0_i32_0 = arith.constant 0 : i32
    return %c0_i32, %arg0 : i32, i32
  }
  func.func @transform_2(%arg0: i32, %arg1: i32) -> (i32, i32) {
    %c0_i32 = arith.constant 0 : i32
    %c0_i32_0 = arith.constant 0 : i32
    return %c0_i32, %arg0 : i32, i32
  }
  func.func @transform_3(%arg0: i32, %arg1: i32) -> (i32, i32) {
    %c0_i32 = arith.constant 0 : i32
    %c0_i32_0 = arith.constant 0 : i32
    return %c0_i32, %arg0 : i32, i32
  }
  func.func @transform_4(%arg0: i32, %arg1: i32) -> (i32, i32) {
    %c0_i32 = arith.constant 0 : i32
    %c0_i32_0 = arith.constant 0 : i32
    return %c0_i32, %arg0 : i32, i32
  }
  func.func @transform_5(%arg0: i32, %arg1: i32) -> (i32, i32, i32) {
    %c0_i32 = arith.constant 0 : i32
    %c0_i32_0 = arith.constant 0 : i32
    return %arg1, %c0_i32, %arg0 : i32, i32, i32
  }
}

module attributes {stable_mosaic.version = 11 : i64} {
  func.func @conv_stats_kernel(%arg0: i32, %arg1: i32, %arg2: memref<1x332x4xbf16, #tpu.memory_space<vmem>>, %arg3: memref<9x4x128xbf16, #tpu.memory_space<vmem>>, %arg4: memref<288x1xf32, #tpu.memory_space<vmem>>, %arg5: memref<1x288x128xf32, #tpu.memory_space<vmem>>, %arg6: memref<1x128xf32, #tpu.memory_space<vmem>>, %arg7: memref<1x128xf32, #tpu.memory_space<vmem>>) attributes {dimension_semantics = [#tpu.dimension_semantics<parallel>, #tpu.dimension_semantics<arbitrary>], iteration_bounds = array<i64: 1, 2>, scalar_prefetch = 0 : i64, scratch_operands = 0 : i64, tpu.core_type = #tpu.core_type<tc>, window_params = [{transform_indices = @transform_0, window_bounds = array<i64: 1, 332, 4>}, {transform_indices = @transform_1, window_bounds = array<i64: 9, 4, 128>}, {pipeline_mode = #tpu.pipeline_mode<synchronous>, transform_indices = @transform_2, window_bounds = array<i64: 288, 1>}, {transform_indices = @transform_3, window_bounds = array<i64: 1, 288, 128>}, {transform_indices = @transform_4, window_bounds = array<i64: 1, 128>}, {transform_indices = @transform_5, window_bounds = array<i64: 1, 128>}]} {
    %c0 = arith.constant 0 : index
    %c0_0 = arith.constant 0 : index
    %c0_1 = arith.constant 0 : index
    %0 = vector.load %arg2[%c0, %c0_0, %c0_1] : memref<1x332x4xbf16, #tpu.memory_space<vmem>>, vector<1x288x4xbf16>
    %1 = vector.shape_cast %0 : vector<1x288x4xbf16> to vector<288x4xbf16>
    %c0_2 = arith.constant 0 : index
    %c0_3 = arith.constant 0 : index
    %c0_4 = arith.constant 0 : index
    %2 = vector.load %arg3[%c0_2, %c0_3, %c0_4] : memref<9x4x128xbf16, #tpu.memory_space<vmem>>, vector<1x4x128xbf16>
    %3 = vector.shape_cast %2 : vector<1x4x128xbf16> to vector<4x128xbf16>
    %cst = arith.constant dense<0.000000e+00> : vector<288x128xf32>
    %4 = tpu.matmul %1, %3, %cst {dimension_numbers = #tpu.dot_dimension_numbers<[1], [0], [0], [1], [0, 0, 1, 1], [], []>} : vector<288x4xbf16>, vector<4x128xbf16>, vector<288x128xf32> -> vector<288x128xf32>
    %c0_5 = arith.constant 0 : index
    %c1 = arith.constant 1 : index
    %c0_6 = arith.constant 0 : index
    %5 = vector.load %arg2[%c0_5, %c1, %c0_6] : memref<1x332x4xbf16, #tpu.memory_space<vmem>>, vector<1x288x4xbf16>
    %6 = vector.shape_cast %5 : vector<1x288x4xbf16> to vector<288x4xbf16>
    %c1_7 = arith.constant 1 : index
    %c0_8 = arith.constant 0 : index
    %c0_9 = arith.constant 0 : index
    %7 = vector.load %arg3[%c1_7, %c0_8, %c0_9] : memref<9x4x128xbf16, #tpu.memory_space<vmem>>, vector<1x4x128xbf16>
    %8 = vector.shape_cast %7 : vector<1x4x128xbf16> to vector<4x128xbf16>
    %cst_10 = arith.constant dense<0.000000e+00> : vector<288x128xf32>
    %9 = tpu.matmul %6, %8, %cst_10 {dimension_numbers = #tpu.dot_dimension_numbers<[1], [0], [0], [1], [0, 0, 1, 1], [], []>} : vector<288x4xbf16>, vector<4x128xbf16>, vector<288x128xf32> -> vector<288x128xf32>
    %10 = arith.addf %4, %9 : vector<288x128xf32>
    %c0_11 = arith.constant 0 : index
    %c2 = arith.constant 2 : index
    %c0_12 = arith.constant 0 : index
    %11 = vector.load %arg2[%c0_11, %c2, %c0_12] : memref<1x332x4xbf16, #tpu.memory_space<vmem>>, vector<1x288x4xbf16>
    %12 = vector.shape_cast %11 : vector<1x288x4xbf16> to vector<288x4xbf16>
    %c2_13 = arith.constant 2 : index
    %c0_14 = arith.constant 0 : index
    %c0_15 = arith.constant 0 : index
    %13 = vector.load %arg3[%c2_13, %c0_14, %c0_15] : memref<9x4x128xbf16, #tpu.memory_space<vmem>>, vector<1x4x128xbf16>
    %14 = vector.shape_cast %13 : vector<1x4x128xbf16> to vector<4x128xbf16>
    %cst_16 = arith.constant dense<0.000000e+00> : vector<288x128xf32>
    %15 = tpu.matmul %12, %14, %cst_16 {dimension_numbers = #tpu.dot_dimension_numbers<[1], [0], [0], [1], [0, 0, 1, 1], [], []>} : vector<288x4xbf16>, vector<4x128xbf16>, vector<288x128xf32> -> vector<288x128xf32>
    %16 = arith.addf %10, %15 : vector<288x128xf32>
    %c0_17 = arith.constant 0 : index
    %c18 = arith.constant 18 : index
    %c0_18 = arith.constant 0 : index
    %17 = vector.load %arg2[%c0_17, %c18, %c0_18] : memref<1x332x4xbf16, #tpu.memory_space<vmem>>, vector<1x288x4xbf16>
    %18 = vector.shape_cast %17 : vector<1x288x4xbf16> to vector<288x4xbf16>
    %c3 = arith.constant 3 : index
    %c0_19 = arith.constant 0 : index
    %c0_20 = arith.constant 0 : index
    %19 = vector.load %arg3[%c3, %c0_19, %c0_20] : memref<9x4x128xbf16, #tpu.memory_space<vmem>>, vector<1x4x128xbf16>
    %20 = vector.shape_cast %19 : vector<1x4x128xbf16> to vector<4x128xbf16>
    %cst_21 = arith.constant dense<0.000000e+00> : vector<288x128xf32>
    %21 = tpu.matmul %18, %20, %cst_21 {dimension_numbers = #tpu.dot_dimension_numbers<[1], [0], [0], [1], [0, 0, 1, 1], [], []>} : vector<288x4xbf16>, vector<4x128xbf16>, vector<288x128xf32> -> vector<288x128xf32>
    %22 = arith.addf %16, %21 : vector<288x128xf32>
    %c0_22 = arith.constant 0 : index
    %c19 = arith.constant 19 : index
    %c0_23 = arith.constant 0 : index
    %23 = vector.load %arg2[%c0_22, %c19, %c0_23] : memref<1x332x4xbf16, #tpu.memory_space<vmem>>, vector<1x288x4xbf16>
    %24 = vector.shape_cast %23 : vector<1x288x4xbf16> to vector<288x4xbf16>
    %c4 = arith.constant 4 : index
    %c0_24 = arith.constant 0 : index
    %c0_25 = arith.constant 0 : index
    %25 = vector.load %arg3[%c4, %c0_24, %c0_25] : memref<9x4x128xbf16, #tpu.memory_space<vmem>>, vector<1x4x128xbf16>
    %26 = vector.shape_cast %25 : vector<1x4x128xbf16> to vector<4x128xbf16>
    %cst_26 = arith.constant dense<0.000000e+00> : vector<288x128xf32>
    %27 = tpu.matmul %24, %26, %cst_26 {dimension_numbers = #tpu.dot_dimension_numbers<[1], [0], [0], [1], [0, 0, 1, 1], [], []>} : vector<288x4xbf16>, vector<4x128xbf16>, vector<288x128xf32> -> vector<288x128xf32>
    %28 = arith.addf %22, %27 : vector<288x128xf32>
    %c0_27 = arith.constant 0 : index
    %c20 = arith.constant 20 : index
    %c0_28 = arith.constant 0 : index
    %29 = vector.load %arg2[%c0_27, %c20, %c0_28] : memref<1x332x4xbf16, #tpu.memory_space<vmem>>, vector<1x288x4xbf16>
    %30 = vector.shape_cast %29 : vector<1x288x4xbf16> to vector<288x4xbf16>
    %c5 = arith.constant 5 : index
    %c0_29 = arith.constant 0 : index
    %c0_30 = arith.constant 0 : index
    %31 = vector.load %arg3[%c5, %c0_29, %c0_30] : memref<9x4x128xbf16, #tpu.memory_space<vmem>>, vector<1x4x128xbf16>
    %32 = vector.shape_cast %31 : vector<1x4x128xbf16> to vector<4x128xbf16>
    %cst_31 = arith.constant dense<0.000000e+00> : vector<288x128xf32>
    %33 = tpu.matmul %30, %32, %cst_31 {dimension_numbers = #tpu.dot_dimension_numbers<[1], [0], [0], [1], [0, 0, 1, 1], [], []>} : vector<288x4xbf16>, vector<4x128xbf16>, vector<288x128xf32> -> vector<288x128xf32>
    %34 = arith.addf %28, %33 : vector<288x128xf32>
    %c0_32 = arith.constant 0 : index
    %c36 = arith.constant 36 : index
    %c0_33 = arith.constant 0 : index
    %35 = vector.load %arg2[%c0_32, %c36, %c0_33] : memref<1x332x4xbf16, #tpu.memory_space<vmem>>, vector<1x288x4xbf16>
    %36 = vector.shape_cast %35 : vector<1x288x4xbf16> to vector<288x4xbf16>
    %c6 = arith.constant 6 : index
    %c0_34 = arith.constant 0 : index
    %c0_35 = arith.constant 0 : index
    %37 = vector.load %arg3[%c6, %c0_34, %c0_35] : memref<9x4x128xbf16, #tpu.memory_space<vmem>>, vector<1x4x128xbf16>
    %38 = vector.shape_cast %37 : vector<1x4x128xbf16> to vector<4x128xbf16>
    %cst_36 = arith.constant dense<0.000000e+00> : vector<288x128xf32>
    %39 = tpu.matmul %36, %38, %cst_36 {dimension_numbers = #tpu.dot_dimension_numbers<[1], [0], [0], [1], [0, 0, 1, 1], [], []>} : vector<288x4xbf16>, vector<4x128xbf16>, vector<288x128xf32> -> vector<288x128xf32>
    %40 = arith.addf %34, %39 : vector<288x128xf32>
    %c0_37 = arith.constant 0 : index
    %c37 = arith.constant 37 : index
    %c0_38 = arith.constant 0 : index
    %41 = vector.load %arg2[%c0_37, %c37, %c0_38] : memref<1x332x4xbf16, #tpu.memory_space<vmem>>, vector<1x288x4xbf16>
    %42 = vector.shape_cast %41 : vector<1x288x4xbf16> to vector<288x4xbf16>
    %c7 = arith.constant 7 : index
    %c0_39 = arith.constant 0 : index
    %c0_40 = arith.constant 0 : index
    %43 = vector.load %arg3[%c7, %c0_39, %c0_40] : memref<9x4x128xbf16, #tpu.memory_space<vmem>>, vector<1x4x128xbf16>
    %44 = vector.shape_cast %43 : vector<1x4x128xbf16> to vector<4x128xbf16>
    %cst_41 = arith.constant dense<0.000000e+00> : vector<288x128xf32>
    %45 = tpu.matmul %42, %44, %cst_41 {dimension_numbers = #tpu.dot_dimension_numbers<[1], [0], [0], [1], [0, 0, 1, 1], [], []>} : vector<288x4xbf16>, vector<4x128xbf16>, vector<288x128xf32> -> vector<288x128xf32>
    %46 = arith.addf %40, %45 : vector<288x128xf32>
    %c0_42 = arith.constant 0 : index
    %c38 = arith.constant 38 : index
    %c0_43 = arith.constant 0 : index
    %47 = vector.load %arg2[%c0_42, %c38, %c0_43] : memref<1x332x4xbf16, #tpu.memory_space<vmem>>, vector<1x288x4xbf16>
    %48 = vector.shape_cast %47 : vector<1x288x4xbf16> to vector<288x4xbf16>
    %c8 = arith.constant 8 : index
    %c0_44 = arith.constant 0 : index
    %c0_45 = arith.constant 0 : index
    %49 = vector.load %arg3[%c8, %c0_44, %c0_45] : memref<9x4x128xbf16, #tpu.memory_space<vmem>>, vector<1x4x128xbf16>
    %50 = vector.shape_cast %49 : vector<1x4x128xbf16> to vector<4x128xbf16>
    %cst_46 = arith.constant dense<0.000000e+00> : vector<288x128xf32>
    %51 = tpu.matmul %48, %50, %cst_46 {dimension_numbers = #tpu.dot_dimension_numbers<[1], [0], [0], [1], [0, 0, 1, 1], [], []>} : vector<288x4xbf16>, vector<4x128xbf16>, vector<288x128xf32> -> vector<288x128xf32>
    %52 = arith.addf %46, %51 : vector<288x128xf32>
    %c0_47 = arith.constant 0 : index
    %c0_48 = arith.constant 0 : index
    %c0_49 = arith.constant 0 : index
    %53 = vector.load %arg5[%c0_47, %c0_48, %c0_49] : memref<1x288x128xf32, #tpu.memory_space<vmem>>, vector<1x288x128xf32>
    %54 = vector.shape_cast %53 : vector<1x288x128xf32> to vector<288x128xf32>
    %55 = vector.shape_cast %52 : vector<288x128xf32> to vector<1x288x128xf32>
    tpu.vector_store %arg5[%c0_47, %c0_48, %c0_49], %55 {strides = array<i32>} : memref<1x288x128xf32, #tpu.memory_space<vmem>>, vector<1x288x128xf32>,
    %c0_i32 = arith.constant 0 : i32
    %56 = arith.cmpi eq, %arg1, %c0_i32 : i32
    %57 = arith.extui %56 : i1 to i32
    %c0_i32_50 = arith.constant 0 : i32
    %58 = arith.cmpi ne, %57, %c0_i32_50 : i32
    scf.if %58 {
      %cst_63 = arith.constant 0.000000e+00 : f32
      %73 = vector.broadcast %cst_63 : f32 to vector<1x128xf32>
      %c0_64 = arith.constant 0 : index
      %c0_65 = arith.constant 0 : index
      %74 = vector.load %arg6[%c0_64, %c0_65] : memref<1x128xf32, #tpu.memory_space<vmem>>, vector<1x128xf32>
      tpu.vector_store %arg6[%c0_64, %c0_65], %73 {strides = array<i32>} : memref<1x128xf32, #tpu.memory_space<vmem>>, vector<1x128xf32>,
      %cst_66 = arith.constant 0.000000e+00 : f32
      %75 = vector.broadcast %cst_66 : f32 to vector<1x128xf32>
      %c0_67 = arith.constant 0 : index
      %c0_68 = arith.constant 0 : index
      %76 = vector.load %arg7[%c0_67, %c0_68] : memref<1x128xf32, #tpu.memory_space<vmem>>, vector<1x128xf32>
      tpu.vector_store %arg7[%c0_67, %c0_68], %75 {strides = array<i32>} : memref<1x128xf32, #tpu.memory_space<vmem>>, vector<1x128xf32>,
    } else {
    }
    %c0_51 = arith.constant 0 : index
    %c0_52 = arith.constant 0 : index
    %59 = vector.load %arg4[%c0_51, %c0_52] : memref<288x1xf32, #tpu.memory_space<vmem>>, vector<288x1xf32>
    %60 = vector.broadcast %59 : vector<288x1xf32> to vector<288x128xf32>
    %61 = arith.mulf %52, %60 : vector<288x128xf32>
    %c0_53 = arith.constant 0 : index
    %c0_54 = arith.constant 0 : index
    %62 = vector.load %arg6[%c0_53, %c0_54] : memref<1x128xf32, #tpu.memory_space<vmem>>, vector<1x128xf32>
    %cst_55 = arith.constant dense<0.000000e+00> : vector<128xf32>
    %63 = vector.multi_reduction <add>, %61, %cst_55 [0] : vector<288x128xf32> to vector<128xf32>
    %64 = vector.shape_cast %63 : vector<128xf32> to vector<1x128xf32>
    %65 = arith.addf %62, %64 : vector<1x128xf32>
    %c0_56 = arith.constant 0 : index
    %c0_57 = arith.constant 0 : index
    %66 = vector.load %arg6[%c0_56, %c0_57] : memref<1x128xf32, #tpu.memory_space<vmem>>, vector<1x128xf32>
    tpu.vector_store %arg6[%c0_56, %c0_57], %65 {strides = array<i32>} : memref<1x128xf32, #tpu.memory_space<vmem>>, vector<1x128xf32>,
    %c0_58 = arith.constant 0 : index
    %c0_59 = arith.constant 0 : index
    %67 = vector.load %arg7[%c0_58, %c0_59] : memref<1x128xf32, #tpu.memory_space<vmem>>, vector<1x128xf32>
    %68 = arith.mulf %61, %61 : vector<288x128xf32>
    %cst_60 = arith.constant dense<0.000000e+00> : vector<128xf32>
    %69 = vector.multi_reduction <add>, %68, %cst_60 [0] : vector<288x128xf32> to vector<128xf32>
    %70 = vector.shape_cast %69 : vector<128xf32> to vector<1x128xf32>
    %71 = arith.addf %67, %70 : vector<1x128xf32>
    %c0_61 = arith.constant 0 : index
    %c0_62 = arith.constant 0 : index
    %72 = vector.load %arg7[%c0_61, %c0_62] : memref<1x128xf32, #tpu.memory_space<vmem>>, vector<1x128xf32>
    tpu.vector_store %arg7[%c0_61, %c0_62], %71 {strides = array<i32>} : memref<1x128xf32, #tpu.memory_space<vmem>>, vector<1x128xf32>,
    return
  }
  func.func @transform_0(%arg0: i32, %arg1: i32) -> (i32, i32, i32) {
    %c0_i32 = arith.constant 0 : i32
    %c0_i32_0 = arith.constant 0 : i32
    %c0_i32_1 = arith.constant 0 : i32
    return %arg1, %c0_i32, %c0_i32_0 : i32, i32, i32
  }
  func.func @transform_1(%arg0: i32, %arg1: i32) -> (i32, i32, i32) {
    %c0_i32 = arith.constant 0 : i32
    %c0_i32_0 = arith.constant 0 : i32
    %c0_i32_1 = arith.constant 0 : i32
    return %c0_i32, %c0_i32_0, %arg0 : i32, i32, i32
  }
  func.func @transform_2(%arg0: i32, %arg1: i32) -> (i32, i32) {
    %c0_i32 = arith.constant 0 : i32
    %c0_i32_0 = arith.constant 0 : i32
    %c0_i32_1 = arith.constant 0 : i32
    return %c0_i32, %c0_i32_0 : i32, i32
  }
  func.func @transform_3(%arg0: i32, %arg1: i32) -> (i32, i32, i32) {
    %c0_i32 = arith.constant 0 : i32
    %c0_i32_0 = arith.constant 0 : i32
    return %arg1, %c0_i32, %arg0 : i32, i32, i32
  }
  func.func @transform_4(%arg0: i32, %arg1: i32) -> (i32, i32) {
    %c0_i32 = arith.constant 0 : i32
    %c0_i32_0 = arith.constant 0 : i32
    return %c0_i32, %arg0 : i32, i32
  }
  func.func @transform_5(%arg0: i32, %arg1: i32) -> (i32, i32) {
    %c0_i32 = arith.constant 0 : i32
    %c0_i32_0 = arith.constant 0 : i32
    return %c0_i32, %arg0 : i32, i32
  }
}

</mosaic_0001>

<bundles_post_ra>
// kernel: conv_block_forward.3
= control target key start
LH: loop header
LB: loop body
LE: loop exit
PB: predicated region body
PF: predicated region fallthrough
CT: control target
= control target key end

     0   :  { %s747_s18 = smov 0   ;;  %s749_s19 = smov 0   ;;  %s951_s0 = inlined_call_operand.vmem [shape: f32[2,288,128], index: 0, kind: input, shape index: {}]   ;;  %s952_s1 = inlined_call_operand.vmem [shape: f32[1,128], index: 1, kind: input, shape index: {}]   ;;  %s953_s2 = inlined_call_operand.vmem [shape: f32[1,128], index: 2, kind: input, shape index: {}]   ;;  %s954_s3 = inlined_call_operand.vmem [shape: f32[1,128], index: 3, kind: input, shape index: {}]   ;;  %s955_s4 = inlined_call_operand.vmem [shape: f32[1,128], index: 4, kind: input, shape index: {}]   ;;  %s956_s5 = inlined_call_operand.vmem [shape: f32[2,288,128], index: 5, kind: output, shape index: {}]  }
   0x1   :  { %s751_s20 = smov 0  }
   0x2 LB: > { %s24_s21 = sadd.s32 1, %s711_s19  ;;  %p661_p0 = scmp.ge.s32.totalorder %s715_s20, 1  ;;  %s715_s20 = sphi %s751_s20, %s15_s20   ;;  %s711_s19 = sphi %s749_s19, %s958_s19   ;;  %s707_s18 = sphi %s747_s18, %s957_s18  }
   0x3   : > { %p25_p1 = scmp.ge.s32.totalorder %s24_s21, 2  ;;  %p238_p2 = scmp.lt.s32.totalorder %s715_s20, 3 }
   0x5   : > { %s960_s21 = smov (%p25_p1, %s24_s21), 0  ;;  %p239_p3 = pnand %p661_p0, %p238_p2 }
   0x6   : > { %p284_p4 = scmp.lt.s32.totalorder (!%p239_p3), %s707_s18, 1 }
   0x7   : > { %242 = sbr.rel (%p239_p3) target bundleno = 89 (0x59), region = 40 }
   0xc   : > { %v312_v0 = vld [vmem:[%s952_s1] sm:$0x1]  ;;  %s962_s18 = smov (!%p284_p4, %s707_s18), 1 }
   0xd   : > { %v314_v1 = vld [vmem:[%s953_s2] sm:$0x1]  ;;  %v313_v2 = vmul.f32 0.001953125, %v312_v0  ;;  %s666_s26 = smul.u32 288, %s962_s18 }
   0xe   : > { %v315_v3 = vmul.f32 0.001953125, %v314_v1  ;;  %v319_v13 = vld [vmem:[%s954_s3] sm:$0x1] }
   0xf   : > { %v316_v4 = vmul.f32 %v313_v2, %v313_v2  ;;  %s782_s6 = scalar_lea.vmem %s951_s0, %s666_s26  ;;  %v332_v17 = vld [vmem:[%s955_s4] sm:$0x1]  ;;  %s821_s11 = scalar_lea.vmem %s956_s5, %s666_s26 }
  0x10   : > { %v335_v18 = vld [vmem:[%s782_s6] sm:$0xff]  ;;  %v336_v19 = vld [vmem:[%s782_s6 + $0x8] sm:$0xff]  ;;  %v337_v20 = vld [vmem:[%s782_s6 + $0x10] sm:$0xff] }
  0x11   : > { %v317_v5 = vsub.f32 %v315_v3, %v316_v4  ;;  %v338_v23 = vld [vmem:[%s782_s6 + $0x18] sm:$0xff]  ;;  %v339_v24 = vld [vmem:[%s782_s6 + $0x20] sm:$0xff]  ;;  %v340_v25 = vld [vmem:[%s782_s6 + $0x28] sm:$0xff] }
  0x12   : > { %v341_v26 = vld [vmem:[%s782_s6 + $0x30] sm:$0xff]  ;;  %v342_v31 = vld [vmem:[%s782_s6 + $0x38] sm:$0xff]  ;;  %v343_v32 = vld [vmem:[%s782_s6 + $0x40] sm:$0xff] }
  0x13   : > { %v318_v6 = vmax.f32 %v317_v5, 0.0  ;;  %v344_v38 = vld [vmem:[%s782_s6 + $0x48] sm:$0xff]  ;;  %v345_v39 = vld [vmem:[%s782_s6 + $0x50] sm:$0xff]  ;;  %v346_v46 = vld [vmem:[%s782_s6 + $0x58] sm:$0xff] }
  0x14   : > { %v347_v51 = vld [vmem:[%s782_s6 + $0x60] sm:$0xff]  ;;  %v348_v56 = vld [vmem:[%s782_s6 + $0x68] sm:$0xff]  ;;  %v349_v60 = vld [vmem:[%s782_s6 + $0x70] sm:$0xff] }
  0x15   : > { %v320_v7 = vadd.f32 1e-05, %v318_v6  ;;  %v350_v0 = vld [vmem:[%s782_s6 + $0x78] sm:$0xff]  ;;  %v351_v4 = vld [vmem:[%s782_s6 + $0x80] sm:$0xff] }
  0x17   : > { %691 = vrsqrt.f32 %v320_v7  ;;  %vm327_vm0 = vweird.f32 %v320_v7 }
  0x1d   : > { %v692_v8 = vpop.eup %691 }
  0x1e   : > { %v322_v9 = vmul.f32 %v692_v8, %v320_v7  ;;  %vm328_vm1 = vweird.f32 %v692_v8 }
  0x1f   : > { %vm329_vm2 = vmor %vm327_vm0, %vm328_vm1 }
  0x20   : > { %v323_v10 = vmul.f32 %v692_v8, %v322_v9 }
  0x22   : > { %v324_v11 = vmul.f32 0.5, %v323_v10 }
  0x24   : > { %v325_v12 = vsub.f32 1.5, %v324_v11 }
  0x26   : > { %v326_v14 = vmul.f32 %v692_v8, %v325_v12  ;;  %v353_v12 = vld [vmem:[%s782_s6 + $0x90] sm:$0xff] }
  0x28   : > { %v330_v15 = vsel %vm329_vm2, %v692_v8, %v326_v14  ;;  %v352_v8 = vld [vmem:[%s782_s6 + $0x88] sm:$0xff] }
  0x29   : > { %v331_v16 = vmul.f32 %v330_v15, %v319_v13 }
  0x2b   : > { %v333_v21 = vmul.f32 %v331_v16, %v313_v2  ;;  %v790_v22 = vperm.slane %v331_v16, 0  ;;  %v354_v16 = vld [vmem:[%s782_s6 + $0x98] sm:$0xff] }
  0x2d   : > { %v334_v27 = vsub.f32 %v332_v17, %v333_v21  ;;  %v374_v28 = vmul.f32 %v790_v22, %v335_v18  ;;  %v375_v29 = vmul.f32 %v790_v22, %v336_v19  ;;  %v376_v30 = vmul.f32 %v790_v22, %v337_v20  ;;  %v355_v20 = vld [vmem:[%s782_s6 + $0xa0] sm:$0xff] }
  0x2e   : > { %v377_v33 = vmul.f32 %v790_v22, %v338_v23  ;;  %v378_v34 = vmul.f32 %v790_v22, %v339_v24  ;;  %v379_v35 = vmul.f32 %v790_v22, %v340_v25  ;;  %v380_v37 = vmul.f32 %v790_v22, %v341_v26  ;;  %v356_v25 = vld [vmem:[%s782_s6 + $0xa8] sm:$0xff] }
  0x2f   : > { %v804_v36 = vperm.slane %v334_v27, 0  ;;  %v381_v40 = vmul.f32 %v790_v22, %v342_v31  ;;  %v382_v41 = vmul.f32 %v790_v22, %v343_v32  ;;  %v383_v49 = vmul.f32 %v790_v22, %v344_v38  ;;  %v359_v38 = vld [vmem:[%s782_s6 + $0xc0] sm:$0xff] }
  0x30   : > { %v384_v50 = vmul.f32 %v790_v22, %v345_v39  ;;  %v385_v59 = vmul.f32 %v790_v22, %v346_v46  ;;  %v386_v63 = vmul.f32 %v790_v22, %v347_v51  ;;  %v387_v3 = vmul.f32 %v790_v22, %v348_v56  ;;  %v361_v46 = vld [vmem:[%s782_s6 + $0xd0] sm:$0xff] }
  0x31   : > { %v413_v42 = vadd.f32 %v804_v36, %v374_v28  ;;  %v414_v43 = vadd.f32 %v804_v36, %v375_v29  ;;  %v415_v44 = vadd.f32 %v804_v36, %v376_v30  ;;  %v416_v45 = vadd.f32 %v804_v36, %v377_v33  ;;  %v357_v29 = vld [vmem:[%s782_s6 + $0xb0] sm:$0xff]  ;;  %v358_v33 = vld [vmem:[%s782_s6 + $0xb8] sm:$0xff] }
  0x32   : > { %v417_v47 = vadd.f32 %v804_v36, %v378_v34  ;;  %v418_v48 = vadd.f32 %v804_v36, %v379_v35  ;;  %v419_v55 = vadd.f32 %v804_v36, %v380_v37  ;;  %v420_v58 = vadd.f32 %v804_v36, %v381_v40 }
  0x33   : > { %v449_v52 = vmax.f32 %v413_v42, 0.0  ;;  %v450_v53 = vmax.f32 %v414_v43, 0.0  ;;  %v451_v54 = vmax.f32 %v415_v44, 0.0  ;;  %v452_v57 = vmax.f32 %v416_v45, 0.0  ;;  %v360_v42 = vld [vmem:[%s782_s6 + $0xc8] sm:$0xff] }
  0x34   : > { %v453_v61 = vmax.f32 %v417_v47, 0.0  ;;  %v421_v62 = vadd.f32 %v804_v36, %v382_v41  ;;  %v454_v1 = vmax.f32 %v418_v48, 0.0  ;;  %v422_v2 = vadd.f32 %v804_v36, %v383_v49 }
  0x35   : > { %485 = vst [vmem:[%s821_s11] sm:$0xff] %v449_v52  ;;  %v455_v5 = vmax.f32 %v419_v55, 0.0  ;;  %v423_v6 = vadd.f32 %v804_v36, %v384_v50  ;;  %v388_v7 = vmul.f32 %v790_v22, %v349_v60  ;;  %v456_v9 = vmax.f32 %v420_v58, 0.0  ;;  %v362_v50 = vld [vmem:[%s782_s6 + $0xd8] sm:$0xff]  ;;  %v364_v58 = vld [vmem:[%s782_s6 + $0xe8] sm:$0xff] }
  0x36   : > { %486 = vst [vmem:[%s821_s11 + $0x8] sm:$0xff] %v450_v53  ;;  %v424_v10 = vadd.f32 %v804_v36, %v385_v59  ;;  %v389_v11 = vmul.f32 %v790_v22, %v350_v0  ;;  %v457_v13 = vmax.f32 %v421_v62, 0.0  ;;  %v425_v14 = vadd.f32 %v804_v36, %v386_v63  ;;  %v365_v62 = vld [vmem:[%s782_s6 + $0xf0] sm:$0xff] }
  0x37   : > { %487 = vst [vmem:[%s821_s11 + $0x10] sm:$0xff] %v451_v54  ;;  %v390_v15 = vmul.f32 %v790_v22, %v351_v4  ;;  %v458_v17 = vmax.f32 %v422_v2, 0.0  ;;  %v426_v18 = vadd.f32 %v804_v36, %v387_v3  ;;  %v391_v19 = vmul.f32 %v790_v22, %v352_v8  ;;  %v363_v54 = vld [vmem:[%s782_s6 + $0xe0] sm:$0xff]  ;;  %v366_v2 = vld [vmem:[%s782_s6 + $0xf8] sm:$0xff] }
  0x38   : > { %488 = vst [vmem:[%s821_s11 + $0x18] sm:$0xff] %v452_v57  ;;  %v459_v21 = vmax.f32 %v423_v6, 0.0  ;;  %v427_v23 = vadd.f32 %v804_v36, %v388_v7  ;;  %v392_v24 = vmul.f32 %v790_v22, %v353_v12  ;;  %v460_v26 = vmax.f32 %v424_v10, 0.0  ;;  %v367_v6 = vld [vmem:[%s782_s6 + $0x100] sm:$0xff]  ;;  %v368_v10 = vld [vmem:[%s782_s6 + $0x108] sm:$0xff] }
  0x39   : > { %489 = vst [vmem:[%s821_s11 + $0x20] sm:$0xff] %v453_v61  ;;  %v428_v27 = vadd.f32 %v804_v36, %v389_v11  ;;  %v393_v28 = vmul.f32 %v790_v22, %v354_v16  ;;  %v461_v30 = vmax.f32 %v425_v14, 0.0  ;;  %v429_v31 = vadd.f32 %v804_v36, %v390_v15  ;;  %v369_v14 = vld [vmem:[%s782_s6 + $0x110] sm:$0xff] }
  0x3a   : > { %490 = vst [vmem:[%s821_s11 + $0x28] sm:$0xff] %v454_v1  ;;  %v394_v32 = vmul.f32 %v790_v22, %v355_v20  ;;  %v462_v34 = vmax.f32 %v426_v18, 0.0  ;;  %v430_v35 = vadd.f32 %v804_v36, %v391_v19  ;;  %v395_v37 = vmul.f32 %v790_v22, %v356_v25  ;;  %v370_v18 = vld [vmem:[%s782_s6 + $0x118] sm:$0xff] }
  0x3b   : > { %491 = vst [vmem:[%s821_s11 + $0x30] sm:$0xff] %v455_v5  ;;  %v463_v39 = vmax.f32 %v427_v23, 0.0  ;;  %v431_v40 = vadd.f32 %v804_v36, %v392_v24  ;;  %v396_v41 = vmul.f32 %v790_v22, %v357_v29  ;;  %v464_v43 = vmax.f32 %v428_v27, 0.0 }
  0x3c   : > { %492 = vst [vmem:[%s821_s11 + $0x38] sm:$0xff] %v456_v9  ;;  %v432_v44 = vadd.f32 %v804_v36, %v393_v28  ;;  %v397_v45 = vmul.f32 %v790_v22, %v358_v33  ;;  %v465_v47 = vmax.f32 %v429_v31, 0.0  ;;  %v433_v48 = vadd.f32 %v804_v36, %v394_v32 }
  0x3d   : > { %493 = vst [vmem:[%s821_s11 + $0x40] sm:$0xff] %v457_v13  ;;  %v398_v49 = vmul.f32 %v790_v22, %v359_v38  ;;  %v466_v51 = vmax.f32 %v430_v35, 0.0  ;;  %v434_v52 = vadd.f32 %v804_v36, %v395_v37  ;;  %v399_v53 = vmul.f32 %v790_v22, %v360_v42 }
  0x3e   : > { %494 = vst [vmem:[%s821_s11 + $0x48] sm:$0xff] %v458_v17  ;;  %v467_v55 = vmax.f32 %v431_v40, 0.0  ;;  %v435_v56 = vadd.f32 %v804_v36, %v396_v41  ;;  %v400_v57 = vmul.f32 %v790_v22, %v361_v46  ;;  %v468_v59 = vmax.f32 %v432_v44, 0.0 }
  0x3f   : > { %495 = vst [vmem:[%s821_s11 + $0x50] sm:$0xff] %v459_v21  ;;  %v436_v60 = vadd.f32 %v804_v36, %v397_v45  ;;  %v401_v61 = vmul.f32 %v790_v22, %v362_v50  ;;  %v469_v63 = vmax.f32 %v433_v48, 0.0  ;;  %v437_v0 = vadd.f32 %v804_v36, %v398_v49 }
  0x40   : > { %496 = vst [vmem:[%s821_s11 + $0x58] sm:$0xff] %v460_v26  ;;  %v402_v1 = vmul.f32 %v790_v22, %v363_v54  ;;  %v470_v3 = vmax.f32 %v434_v52, 0.0  ;;  %v438_v4 = vadd.f32 %v804_v36, %v399_v53  ;;  %v403_v5 = vmul.f32 %v790_v22, %v364_v58 }
  0x41   : > { %497 = vst [vmem:[%s821_s11 + $0x60] sm:$0xff] %v461_v30  ;;  %v471_v7 = vmax.f32 %v435_v56, 0.0  ;;  %v439_v8 = vadd.f32 %v804_v36, %v400_v57  ;;  %v404_v9 = vmul.f32 %v790_v22, %v365_v62  ;;  %v472_v11 = vmax.f32 %v436_v60, 0.0 }
  0x42   : > { %498 = vst [vmem:[%s821_s11 + $0x68] sm:$0xff] %v462_v34  ;;  %v440_v12 = vadd.f32 %v804_v36, %v401_v61  ;;  %v405_v13 = vmul.f32 %v790_v22, %v366_v2  ;;  %v473_v15 = vmax.f32 %v437_v0, 0.0  ;;  %v441_v16 = vadd.f32 %v804_v36, %v402_v1 }
  0x43   : > { %499 = vst [vmem:[%s821_s11 + $0x70] sm:$0xff] %v463_v39  ;;  %v406_v17 = vmul.f32 %v790_v22, %v367_v6  ;;  %v474_v19 = vmax.f32 %v438_v4, 0.0  ;;  %v442_v20 = vadd.f32 %v804_v36, %v403_v5  ;;  %v407_v21 = vmul.f32 %v790_v22, %v368_v10 }
  0x44   : > { %500 = vst [vmem:[%s821_s11 + $0x78] sm:$0xff] %v464_v43  ;;  %v475_v23 = vmax.f32 %v439_v8, 0.0  ;;  %v443_v24 = vadd.f32 %v804_v36, %v404_v9  ;;  %v408_v25 = vmul.f32 %v790_v22, %v369_v14  ;;  %v476_v26 = vmax.f32 %v440_v12, 0.0 }
  0x45   : > { %501 = vst [vmem:[%s821_s11 + $0x80] sm:$0xff] %v465_v47  ;;  %v444_v27 = vadd.f32 %v804_v36, %v405_v13  ;;  %v409_v28 = vmul.f32 %v790_v22, %v370_v18  ;;  %v477_v29 = vmax.f32 %v441_v16, 0.0  ;;  %v445_v30 = vadd.f32 %v804_v36, %v406_v17 }
  0x46   : > { %502 = vst [vmem:[%s821_s11 + $0x88] sm:$0xff] %v466_v51  ;;  %v478_v31 = vmax.f32 %v442_v20, 0.0  ;;  %v446_v32 = vadd.f32 %v804_v36, %v407_v21  ;;  %v479_v33 = vmax.f32 %v443_v24, 0.0  ;;  %v447_v34 = vadd.f32 %v804_v36, %v408_v25 }
  0x47   : > { %503 = vst [vmem:[%s821_s11 + $0x90] sm:$0xff] %v467_v55  ;;  %v480_v22 = vmax.f32 %v444_v27, 0.0  ;;  %v448_v35 = vadd.f32 %v804_v36, %v409_v28  ;;  %v481_v37 = vmax.f32 %v445_v30, 0.0 }
  0x48   : > { %504 = vst [vmem:[%s821_s11 + $0x98] sm:$0xff] %v468_v59  ;;  %v482_v38 = vmax.f32 %v446_v32, 0.0  ;;  %v483_v39 = vmax.f32 %v447_v34, 0.0 }
  0x49   : > { %505 = vst [vmem:[%s821_s11 + $0xa0] sm:$0xff] %v469_v63  ;;  %v484_v40 = vmax.f32 %v448_v35, 0.0 }
  0x4a   : > { %506 = vst [vmem:[%s821_s11 + $0xa8] sm:$0xff] %v470_v3 }
  0x4b   : > { %507 = vst [vmem:[%s821_s11 + $0xb0] sm:$0xff] %v471_v7 }
  0x4c   : > { %508 = vst [vmem:[%s821_s11 + $0xb8] sm:$0xff] %v472_v11 }
  0x4d   : > { %509 = vst [vmem:[%s821_s11 + $0xc0] sm:$0xff] %v473_v15 }
  0x4e   : > { %510 = vst [vmem:[%s821_s11 + $0xc8] sm:$0xff] %v474_v19 }
  0x4f   : > { %511 = vst [vmem:[%s821_s11 + $0xd0] sm:$0xff] %v475_v23 }
  0x50   : > { %512 = vst [vmem:[%s821_s11 + $0xd8] sm:$0xff] %v476_v26 }
  0x51   : > { %513 = vst [vmem:[%s821_s11 + $0xe0] sm:$0xff] %v477_v29 }
  0x52   : > { %514 = vst [vmem:[%s821_s11 + $0xe8] sm:$0xff] %v478_v31 }
  0x53   : > { %515 = vst [vmem:[%s821_s11 + $0xf0] sm:$0xff] %v479_v33 }
  0x54   : > { %516 = vst [vmem:[%s821_s11 + $0xf8] sm:$0xff] %v480_v22 }
  0x55   : > { %517 = vst [vmem:[%s821_s11 + $0x100] sm:$0xff] %v481_v37 }
  0x56   : > { %518 = vst [vmem:[%s821_s11 + $0x108] sm:$0xff] %v482_v38 }
  0x57   : > { %519 = vst [vmem:[%s821_s11 + $0x110] sm:$0xff] %v483_v39 }
  0x58   : > { %520 = vst [vmem:[%s821_s11 + $0x118] sm:$0xff] %v484_v40 }
  0x59 PF: > { %s15_s20 = sadd.s32 1, %s715_s20   ;;  %s957_s18 = smov %s711_s19 }
  0x5a   : > { %p12_p5 = scmp.ge.s32.totalorder %s15_s20, 4   ;;  %s958_s19 = smov %s960_s21 }
  0x5c   :  { %14 = sbr.rel (!%p12_p5) target bundleno = 2 (0x2), region = 82 }

// kernel: conv_block_forward.2
= control target key start
LH: loop header
LB: loop body
LE: loop exit
PB: predicated region body
PF: predicated region fallthrough
CT: control target
= control target key end

     0   :  { %s4136_s18 = smov 0   ;;  %s4138_s19 = smov 0   ;;  %s5407_s0 = inlined_call_operand.vmem [shape: bf16[2,332,4], index: 0, kind: input, shape index: {}]   ;;  %s5408_s1 = inlined_call_operand.vmem [shape: bf16[9,4,128], index: 1, kind: input, shape index: {}]   ;;  %s5409_s2 = inlined_call_operand.vmem [shape: f32[288,1], index: 2, kind: input, shape index: {}]   ;;  %s5410_s3 = inlined_call_operand.vmem [shape: f32[2,288,128], index: 3, kind: output, shape index: {0}]   ;;  %s5411_s4 = inlined_call_operand.vmem [shape: f32[1,128], index: 4, kind: output, shape index: {1}]   ;;  %s5412_s5 = inlined_call_operand.vmem [shape: f32[1,128], index: 5, kind: output, shape index: {2}]  }
   0x1   :  { %s4140_s20 = smov 0  }
   0x2 LB: > { %s25_s21 = sadd.s32 1, %s4098_s19  ;;  %p3586_p0 = scmp.ge.s32.totalorder %s4102_s20, 1  ;;  %s4102_s20 = sphi %s4140_s20, %s16_s20   ;;  %s4098_s19 = sphi %s4138_s19, %s5444_s19   ;;  %s4094_s18 = sphi %s4136_s18, %s5443_s18  }
   0x3   : > { %p26_p1 = scmp.ge.s32.totalorder %s25_s21, 2  ;;  %p215_p2 = scmp.lt.s32.totalorder %s4102_s20, 3 }
   0x5   : > { %s5446_s21 = smov (%p26_p1, %s25_s21), 0  ;;  %p216_p3 = pnand %p3586_p0, %p215_p2 }
   0x7   : > { %219 = sbr.rel (%p216_p3) target bundleno = 1049 (0x419), region = 32 }
   0xc   : > { %v3589_v0 = vld [vmem:[%s5408_s1 + $0x2] sm:$0x3]  ;;  %vm617_vm0 = vcmask 1041408   ;;  %p256_p4 = scmp.lt.s32.totalorder %s4094_s18, 1  ;;  %v3694_v2 = vld [vmem:[%s5408_s1 + $0x4] sm:$0x3] }
   0xd   : > { %v619_v1 = vsel %vm617_vm0, %v3589_v0, 0  ;;  %v316_v3 = vld [vmem:[%s5408_s1] sm:$0x3]  ;;  %v957_v4 = vsel %vm617_vm0, %v3694_v2, 0  ;;  %v3800_v6 = vld [vmem:[%s5408_s1 + $0x8] sm:$0x3] }
   0xe   : > { %4026 = vmatpush.bf16.msra.mxu1 %v619_v1  ;;  %4027 = vmatpush.bf16.msra.mxu2 %v619_v1  ;;  %s4168_s28 = scalar_select %p256_p4, %s4094_s18, 1  ;;  %v757_v5 = vsel %vm617_vm0, %v316_v3, 0  ;;  %v1687_v7 = vsel %vm617_vm0, %v3800_v6, 0  ;;  %vm413_vm1 = vsmask.f32 7424  ;;  %vm562_vm2 = vcmask 31744  }
   0xf   : > { %628 = vmatpush.bf16.msra.mxu0 %v619_v1  ;;  %4028 = vmatpush.bf16.msra.mxu3 %v619_v1  ;;  %v3713_v45 = vld [vmem:[%s5408_s1 + $0x6] sm:$0x3]  ;;  %vm864_vm3 = vcmask 1046528   ;;  %vm1461_vm4 = vsmask.f32 6400  ;;  %vm1830_vm6 = vcmask 1045504  }
  0x10   : > { %s4029_s6 = smul.u32 168, %s4168_s28  ;;  %v1318_v53 = vsel %vm617_vm0, %v3713_v45, 0  ;;  %vm2427_vm5 = vsmask.f32 5376  ;;  %vm2796_vm7 = vcmask 1044480   ;;  %p3963_p5 = scmp.ne.s32.totalorder %s4094_s18, 0 }
  0x11   : > { %s4030_s24 = smul.u32 288, %s4168_s28 }
  0x12   : > { %966 = vmatpush.bf16.msrb.mxu2 %v957_v4  ;;  %766 = vmatpush.bf16.msrb.mxu1 %v757_v5  ;;  %s4180_s9 = scalar_lea.vmem %s5407_s0, %s4029_s6 }
  0x13   : > { %1696 = vmatpush.bf16.msrb.mxu0 %v1687_v7  ;;  %v4183_v8 = vld [vmem:[%s4180_s9 + $0x28] sm:$0xff]  ;;  %v4186_v9 = vld [vmem:[%s4180_s9 + $0x30] sm:$0xff]  ;;  %v4192_v11 = vld [vmem:[%s4180_s9 + $0x58] sm:$0xff]  ;;  %1327 = vmatpush.bf16.msrb.mxu3 %v1318_v53  ;;  %s4923_s27 = scalar_lea.vmem %s5410_s3, %s4030_s24 }
  0x14   : > { %v4189_v10 = vld [vmem:[%s4180_s9 + $0x50] sm:$0xff]  ;;  %v4195_v12 = vld [vmem:[%s4180_s9] sm:$0xff]   ;;  %v4198_v13 = vld [vmem:[%s4180_s9 + $0x8] sm:$0xff]  ;;  %v454_v14 = vshll.u32 %v4183_v8, 16  ;;  %v458_v15 = vshrl.u32 %v4183_v8, 16  ;;  %v462_v16 = vshll.u32 %v4186_v9, 16 }
  0x15   : > { %v494_v17 = vshll.u32 %v4189_v10, 16  ;;  %v498_v18 = vshrl.u32 %v4189_v10, 16  ;;  %v502_v19 = vshll.u32 %v4192_v11, 16  ;;  %v415_v20 = vshrl.u32 %v4195_v12, 16  ;;  %v4216_v31 = vld [vmem:[%s4180_s9 + $0x78] sm:$0xff]  ;;  %v3983_v32 = vld [vmem:[%s4180_s9 + $0x80] sm:$0xff] }
  0x16   : > { %v417_v21 = vshll.u32 %v4195_v12, 16  ;;  %v4208_v22 = vrot.slane %v454_v14, 1  ;;  %v464_v23 = vrot.slane %v462_v16, 1  ;;  %v422_v25 = vshll.u32 %v4198_v13, 16  ;;  %v4225_v37 = vld [vmem:[%s4180_s9 + $0x38] sm:$0xff]  ;;  %v4229_v38 = vld [vmem:[%s4180_s9 + $0x60] sm:$0xff] }
  0x17   : > { %v4210_v24 = vrot.slane %v494_v17, 1  ;;  %v504_v26 = vrot.slane %v502_v19, 1  ;;  %v534_v39 = vshll.u32 %v4216_v31, 16  ;;  %v538_v40 = vshrl.u32 %v4216_v31, 16  ;;  %v4234_v42 = vld [vmem:[%s4180_s9 + $0x10] sm:$0xff]  ;;  %v3984_v59 = vld [vmem:[%s4180_s9 + $0x88] sm:$0xff] }
  0x18   : > { %v419_v27 = vrot.slane %v417_v21, 1  ;;  %v460_v28 = vor.u32 %v458_v15, %v4208_v22  ;;  %v424_v30 = vrot.slane %v422_v25, 1  ;;  %v542_v41 = vshll.u32 %v3983_v32, 16  ;;  %v4253_v60 = vld [vmem:[%s4180_s9 + $0x48] sm:$0xff]  ;;  %v4262_v5 = vld [vmem:[%s4180_s9 + $0x40] sm:$0xff]  ;;  %v4270_v17 = vld [vmem:[%s4180_s9 + $0x18] sm:$0xff] }
  0x19   : > { %v500_v29 = vor.u32 %v498_v18, %v4210_v24  ;;  %v4236_v43 = vrot.slane %v534_v39, 1  ;;  %v466_v46 = vshrl.u32 %v4186_v9, 16  ;;  %v470_v47 = vshll.u32 %v4225_v37, 16  ;;  %v4265_v6 = vld [vmem:[%s4180_s9 + $0x68] sm:$0xff]  ;;  %v317_v18 = vld [vmem:[%s4180_s9 + $0x90] sm:$0x1] }
  0x1a   : > { %v420_v33 = vor.u32 %v419_v27, %v415_v20  ;;  %v465_v34 = vsel %vm413_vm1, %v460_v28, %v464_v23  ;;  %v544_v44 = vrot.slane %v542_v41, 1  ;;  %v506_v48 = vshrl.u32 %v4192_v11, 16  ;;  %v4279_v27 = vld [vmem:[%s4180_s9 + $0x20] sm:$0xff] }
  0x1b   : > { %v505_v35 = vsel %vm413_vm1, %v500_v29, %v504_v26  ;;  %3663 = vmatmul.msk.bf16.vlgmr.msra.gmra.mxu1 %vm562_vm2, %v465_v34  ;;  %v510_v49 = vshll.u32 %v4229_v38, 16  ;;  %v540_v50 = vor.u32 %v538_v40, %v4236_v43  ;;  %v426_v51 = vshrl.u32 %v4198_v13, 16 }
  0x1c   : > { %3668 = vmatmul.msk.bf16.vlgmr.msra.gmra.mxu2 %vm562_vm2, %v505_v35  ;;  %v425_v36 = vsel %vm413_vm1, %v420_v33, %v424_v30  ;;  %v430_v52 = vshll.u32 %v4234_v42, 16  ;;  %v468_v55 = vor.u32 %v466_v46, %v464_v23  ;;  %v472_v56 = vrot.slane %v470_v47, 1 }
  0x1d   : > { %3658 = vmatmul.msk.bf16.vlgmr.msra.gmra.mxu0 %vm562_vm2, %v425_v36  ;;  %v545_v54 = vsel %vm413_vm1, %v540_v50, %v544_v44  ;;  %v508_v57 = vor.u32 %v506_v48, %v504_v26  ;;  %v512_v58 = vrot.slane %v510_v49, 1  ;;  %v428_v61 = vor.u32 %v426_v51, %v424_v30 }
  0x1e   : > { %3673 = vmatmul.msk.bf16.vlgmr.msra.gmra.mxu3 %vm562_vm2, %v545_v54  ;;  %v432_v62 = vrot.slane %v430_v52, 1  ;;  %v473_v63 = vsel %vm413_vm1, %v468_v55, %v472_v56  ;;  %v546_v1 = vshrl.u32 %v3983_v32, 16  ;;  %v550_v2 = vshll.u32 %v3984_v59, 16  ;;  %v4300_v52 = vld [vmem:[%s4180_s9 + $0x70] sm:$0xff] }
  0x1f   : > { %v513_v0 = vsel %vm413_vm1, %v508_v57, %v512_v58  ;;  %v486_v3 = vshll.u32 %v4253_v60, 16  ;;  %v490_v16 = vshrl.u32 %v4253_v60, 16  ;;  %v474_v20 = vshrl.u32 %v4225_v37, 16 }
  0x20   : > { %v433_v4 = vsel %vm413_vm1, %v428_v61, %v432_v62  ;;  %v548_v7 = vor.u32 %v546_v1, %v544_v44  ;;  %v552_v14 = vrot.slane %v550_v2, 1  ;;  %v478_v21 = vshll.u32 %v4262_v5, 16 }
  0x21   : > { %v488_v15 = vrot.slane %v486_v3, 1  ;;  %v514_v23 = vshrl.u32 %v4229_v38, 16  ;;  %v518_v25 = vshll.u32 %v4265_v6, 16  ;;  %v393_v28 = vunpack.c.l.b16 %v317_v18 }
  0x22   : > { %v553_v26 = vsel %vm413_vm1, %v548_v7, %v552_v14  ;;  %v434_v30 = vshrl.u32 %v4234_v42, 16  ;;  %v438_v32 = vshll.u32 %v4270_v17, 16  ;;  %v476_v33 = vor.u32 %v474_v20, %v472_v56  ;;  %v3985_v7 = vld [vmem:[%s4180_s9 + $0x10] sm:$0xff] }
  0x23   : > { %v492_v19 = vor.u32 %v490_v16, %v488_v15  ;;  %v480_v34 = vrot.slane %v478_v21, 1  ;;  %v516_v35 = vor.u32 %v514_v23, %v512_v58  ;;  %v520_v36 = vrot.slane %v518_v25, 1  ;;  %v3838_v21 = vld [vmem:[%s5408_s1 + $0xc] sm:$0x3]  ;;  %v3925_v25 = vld [vmem:[%s5408_s1 + $0xe] sm:$0x3] }
  0x24   : > { %v446_v39 = vshll.u32 %v4279_v27, 16  ;;  %v4289_v40 = vpack.c.b16 %v393_v28, %v393_v28  ;;  %v436_v41 = vor.u32 %v434_v30, %v432_v62  ;;  %v440_v44 = vrot.slane %v438_v32, 1  ;;  %v1094_v62 = vld [vmem:[%s4180_s9 + $0x8] sm:$0xe]  ;;  %v3944_v32 = vld [vmem:[%s5408_s1 + $0x10] sm:$0x3] }
  0x25   : > { %v4283_v29 = vsel %vm413_vm1, %v492_v19, %v4210_v24  ;;  %v481_v24 = vsel %vm413_vm1, %v476_v33, %v480_v34  ;;  %v521_v45 = vsel %vm413_vm1, %v516_v35, %v520_v36  ;;  %v554_v47 = vshrl.u32 %v3984_v59, 16 }
  0x26   : > { %v448_v46 = vrot.slane %v446_v39, 1  ;;  %v558_v48 = vshll.u32 %v4289_v40, 16  ;;  %v450_v49 = vshrl.u32 %v4279_v27, 16  ;;  %v441_v50 = vsel %vm413_vm1, %v436_v41, %v440_v44  ;;  %v3986_v41 = vld [vmem:[%s4180_s9 + $0x18] sm:$0xff] }
  0x27   : > { %v556_v53 = vor.u32 %v554_v47, %v552_v14  ;;  %v482_v56 = vshrl.u32 %v4262_v5, 16  ;;  %v522_v57 = vshrl.u32 %v4265_v6, 16  ;;  %v526_v58 = vshll.u32 %v4300_v52, 16 }
  0x28   : > { %v452_v51 = vor.u32 %v450_v49, %v448_v46  ;;  %v560_v54 = vrot.slane %v558_v48, 1  ;;  %v442_v61 = vshrl.u32 %v4270_v17, 16  ;;  %v1170_v3 = vunpack.c.l.b16 %v1094_v62 }
  0x29   : > { %v524_v1 = vor.u32 %v522_v57, %v520_v36  ;;  %v528_v2 = vrot.slane %v526_v58, 1  ;;  %v1227_v20 = vrot.slane %v3985_v7, 1  ;;  %v2653_v28 = vsel %vm617_vm0, %v3925_v25, 0 }
  0x2a   : > { %v457_v55 = vsel %vm413_vm1, %v452_v51, %v4208_v22  ;;  %v561_v59 = vsel %vm413_vm1, %v556_v53, %v560_v54  ;;  %2662 = vmatpush.bf16.msra.mxu3 %v2653_v28  ;;  %v2889_v33 = vsel %vm617_vm0, %v3944_v32, 0  ;;  %v1471_v48 = vshrl.u32 %v3985_v7, 16 }
  0x2b   : > { %3664 = vmatmul.msk.bf16.gmra.mxu1 %vm562_vm2, %v473_v63  ;;  %v4311_v63 = vld [vmem:[%s4180_s9 + $0xc] sm:$0xf]  ;;  %v529_v16 = vsel %vm413_vm1, %v524_v1, %v528_v2  ;;  %2898 = vmatpush.bf16.msra.mxu0 %v2889_v33  ;;  %v1474_v49 = vshll.u32 %v3985_v7, 16  ;;  %v1480_v1 = vshrl.u32 %v3986_v41, 16  ;;  %v870_v28 = vrot.slane %v4270_v17, 1  ;;  %v3989_v33 = vld [vmem:[%s4180_s9 + $0x30] sm:$0xff] }
  0x2c   : > { %3669 = vmatmul.msk.bf16.gmra.mxu2 %vm562_vm2, %v513_v0  ;;  %v484_v0 = vor.u32 %v482_v56, %v480_v34  ;;  %v5413_v22 = vunpack.c.l.b16 %v4311_v63  ;;  %v530_v34 = vshrl.u32 %v4300_v52, 16  ;;  %v1473_v54 = vrot.slane %v1471_v48, 1 }
  0x2d   : > { %3659 = vmatmul.msk.bf16.gmra.mxu0 %vm562_vm2, %v433_v4  ;;  %v444_v4 = vor.u32 %v442_v61, %v440_v44  ;;  %v4023_v44 = vld [vmem:[%s4180_s9] sm:$0xf0]  ;;  %v1476_v56 = vrot.slane %v1474_v49, 2 }
  0x2e   : > { %3674 = vmatmul.msk.bf16.gmra.mxu3 %vm562_vm2, %v553_v26  ;;  %v489_v14 = vsel %vm413_vm1, %v484_v0, %v488_v15  ;;  %v1207_v18 = vpack.c.b16 %v5413_v22, %v1170_v3  ;;  %v2284_v15 = vsel %vm617_vm0, %v3838_v21, 0  ;;  %v3819_v26 = vld [vmem:[%s5408_s1 + $0xa] sm:$0x3]  ;;  %v532_v36 = vor.u32 %v530_v34, %v528_v2  ;;  %v3987_v61 = vld [vmem:[%s4180_s9 + $0x20] sm:$0xff] }
  0x2f   : > { %v449_v19 = vsel %vm413_vm1, %v444_v4, %v448_v46  ;;  %2293 = vmatpush.bf16.msra.mxu2 %v2284_v15  ;;  %v1923_v30 = vsel %vm617_vm0, %v3819_v26, 0  ;;  %v1477_v58 = vor.u32 %v1476_v56, %v1473_v54  ;;  %v1231_v0 = vrot.slane %v3987_v61, 1  ;;  %v3995_v22 = vld [vmem:[%s4180_s9 + $0x60] sm:$0xff] }
  0x30   : > { %v1226_v23 = vrot.slane %v1207_v18, 1  ;;  %1932 = vmatpush.bf16.msra.mxu1 %v1923_v30  ;;  %v537_v39 = vsel %vm413_vm1, %v532_v36, %v4236_v43  ;;  %v1463_v46 = vshrl.u32 %v1207_v18, 16  ;;  %v1466_v47 = vshll.u32 %v1207_v18, 16 }
  0x31   : > { %v1483_v2 = vshll.u32 %v3986_v41, 16  ;;  %v1482_v4 = vrot.slane %v1480_v1, 1  ;;  %v1489_v21 = vshrl.u32 %v3987_v61, 16  ;;  %v1235_v34 = vrot.slane %v3989_v33, 1  ;;  %v3991_v1 = vld [vmem:[%s4180_s9 + $0x40] sm:$0xff] }
  0x32   : > { %v1228_v35 = vsel %vm864_vm3, %v1226_v23, %v1227_v20  ;;  %v1465_v43 = vrot.slane %v1463_v46, 1  ;;  %v1468_v53 = vrot.slane %v1466_v47, 2  ;;  %v1492_v23 = vshll.u32 %v3987_v61, 16  ;;  %v3990_v47 = vld [vmem:[%s4180_s9 + $0x38] sm:$0xff] }
  0x33   : > { %v1485_v7 = vrot.slane %v1483_v2, 2  ;;  %v1491_v25 = vrot.slane %v1489_v21, 1 }
  0x34   : > { %v1469_v57 = vor.u32 %v1468_v53, %v1465_v43  ;;  %v1494_v26 = vrot.slane %v1492_v23, 2  ;;  %v1510_v43 = vshll.u32 %v3989_v33, 16  ;;  %v876_v23 = vrot.slane %v4186_v9, 1 }
  0x36   : > { %v1478_v62 = vsel %vm1461_vm4, %v1469_v57, %v1477_v58  ;;  %v1495_v30 = vor.u32 %v1494_v26, %v1491_v25  ;;  %v1512_v57 = vrot.slane %v1510_v43, 2 }
  0x3b   : > { %3665 = vmatmul.msk.bf16.gmra.mxu1 %vm562_vm2, %v481_v24  ;;  %v1229_v24 = vrot.slane %v3986_v41, 1 }
  0x3c   : > { %3670 = vmatmul.msk.bf16.gmra.mxu2 %vm562_vm2, %v521_v45  ;;  %v4024_v45 = vld [vmem:[%s4180_s9] sm:$0xe] }
  0x3d   : > { %3660 = vmatmul.msk.bf16.gmra.mxu0 %vm562_vm2, %v441_v50  ;;  %v4025_v50 = vor.u32 %v4024_v45, %v4023_v44  ;;  %v1230_v51 = vsel %vm864_vm3, %v1227_v20, %v1229_v24  ;;  %v1232_v3 = vsel %vm864_vm3, %v1229_v24, %v1231_v0  ;;  %v872_v24 = vrot.slane %v4279_v27, 1 }
  0x3e   : > { %3675 = vmatmul.msk.bf16.gmra.mxu3 %vm562_vm2, %v561_v59 }
  0x4b   : > { %3666 = vmatmul.msk.bf16.gmra.mxu1 %vm562_vm2, %v489_v14  ;;  %v868_v14 = vrot.slane %v4234_v42, 1 }
  0x4c   : > { %3671 = vmatmul.msk.bf16.gmra.mxu2 %vm562_vm2, %v529_v16  ;;  %v1486_v16 = vor.u32 %v1485_v7, %v1482_v4  ;;  %v1239_v4 = vrot.slane %v3991_v1, 1  ;;  %v1516_v7 = vshrl.u32 %v3990_v47, 16 }
  0x4d   : > { %3661 = vmatmul.msk.bf16.gmra.mxu0 %vm562_vm2, %v449_v19  ;;  %v871_v32 = vsel %vm864_vm3, %v868_v14, %v870_v28 }
  0x4e   : > { %3782 = vmatmul.msk.bf16.vlgmr.msrb.gmra.mxu3 %vm562_vm2, %v1228_v35  ;;  %v1487_v19 = vsel %vm1461_vm4, %v1477_v58, %v1486_v16  ;;  %v1518_v21 = vrot.slane %v1516_v7, 1 }
  0x5b   : > { %3667 = vmatmul.msk.bf16.gmra.mxu1 %vm562_vm2, %v4283_v29  ;;  %v865_v29 = vrot.slane %v4025_v50, 1  ;;  %v1237_v50 = vrot.slane %v3990_v47, 1 }
  0x5c   : > { %3672 = vmatmul.msk.bf16.gmra.mxu2 %vm562_vm2, %v537_v39 }
  0x5d   : > { %3662 = vmatmul.msk.bf16.gmra.mxu0 %vm562_vm2, %v457_v55  ;;  %v866_v55 = vrot.slane %v4198_v13, 1  ;;  %v1238_v56 = vsel %vm864_vm3, %v1235_v34, %v1237_v50 }
  0x5e   : > { %3783 = vmatmul.msk.bf16.gmra.mxu3 %vm562_vm2, %v1230_v51  ;;  %v1507_v51 = vshrl.u32 %v3989_v33, 16 }
  0x5f   : > { %v867_v59 = vsel %vm864_vm3, %v865_v29, %v866_v55  ;;  %v869_v18 = vsel %vm864_vm3, %v866_v55, %v868_v14  ;;  %v1519_v14 = vshll.u32 %v3990_v47, 16  ;;  %v878_v47 = vrot.slane %v4225_v37, 1 }
  0x60   : > { %v1509_v55 = vrot.slane %v1507_v51, 1 }
  0x62   : > { %v1513_v58 = vor.u32 %v1512_v57, %v1509_v55  ;;  %v3993_v55 = vld [vmem:[%s4180_s9 + $0x50] sm:$0xff] }
  0x6b   : > { %3676 = vmatmul.msk.bf16.vlgmr.msrb.gmra.mxu1 %vm562_vm2, %v4195_v12  ;;  %v3988_v12 = vld [vmem:[%s4180_s9 + $0x28] sm:$0xff] }
  0x6c   : > { %3695 = vmatmul.msk.bf16.vlgmr.msrb.gmra.mxu2 %vm562_vm2, %v867_v59  ;;  %v1233_v20 = vrot.slane %v3988_v12, 1  ;;  %v1498_v35 = vshrl.u32 %v3988_v12, 16  ;;  %v1501_v36 = vshll.u32 %v3988_v12, 16 }
  0x6d   : > { %3801 = vmatmul.msk.bf16.vlgmr.msrb.gmra.mxu0 %vm562_vm2, %v1478_v62 }
  0x6e   : > { %3784 = vmatmul.msk.bf16.gmra.mxu3 %vm562_vm2, %v1232_v3  ;;  %v1234_v15 = vsel %vm864_vm3, %v1231_v0, %v1233_v20  ;;  %v1236_v39 = vsel %vm864_vm3, %v1233_v20, %v1235_v34  ;;  %v1500_v41 = vrot.slane %v1498_v35, 1  ;;  %v1503_v44 = vrot.slane %v1501_v36, 2 }
  0x6f   : > { %v1525_v35 = vshrl.u32 %v3991_v1, 16  ;;  %v1528_v36 = vshll.u32 %v3991_v1, 16 }
  0x70   : > { %v1504_v45 = vor.u32 %v1503_v44, %v1500_v41 }
  0x72   : > { %v1505_v49 = vsel %vm1461_vm4, %v1495_v30, %v1504_v45  ;;  %v1514_v3 = vsel %vm1461_vm4, %v1504_v45, %v1513_v58 }
  0x7b   : > { %3677 = vmatmul.msk.bf16.gmra.mxu1 %vm562_vm2, %v4198_v13  ;;  %v1496_v13 = vsel %vm1461_vm4, %v1486_v16, %v1495_v30 }
  0x7c   : > { %3696 = vmatmul.msk.bf16.gmra.mxu2 %vm562_vm2, %v869_v18 }
  0x7d   : > { %3802 = vmatmul.msk.bf16.gmra.mxu0 %vm562_vm2, %v1487_v19  ;;  %v1240_v19 = vsel %vm864_vm3, %v1237_v50, %v1239_v4 }
  0x7e   : > { %3785 = vmatmul.msk.bf16.gmra.mxu3 %vm562_vm2, %v1234_v15 }
  0x8b   : > { %3678 = vmatmul.msk.bf16.gmra.mxu1 %vm562_vm2, %v4234_v42  ;;  %v873_v42 = vsel %vm864_vm3, %v870_v28, %v872_v24 }
  0x8c   : > { %3697 = vmatmul.msk.bf16.gmra.mxu2 %vm562_vm2, %v871_v32  ;;  %v3992_v32 = vld [vmem:[%s4180_s9 + $0x48] sm:$0xff] }
  0x8d   : > { %3803 = vmatmul.msk.bf16.gmra.mxu0 %vm562_vm2, %v1496_v13  ;;  %v1241_v34 = vrot.slane %v3992_v32, 1  ;;  %v1537_v1 = vshll.u32 %v3992_v32, 16 }
  0x8e   : > { %3786 = vmatmul.msk.bf16.gmra.mxu3 %vm562_vm2, %v1236_v39 }
  0x98   : > { %v4385_v46 = vpop.f32.mrf.mxu1 }
  0x9a   : > { %v4389_v48 = vpop.f32.mrf.mxu0 }
  0x9b   : > { %3679 = vmatmul.msk.bf16.gmra.mxu1 %vm562_vm2, %v4270_v17  ;;  %v874_v17 = vrot.slane %v4183_v8, 1 }
  0x9c   : > { %3698 = vmatmul.msk.bf16.gmra.mxu2 %vm562_vm2, %v873_v42  ;;  %v1527_v42 = vrot.slane %v1525_v35, 1  ;;  %v3994_v35 = vld [vmem:[%s4180_s9 + $0x58] sm:$0xff] }
  0x9d   : > { %3804 = vmatmul.msk.bf16.gmra.mxu0 %vm562_vm2, %v1505_v49  ;;  %v875_v0 = vsel %vm864_vm3, %v872_v24, %v874_v17  ;;  %v877_v30 = vsel %vm864_vm3, %v874_v17, %v876_v23  ;;  %v1242_v24 = vsel %vm864_vm3, %v1239_v4, %v1241_v34 }
  0x9e   : > { %3787 = vmatmul.msk.bf16.gmra.mxu3 %vm562_vm2, %v1238_v56  ;;  %v879_v56 = vsel %vm864_vm3, %v876_v23, %v878_v47 }
  0x9f   : > { %v4396_v53 = vpop.f32.mrf.mxu2 }
  0xa0   : > { %v4398_v54 = vpop.f32.mrf.mxu1 }
  0xa1   : > { %v4407_v61 = vpop.f32.mrf.mxu3 }
  0xa2   : > { %v4401_v29 = vpop.f32.mrf.mxu0  ;;  %5417 = vst [vmem:[#allocation2_spill] sm:$0xff] %v4407_v61 }
  0xa7   : > { %v4405_v59 = vpop.f32.mrf.mxu2 }
  0xa8   : > { %v4409_v62 = vpop.f32.mrf.mxu1 }
  0xa9   : > { %v4422_v18 = vpop.f32.mrf.mxu3 }
  0xaa   : > { %v4413_v2 = vpop.f32.mrf.mxu0  ;;  %5418 = vst [vmem:[#allocation3_spill] sm:$0xff] %v4422_v18 }
  0xab   : > { %3680 = vmatmul.msk.bf16.gmra.mxu1 %vm562_vm2, %v4279_v27  ;;  %v1521_v27 = vrot.slane %v1519_v14, 2 }
  0xac   : > { %3699 = vmatmul.msk.bf16.gmra.mxu2 %vm562_vm2, %v875_v0  ;;  %v1534_v0 = vshrl.u32 %v3992_v32, 16 }
  0xad   : > { %3805 = vmatmul.msk.bf16.gmra.mxu0 %vm562_vm2, %v1514_v3  ;;  %v1522_v15 = vor.u32 %v1521_v27, %v1518_v21  ;;  %v880_v27 = vrot.slane %v4262_v5, 1 }
  0xae   : > { %3788 = vmatmul.msk.bf16.gmra.mxu3 %vm562_vm2, %v1240_v19  ;;  %v1536_v21 = vrot.slane %v1534_v0, 1 }
  0xaf   : > { %v4420_v16 = vpop.f32.mrf.mxu2  ;;  %v1523_v13 = vsel %vm1461_vm4, %v1513_v58, %v1522_v15  ;;  %v1243_v58 = vrot.slane %v3993_v55, 1 }
  0xb0   : > { %v4424_v12 = vpop.f32.mrf.mxu1 }
  0xb1   : > { %v4433_v26 = vpop.f32.mrf.mxu3  ;;  %v1244_v14 = vsel %vm864_vm3, %v1241_v34, %v1243_v58 }
  0xb2   : > { %v4427_v20 = vpop.f32.mrf.mxu0  ;;  %5419 = vst [vmem:[#allocation4_spill] sm:$0xff] %v4433_v26 }
  0xb7   : > { %v4431_v25 = vpop.f32.mrf.mxu2 }
  0xb8   : > { %v4435_v28 = vpop.f32.mrf.mxu1 }
  0xb9   : > { %v4448_v41 = vpop.f32.mrf.mxu3 }
  0xba   : > { %v4439_v33 = vpop.f32.mrf.mxu0  ;;  %5420 = vst [vmem:[#allocation5_spill] sm:$0xff] %v4448_v41 }
  0xbb   : > { %3681 = vmatmul.msk.bf16.gmra.mxu1 %vm562_vm2, %v4183_v8  ;;  %v1530_v8 = vrot.slane %v1528_v36, 2 }
  0xbc   : > { %3700 = vmatmul.msk.bf16.gmra.mxu2 %vm562_vm2, %v877_v30 }
  0xbd   : > { %3806 = vmatmul.msk.bf16.gmra.mxu0 %vm562_vm2, %v1523_v13  ;;  %v1531_v49 = vor.u32 %v1530_v8, %v1527_v42  ;;  %v881_v13 = vsel %vm864_vm3, %v878_v47, %v880_v27  ;;  %v1543_v42 = vshrl.u32 %v3993_v55, 16  ;;  %v1546_v8 = vshll.u32 %v3993_v55, 16 }
  0xbe   : > { %3789 = vmatmul.msk.bf16.gmra.mxu3 %vm562_vm2, %v1242_v24  ;;  %v1245_v24 = vrot.slane %v3994_v35, 1 }
  0xbf   : > { %v4446_v39 = vpop.f32.mrf.mxu2  ;;  %v1532_v17 = vsel %vm1461_vm4, %v1522_v15, %v1531_v49 }
  0xc0   : > { %v4450_v44 = vpop.f32.mrf.mxu1  ;;  %v1246_v0 = vsel %vm864_vm3, %v1243_v58, %v1245_v24  ;;  %v1247_v58 = vrot.slane %v3995_v22, 1 }
  0xc1   : > { %v4459_v51 = vpop.f32.mrf.mxu3 }
  0xc2   : > { %v4453_v45 = vpop.f32.mrf.mxu0  ;;  %5421 = vst [vmem:[#allocation6_spill] sm:$0xff] %v4459_v51  ;;  %v1248_v26 = vsel %vm864_vm3, %v1245_v24, %v1247_v58  ;;  %v3996_v24 = vld [vmem:[%s4180_s9 + $0x68] sm:$0xff] }
  0xc7   : > { %v4457_v50 = vpop.f32.mrf.mxu2 }
  0xc8   : > { %v4461_v43 = vpop.f32.mrf.mxu1 }
  0xc9   : > { %v4474_v4 = vpop.f32.mrf.mxu3 }
  0xca   : > { %v4465_v57 = vpop.f32.mrf.mxu0  ;;  %5422 = vst [vmem:[#allocation7_spill] sm:$0xff] %v4474_v4 }
  0xcb   : > { %3682 = vmatmul.msk.bf16.gmra.mxu1 %vm562_vm2, %v4186_v9  ;;  %v1539_v9 = vrot.slane %v1537_v1, 2 }
  0xcc   : > { %3701 = vmatmul.msk.bf16.gmra.mxu2 %vm562_vm2, %v879_v56 }
  0xcd   : > { %3807 = vmatmul.msk.bf16.gmra.mxu0 %vm562_vm2, %v1532_v17  ;;  %v1540_v23 = vor.u32 %v1539_v9, %v1536_v21 }
  0xce   : > { %3790 = vmatmul.msk.bf16.gmra.mxu3 %vm562_vm2, %v1244_v14  ;;  %v1548_v14 = vrot.slane %v1546_v8, 2  ;;  %v1552_v8 = vshrl.u32 %v3994_v35, 16 }
  0xcf   : > { %v4472_v3 = vpop.f32.mrf.mxu2  ;;  %v1541_v34 = vsel %vm1461_vm4, %v1531_v49, %v1540_v23  ;;  %v1545_v49 = vrot.slane %v1543_v42, 1 }
  0xd0   : > { %v4476_v7 = vpop.f32.mrf.mxu1  ;;  %v1554_v61 = vrot.slane %v1552_v8, 1 }
  0xd1   : > { %v1329_v30 = vpop.f32.mrf.mxu3  ;;  %v1549_v21 = vor.u32 %v1548_v14, %v1545_v49 }
  0xd2   : > { %v4479_v19 = vpop.f32.mrf.mxu0 }
  0xd3   : > { %v1550_v51 = vsel %vm1461_vm4, %v1540_v23, %v1549_v21 }
  0xd7   : > { %v4483_v15 = vpop.f32.mrf.mxu2 }
  0xd8   : > { %v4485_v32 = vpop.f32.mrf.mxu1 }
  0xd9   : > { %v1331_v17 = vpop.f32.mrf.mxu3 }
  0xda   : > { %v4489_v36 = vpop.f32.mrf.mxu0 }
  0xdb   : > { %3683 = vmatmul.msk.bf16.gmra.mxu1 %vm562_vm2, %v4225_v37  ;;  %v882_v37 = vrot.slane %v4253_v60, 1 }
  0xdc   : > { %3702 = vmatmul.msk.bf16.gmra.mxu2 %vm562_vm2, %v881_v13 }
  0xdd   : > { %3808 = vmatmul.msk.bf16.gmra.mxu0 %vm562_vm2, %v1541_v34  ;;  %v883_v34 = vsel %vm864_vm3, %v880_v27, %v882_v37 }
  0xde   : > { %3791 = vmatmul.msk.bf16.gmra.mxu3 %vm562_vm2, %v1246_v0  ;;  %v1555_v0 = vshll.u32 %v3994_v35, 16 }
  0xdf   : > { %v4496_v56 = vpop.f32.mrf.mxu2 }
  0xe0   : > { %5423 = vst [vmem:[#allocation8_spill] sm:$0xff] %v4496_v56  ;;  %v4498_v47 = vpop.f32.mrf.mxu1 }
  0xe1   : > { %v1334_v13 = vpop.f32.mrf.mxu3 }
  0xe2   : > { %v4501_v1 = vpop.f32.mrf.mxu0 }
  0xe7   : > { %v4505_v9 = vpop.f32.mrf.mxu2 }
  0xe8   : > { %5424 = vst [vmem:[#allocation9_spill] sm:$0xff] %v4505_v9  ;;  %v768_v55 = vpop.f32.mrf.mxu1 }
  0xe9   : > { %v769_v42 = vadd.f32 %v768_v55, %v4389_v48  ;;  %v1336_v14 = vpop.f32.mrf.mxu3 }
  0xea   : > { %v1698_v4 = vpop.f32.mrf.mxu0 }
  0xeb   : > { %3684 = vmatmul.msk.bf16.gmra.mxu1 %vm562_vm2, %v4262_v5  ;;  %v1557_v5 = vrot.slane %v1555_v0, 2  ;;  %v1564_v0 = vshll.u32 %v3995_v22, 16 }
  0xec   : > { %3703 = vmatmul.msk.bf16.gmra.mxu2 %vm562_vm2, %v883_v34 }
  0xed   : > { %3809 = vmatmul.msk.bf16.gmra.mxu0 %vm562_vm2, %v1550_v51  ;;  %v884_v51 = vrot.slane %v4189_v10, 1  ;;  %v1558_v35 = vor.u32 %v1557_v5, %v1554_v61 }
  0xee   : > { %3792 = vmatmul.msk.bf16.gmra.mxu3 %vm562_vm2, %v1248_v26 }
  0xef   : > { %v968_v49 = vpop.f32.mrf.mxu2  ;;  %v885_v56 = vsel %vm864_vm3, %v882_v37, %v884_v51  ;;  %v1559_v8 = vsel %vm1461_vm4, %v1549_v21, %v1558_v35 }
  0xf0   : > { %v1058_v41 = vadd.f32 %v968_v49, %v769_v42  ;;  %v770_v27 = vpop.f32.mrf.mxu1 }
  0xf1   : > { %v771_v48 = vadd.f32 %v770_v27, %v4401_v29  ;;  %v1339_v9 = vpop.f32.mrf.mxu3  ;;  %v1249_v29 = vrot.slane %v3996_v24, 1 }
  0xf2   : > { %v1419_v23 = vadd.f32 %v1329_v30, %v1058_v41  ;;  %v1700_v18 = vpop.f32.mrf.mxu0 }
  0xf3   : > { %v1250_v21 = vsel %vm864_vm3, %v1247_v58, %v1249_v29  ;;  %v3997_v58 = vld [vmem:[%s4180_s9 + $0x70] sm:$0xff] }
  0xf4   : > { %v4517_v34 = vadd.f32 %v1698_v4, %v1419_v23  ;;  %v1561_v4 = vshrl.u32 %v3995_v22, 16 }
  0xf7   : > { %v970_v55 = vpop.f32.mrf.mxu2 }
  0xf8   : > { %v1059_v42 = vadd.f32 %v970_v55, %v771_v48  ;;  %v773_v49 = vpop.f32.mrf.mxu1  ;;  %v1563_v48 = vrot.slane %v1561_v4, 1  ;;  %v886_v55 = vrot.slane %v4192_v11, 1 }
  0xf9   : > { %v774_v61 = vadd.f32 %v773_v49, %v4413_v2  ;;  %v1341_v27 = vpop.f32.mrf.mxu3 }
  0xfa   : > { %v1420_v41 = vadd.f32 %v1331_v17, %v1059_v42  ;;  %v1703_v30 = vpop.f32.mrf.mxu0 }
  0xfb   : > { %3685 = vmatmul.msk.bf16.gmra.mxu1 %vm562_vm2, %v4253_v60 }
  0xfc   : > { %3704 = vmatmul.msk.bf16.gmra.mxu2 %vm562_vm2, %v885_v56  ;;  %v4527_v26 = vadd.f32 %v1700_v18, %v1420_v41  ;;  %v1566_v56 = vrot.slane %v1564_v0, 2 }
  0xfd   : > { %3810 = vmatmul.msk.bf16.gmra.mxu0 %vm562_vm2, %v1559_v8 }
  0xfe   : > { %3793 = vmatmul.msk.bf16.gmra.mxu3 %vm562_vm2, %v1250_v21  ;;  %v1567_v22 = vor.u32 %v1566_v56, %v1563_v48 }
  0xff   : > { %v973_v37 = vpop.f32.mrf.mxu2 }
 0x100   : > { %v1060_v17 = vadd.f32 %v973_v37, %v774_v61  ;;  %v775_v23 = vpop.f32.mrf.mxu1  ;;  %v887_v61 = vsel %vm864_vm3, %v884_v51, %v886_v55  ;;  %v1568_v4 = vsel %vm1461_vm4, %v1558_v35, %v1567_v22 }
 0x101   : > { %v776_v2 = vadd.f32 %v775_v23, %v4427_v20  ;;  %v1344_v49 = vpop.f32.mrf.mxu3  ;;  %v1251_v20 = vrot.slane %v3997_v58, 1  ;;  %v1573_v23 = vshll.u32 %v3996_v24, 16 }
 0x102   : > { %v1421_v5 = vadd.f32 %v1334_v13, %v1060_v17  ;;  %v1705_v60 = vpop.f32.mrf.mxu0  ;;  %v1570_v17 = vshrl.u32 %v3996_v24, 16 }
 0x103   : > { %v1252_v35 = vsel %vm864_vm3, %v1249_v29, %v1251_v20  ;;  %v3998_v29 = vld [vmem:[%s4180_s9 + $0x78] sm:$0xff] }
 0x104   : > { %v4533_v18 = vadd.f32 %v1703_v30, %v1421_v5  ;;  %v1572_v56 = vrot.slane %v1570_v17, 1 }
 0x107   : > { %v975_v42 = vpop.f32.mrf.mxu2 }
 0x108   : > { %v1061_v41 = vadd.f32 %v975_v42, %v776_v2  ;;  %v778_v8 = vpop.f32.mrf.mxu1  ;;  %v1575_v2 = vrot.slane %v1573_v23, 2  ;;  %v888_v42 = vrot.slane %v4229_v38, 1 }
 0x109   : > { %v779_v0 = vadd.f32 %v778_v8, %v4439_v33  ;;  %v1346_v21 = vpop.f32.mrf.mxu3 }
 0x10a   : > { %v1422_v13 = vadd.f32 %v1336_v14, %v1061_v41  ;;  %v1708_v37 = vpop.f32.mrf.mxu0  ;;  %v1576_v24 = vor.u32 %v1575_v2, %v1572_v56 }
 0x10b   : > { %3686 = vmatmul.msk.bf16.gmra.mxu1 %vm562_vm2, %v4189_v10 }
 0x10c   : > { %3705 = vmatmul.msk.bf16.gmra.mxu2 %vm562_vm2, %v887_v61  ;;  %v4543_v30 = vadd.f32 %v1705_v60, %v1422_v13  ;;  %v1577_v17 = vsel %vm1461_vm4, %v1567_v22, %v1576_v24 }
 0x10d   : > { %3811 = vmatmul.msk.bf16.gmra.mxu0 %vm562_vm2, %v1568_v4  ;;  %v889_v4 = vsel %vm864_vm3, %v886_v55, %v888_v42 }
 0x10e   : > { %3794 = vmatmul.msk.bf16.gmra.mxu3 %vm562_vm2, %v1252_v35 }
 0x10f   : > { %v978_v51 = vpop.f32.mrf.mxu2 }
 0x110   : > { %v1062_v14 = vadd.f32 %v978_v51, %v779_v0  ;;  %v780_v5 = vpop.f32.mrf.mxu1  ;;  %v1579_v51 = vshrl.u32 %v3997_v58, 16 }
 0x111   : > { %v781_v33 = vadd.f32 %v780_v5, %v4453_v45  ;;  %v1349_v8 = vpop.f32.mrf.mxu3  ;;  %v1253_v45 = vrot.slane %v3998_v29, 1 }
 0x112   : > { %v1423_v48 = vadd.f32 %v1339_v9, %v1062_v14  ;;  %v1710_v10 = vpop.f32.mrf.mxu0  ;;  %v1582_v14 = vshll.u32 %v3997_v58, 16  ;;  %v1581_v56 = vrot.slane %v1579_v51, 1 }
 0x113   : > { %v1254_v22 = vsel %vm864_vm3, %v1251_v20, %v1253_v45  ;;  %v3999_v20 = vld [vmem:[%s4180_s9 + $0x80] sm:$0xff] }
 0x114   : > { %v4549_v60 = vadd.f32 %v1708_v37, %v1423_v48  ;;  %v1584_v2 = vrot.slane %v1582_v14, 2  ;;  %v1588_v14 = vshrl.u32 %v3998_v29, 16 }
 0x116   : > { %v1585_v58 = vor.u32 %v1584_v2, %v1581_v56  ;;  %v892_v2 = vrot.slane %v4300_v52, 1 }
 0x117   : > { %v980_v41 = vpop.f32.mrf.mxu2 }
 0x118   : > { %v1063_v61 = vadd.f32 %v980_v41, %v781_v33  ;;  %v783_v13 = vpop.f32.mrf.mxu1  ;;  %v890_v33 = vrot.slane %v4265_v6, 1 }
 0x119   : > { %v784_v23 = vadd.f32 %v783_v13, %v4465_v57  ;;  %v1351_v5 = vpop.f32.mrf.mxu3 }
 0x11a   : > { %v1424_v9 = vadd.f32 %v1341_v27, %v1063_v61  ;;  %v1713_v0 = vpop.f32.mrf.mxu0 }
 0x11b   : > { %3687 = vmatmul.msk.bf16.gmra.mxu1 %vm562_vm2, %v4192_v11 }
 0x11c   : > { %3706 = vmatmul.msk.bf16.gmra.mxu2 %vm562_vm2, %v889_v4  ;;  %v4559_v37 = vadd.f32 %v1710_v10, %v1424_v9  ;;  %v891_v9 = vsel %vm864_vm3, %v888_v42, %v890_v33 }
 0x11d   : > { %3812 = vmatmul.msk.bf16.gmra.mxu0 %vm562_vm2, %v1577_v17 }
 0x11e   : > { %3795 = vmatmul.msk.bf16.gmra.mxu3 %vm562_vm2, %v1254_v22 }
 0x11f   : > { %v983_v55 = vpop.f32.mrf.mxu2 }
 0x120   : > { %v1064_v27 = vadd.f32 %v983_v55, %v784_v23  ;;  %v785_v35 = vpop.f32.mrf.mxu1  ;;  %v1586_v23 = vsel %vm1461_vm4, %v1576_v24, %v1585_v58  ;;  %v1591_v55 = vshll.u32 %v3998_v29, 16 }
 0x121   : > { %v786_v57 = vadd.f32 %v785_v35, %v4479_v19  ;;  %v1354_v61 = vpop.f32.mrf.mxu3  ;;  %v1255_v19 = vrot.slane %v3999_v20, 1 }
 0x122   : > { %v1425_v48 = vadd.f32 %v1344_v49, %v1064_v27  ;;  %v1715_v11 = vpop.f32.mrf.mxu0  ;;  %v1593_v56 = vrot.slane %v1591_v55, 2  ;;  %v1600_v55 = vshll.u32 %v3999_v20, 16 }
 0x123   : > { %v1256_v24 = vsel %vm864_vm3, %v1253_v45, %v1255_v19  ;;  %v4000_v45 = vld [vmem:[%s4180_s9 + $0x88] sm:$0xff] }
 0x124   : > { %v4565_v10 = vadd.f32 %v1713_v0, %v1425_v48  ;;  %v1590_v48 = vrot.slane %v1588_v14, 1  ;;  %v1597_v14 = vshrl.u32 %v3999_v20, 16 }
 0x126   : > { %v1594_v29 = vor.u32 %v1593_v56, %v1590_v48  ;;  %v894_v48 = vrot.slane %v4216_v31, 1 }
 0x127   : > { %v985_v41 = vpop.f32.mrf.mxu2 }
 0x128   : > { %v1065_v13 = vadd.f32 %v985_v41, %v786_v57  ;;  %v788_v4 = vpop.f32.mrf.mxu1 }
 0x129   : > { %v789_v51 = vadd.f32 %v788_v4, %v4489_v36  ;;  %v1356_v27 = vpop.f32.mrf.mxu3 }
 0x12a   : > { %v1426_v49 = vadd.f32 %v1346_v21, %v1065_v13  ;;  %v1718_v17 = vpop.f32.mrf.mxu0 }
 0x12b   : > { %3688 = vmatmul.msk.bf16.gmra.mxu1 %vm562_vm2, %v4229_v38 }
 0x12c   : > { %3707 = vmatmul.msk.bf16.gmra.mxu2 %vm562_vm2, %v891_v9  ;;  %v4575_v0 = vadd.f32 %v1715_v11, %v1426_v49  ;;  %v893_v9 = vsel %vm864_vm3, %v890_v33, %v892_v2 }
 0x12d   : > { %3813 = vmatmul.msk.bf16.gmra.mxu0 %vm562_vm2, %v1586_v23  ;;  %v1595_v23 = vsel %vm1461_vm4, %v1585_v58, %v1594_v29 }
 0x12e   : > { %3796 = vmatmul.msk.bf16.gmra.mxu3 %vm562_vm2, %v1256_v24  ;;  %v1599_v24 = vrot.slane %v1597_v14, 1 }
 0x12f   : > { %v988_v42 = vpop.f32.mrf.mxu2 }
 0x130   : > { %v1066_v21 = vadd.f32 %v988_v42, %v789_v51  ;;  %v790_v35 = vpop.f32.mrf.mxu1 }
 0x131   : > { %v791_v36 = vadd.f32 %v790_v35, %v4501_v1  ;;  %v1359_v41 = vpop.f32.mrf.mxu3  ;;  %v1257_v1 = vrot.slane %v4000_v45, 1 }
 0x132   : > { %v1427_v22 = vadd.f32 %v1349_v8, %v1066_v21  ;;  %v1720_v38 = vpop.f32.mrf.mxu0 }
 0x133   : > { %v1258_v58 = vsel %vm864_vm3, %v1255_v19, %v1257_v1  ;;  %v4001_v19 = vld [vmem:[%s4180_s9 + $0x90] sm:$0xff] }
 0x134   : > { %v4581_v11 = vadd.f32 %v1718_v17, %v1427_v22  ;;  %v1602_v22 = vrot.slane %v1600_v55, 2 }
 0x136   : > { %v1603_v20 = vor.u32 %v1602_v22, %v1599_v24 }
 0x137   : > { %v990_v57 = vpop.f32.mrf.mxu2 }
 0x138   : > { %v1067_v13 = vadd.f32 %v990_v57, %v791_v36  ;;  %v793_v4 = vpop.f32.mrf.mxu1 }
 0x139   : > { %v794_v51 = vadd.f32 %v793_v4, %v4385_v46  ;;  %v1361_v42 = vpop.f32.mrf.mxu3  ;;  %v895_v4 = vsel %vm864_vm3, %v892_v2, %v894_v48  ;;  %v1606_v2 = vshrl.u32 %v4000_v45, 16 }
 0x13a   : > { %v1428_v8 = vadd.f32 %v1351_v5, %v1067_v13  ;;  %v1723_v49 = vpop.f32.mrf.mxu0 }
 0x13b   : > { %3689 = vmatmul.msk.bf16.gmra.mxu1 %vm562_vm2, %v4265_v6 }
 0x13c   : > { %3708 = vmatmul.msk.bf16.gmra.mxu2 %vm562_vm2, %v893_v9  ;;  %v4591_v17 = vadd.f32 %v1720_v38, %v1428_v8  ;;  %v1604_v8 = vsel %vm1461_vm4, %v1594_v29, %v1603_v20 }
 0x13d   : > { %3814 = vmatmul.msk.bf16.gmra.mxu0 %vm562_vm2, %v1595_v23  ;;  %v1609_v23 = vshll.u32 %v4000_v45, 16 }
 0x13e   : > { %3797 = vmatmul.msk.bf16.gmra.mxu3 %vm562_vm2, %v1258_v58  ;;  %v1130_v58 = vld [vmem:[%s4180_s9 + $0x98] sm:$0x1] }
 0x13f   : > { %v993_v33 = vpop.f32.mrf.mxu2 }
 0x140   : > { %v1068_v5 = vadd.f32 %v993_v33, %v794_v51  ;;  %v795_v21 = vpop.f32.mrf.mxu1 }
 0x141   : > { %v796_v46 = vadd.f32 %v795_v21, %v4398_v54  ;;  %v1364_v36 = vpop.f32.mrf.mxu3  ;;  %v1259_v54 = vrot.slane %v4001_v19, 1  ;;  %v1611_v21 = vrot.slane %v1609_v23, 2 }
 0x142   : > { %v1429_v35 = vadd.f32 %v1354_v61, %v1068_v5  ;;  %v1725_v6 = vpop.f32.mrf.mxu0  ;;  %v1608_v5 = vrot.slane %v1606_v2, 1  ;;  %v4058_v2 = vld [vmem:[%s4180_s9 + $0x78] sm:$0xff] }
 0x144   : > { %v4597_v38 = vadd.f32 %v1723_v49, %v1429_v35 }
 0x147   : > { %v995_v56 = vpop.f32.mrf.mxu2 }
 0x148   : > { %v1069_v57 = vadd.f32 %v995_v56, %v796_v46  ;;  %v798_v13 = vpop.f32.mrf.mxu1 }
 0x149   : > { %v799_v49 = vadd.f32 %v798_v13, %v4409_v62  ;;  %v4611_v51 = vpop.f32.mrf.mxu3  ;;  %v4619_v62 = vld [vmem:[%s4180_s9 + $0x80] sm:$0xff] }
 0x14a   : > { %v1430_v61 = vadd.f32 %v1356_v27, %v1069_v57  ;;  %v1728_v9 = vpop.f32.mrf.mxu0  ;;  %v896_v45 = vrot.slane %v4619_v62, 1 }
 0x14b   : > { %3690 = vmatmul.msk.bf16.gmra.mxu1 %vm562_vm2, %v4300_v52  ;;  %v1260_v52 = vsel %vm864_vm3, %v1257_v1, %v1259_v54  ;;  %v1612_v1 = vor.u32 %v1611_v21, %v1608_v5  ;;  %v4643_v21 = vld [vmem:[%s4180_s9 + $0x18] sm:$0xff] }
 0x14c   : > { %3709 = vmatmul.msk.bf16.gmra.mxu2 %vm562_vm2, %v895_v4  ;;  %v4607_v31 = vadd.f32 %v1725_v6, %v1430_v61  ;;  %v1206_v6 = vunpack.c.l.b16 %v1130_v58  ;;  %v897_v57 = vsel %vm864_vm3, %v894_v48, %v896_v45 }
 0x14d   : > { %3815 = vmatmul.msk.bf16.gmra.mxu0 %vm562_vm2, %v1604_v8  ;;  %v2060_v8 = vld [vmem:[%s4180_s9 + $0x10] sm:$0xc] }
 0x14e   : > { %3798 = vmatmul.msk.bf16.gmra.mxu3 %vm562_vm2, %v1260_v52  ;;  %v1225_v13 = vpack.c.b16 %v1206_v6, %v1206_v6  ;;  %v2136_v48 = vunpack.c.l.b16 %v2060_v8 }
 0x14f   : > { %v998_v27 = vpop.f32.mrf.mxu2 }
 0x150   : > { %v1070_v29 = vadd.f32 %v998_v27, %v799_v49  ;;  %v800_v14 = vpop.f32.mrf.mxu1  ;;  %v4629_v49 = vld [vmem:[%s4180_s9 + $0x14] sm:$0xf]  ;;  %v1261_v23 = vrot.slane %v1225_v13, 1  ;;  %v1615_v27 = vshrl.u32 %v4001_v19, 16 }
 0x151   : > { %v801_v24 = vadd.f32 %v800_v14, %v4424_v12  ;;  %v4623_v22 = vpop.f32.mrf.mxu3 }
 0x152   : > { %v1431_v55 = vadd.f32 %v1359_v41, %v1070_v29  ;;  %v1730_v33 = vpop.f32.mrf.mxu0  ;;  %v1618_v29 = vshll.u32 %v4001_v19, 16 }
 0x154   : > { %v4616_v35 = vadd.f32 %v1728_v9, %v1431_v55  ;;  %v1613_v9 = vsel %vm1461_vm4, %v1603_v20, %v1612_v1 }
 0x157   : > { %v1000_v41 = vpop.f32.mrf.mxu2 }
 0x158   : > { %v1071_v46 = vadd.f32 %v1000_v41, %v801_v24  ;;  %v803_v56 = vpop.f32.mrf.mxu1  ;;  %v1617_v41 = vrot.slane %v1615_v27, 1 }
 0x159   : > { %v804_v20 = vadd.f32 %v803_v56, %v4435_v28  ;;  %v4639_v52 = vpop.f32.mrf.mxu3  ;;  %v1455_v28 = vld [vmem:[%s4180_s9 + $0x98] sm:$0x3]  ;;  %v4651_v56 = vld [vmem:[%s4180_s9 + $0x88] sm:$0xff] }
 0x15a   : > { %v1432_v4 = vadd.f32 %v1361_v42, %v1071_v46  ;;  %v1733_v61 = vpop.f32.mrf.mxu0  ;;  %v5414_v42 = vunpack.c.l.b16 %v4629_v49  ;;  %v1620_v46 = vrot.slane %v1618_v29, 2  ;;  %v898_v19 = vrot.slane %v4651_v56, 1 }
 0x15b   : > { %3691 = vmatmul.msk.bf16.gmra.mxu1 %vm562_vm2, %v4058_v2  ;;  %v1459_v2 = vunpack.c.l.b16 %v1455_v28 }
 0x15c   : > { %3710 = vmatmul.msk.bf16.gmra.mxu2 %vm562_vm2, %v897_v57  ;;  %v4634_v12 = vadd.f32 %v1730_v33, %v1432_v4  ;;  %v1262_v33 = vsel %vm864_vm3, %v1259_v54, %v1261_v23  ;;  %v4647_v58 = vpack.c.b16 %v5414_v42, %v2136_v48  ;;  %v2437_v4 = vshrl.u32 %v4643_v21, 16 }
 0x15d   : > { %3816 = vmatmul.msk.bf16.gmra.mxu0 %vm562_vm2, %v1613_v9  ;;  %v1621_v8 = vor.u32 %v1620_v46, %v1617_v41  ;;  %v899_v27 = vsel %vm864_vm3, %v896_v45, %v898_v19 }
 0x15e   : > { %5425 = vst [vmem:[#allocation10_spill] sm:$0xff] %v4634_v12  ;;  %3799 = vmatmul.msk.bf16.gmra.mxu3 %vm562_vm2, %v1262_v33  ;;  %v2429_v54 = vshrl.u32 %v4647_v58, 16  ;;  %v2432_v13 = vshll.u32 %v4647_v58, 16  ;;  %v4667_v12 = vpack.c.b16 %v1459_v2, %v1459_v2  ;;  %v900_v2 = vrot.slane %v4289_v40, 1 }
 0x15f   : > { %v1003_v14 = vpop.f32.mrf.mxu2 }
 0x160   : > { %v1072_v55 = vadd.f32 %v1003_v14, %v804_v20  ;;  %v805_v5 = vpop.f32.mrf.mxu1  ;;  %v2431_v29 = vrot.slane %v2429_v54, 2  ;;  %v2434_v14 = vrot.slane %v2432_v13, 3 }
 0x161   : > { %v806_v9 = vadd.f32 %v805_v5, %v4450_v44  ;;  %v4662_v48 = vpop.f32.mrf.mxu3 }
 0x162   : > { %v1433_v6 = vadd.f32 %v1364_v36, %v1072_v55  ;;  %v1735_v24 = vpop.f32.mrf.mxu0  ;;  %v2440_v36 = vshll.u32 %v4643_v21, 16  ;;  %v2439_v55 = vrot.slane %v2437_v4, 2  ;;  %v2435_v45 = vor.u32 %v2434_v14, %v2431_v29 }
 0x164   : > { %v4655_v57 = vadd.f32 %v1733_v61, %v1433_v6  ;;  %v2442_v33 = vrot.slane %v2440_v36, 3 }
 0x166   : > { %5426 = vst [vmem:[#allocation11_spill] sm:$0xff] %v4655_v57  ;;  %v1622_v57 = vsel %vm1461_vm4, %v1612_v1, %v1621_v8  ;;  %v2443_v5 = vor.u32 %v2442_v33, %v2439_v55  ;;  %v1627_v1 = vshll.u32 %v4667_v12, 16  ;;  %v901_v33 = vsel %vm864_vm3, %v898_v19, %v900_v2  ;;  %v4712_v2 = vld [vmem:[%s4180_s9 + $0x28] sm:$0xff] }
 0x167   : > { %v1005_v23 = vpop.f32.mrf.mxu2 }
 0x168   : > { %v1073_v20 = vadd.f32 %v1005_v23, %v806_v9  ;;  %v808_v61 = vpop.f32.mrf.mxu1  ;;  %v2444_v13 = vsel %vm2427_vm5, %v2435_v45, %v2443_v5 }
 0x169   : > { %v809_v41 = vadd.f32 %v808_v61, %v4461_v43  ;;  %v4678_v28 = vpop.f32.mrf.mxu3  ;;  %v1629_v43 = vrot.slane %v1627_v1, 2  ;;  %v2790_v1 = vld [vmem:[%s4180_s9 + $0x10] sm:$0x8] }
 0x16a   : > { %v1434_v6 = vadd.f32 %v4611_v51, %v1073_v20  ;;  %v1738_v42 = vpop.f32.mrf.mxu0  ;;  %v1624_v51 = vshrl.u32 %v4667_v12, 16 }
 0x16b   : > { %3692 = vmatmul.msk.bf16.gmra.mxu1 %vm562_vm2, %v4619_v62 }
 0x16c   : > { %3711 = vmatmul.msk.bf16.gmra.mxu2 %vm562_vm2, %v899_v27  ;;  %v4672_v44 = vadd.f32 %v1735_v24, %v1434_v6  ;;  %v4682_v24 = vld [vmem:[%s4180_s9 + $0x20] sm:$0xff]  ;;  %v1626_v36 = vrot.slane %v1624_v51, 1  ;;  %v1824_v6 = vld [vmem:[%s4180_s9 + $0x8] sm:$0xc] }
 0x16d   : > { %3817 = vmatmul.msk.bf16.gmra.mxu0 %vm562_vm2, %v1622_v57  ;;  %v2446_v23 = vshrl.u32 %v4682_v24, 16  ;;  %v2449_v20 = vshll.u32 %v4682_v24, 16 }
 0x16e   : > { %3926 = vmatmul.msk.bf16.vlgmr.msra.gmra.mxu3 %vm562_vm2, %v2444_v13  ;;  %v1630_v61 = vor.u32 %v1629_v43, %v1626_v36 }
 0x16f   : > { %v1008_v46 = vpop.f32.mrf.mxu2  ;;  %v2451_v45 = vrot.slane %v2449_v20, 3  ;;  %v5428_v20 = vunpack.c.l.b16 %v4629_v49 }
 0x170   : > { %v1074_v54 = vadd.f32 %v1008_v46, %v809_v41  ;;  %v810_v62 = vpop.f32.mrf.mxu1  ;;  %v1631_v51 = vsel %vm1461_vm4, %v1621_v8, %v1630_v61  ;;  %v4060_v61 = vld [vmem:[%s4180_s9 + $0x10] sm:$0xff] }
 0x171   : > { %v811_v27 = vadd.f32 %v810_v62, %v4476_v7  ;;  %v1828_v7 = vunpack.c.l.b16 %v1824_v6  ;;  %v2798_v6 = vrot.slane %v4643_v21, 3 }
 0x172   : > { %v1435_v57 = vadd.f32 %v4623_v22, %v1074_v54  ;;  %v1740_v4 = vpop.f32.mrf.mxu0  ;;  %v4692_v22 = vpop.f32.mrf.mxu3 }
 0x174   : > { %v4686_v9 = vadd.f32 %v1738_v42, %v1435_v57  ;;  %v2448_v42 = vrot.slane %v2446_v23, 2  ;;  %v5427_v57 = vunpack.c.l.b16 %v4311_v63  ;;  %v2192_v63 = vrot.slane %v4647_v58, 2 }
 0x176   : > { %v2452_v19 = vor.u32 %v2451_v45, %v2448_v42  ;;  %v1829_v36 = vpack.c.b16 %v5427_v57, %v1828_v7 }
 0x177   : > { %v1010_v29 = vpop.f32.mrf.mxu2 }
 0x178   : > { %v1075_v14 = vadd.f32 %v1010_v29, %v811_v27  ;;  %v813_v55 = vpop.f32.mrf.mxu1  ;;  %v2453_v43 = vsel %vm2427_vm5, %v2443_v5, %v2452_v19  ;;  %v1832_v29 = vrot.slane %v4060_v61, 2  ;;  %v2455_v5 = vshrl.u32 %v4712_v2, 16 }
 0x179   : > { %v814_v54 = vadd.f32 %v813_v55, %v4485_v32  ;;  %v1831_v32 = vrot.slane %v1829_v36, 2  ;;  %v2193_v55 = vrot.slane %v4643_v21, 2 }
 0x17a   : > { %v1436_v40 = vadd.f32 %v4639_v52, %v1075_v14  ;;  %v1743_v41 = vpop.f32.mrf.mxu0  ;;  %v2794_v52 = vunpack.c.l.b16 %v2790_v1  ;;  %v4706_v13 = vpop.f32.mrf.mxu3  ;;  %v2457_v1 = vrot.slane %v2455_v5, 2 }
 0x17b   : > { %3693 = vmatmul.msk.bf16.gmra.mxu1 %vm562_vm2, %v4651_v56  ;;  %v2194_v58 = vsel %vm1830_vm6, %v2192_v63, %v2193_v55  ;;  %v2195_v63 = vrot.slane %v4682_v24, 2 }
 0x17c   : > { %3712 = vmatmul.msk.bf16.gmra.mxu2 %vm562_vm2, %v901_v33  ;;  %v4702_v46 = vadd.f32 %v1740_v4, %v1436_v40  ;;  %v2795_v27 = vpack.c.b16 %v5428_v20, %v2794_v52  ;;  %v2458_v33 = vshll.u32 %v4712_v2, 16 }
 0x17d   : > { %3818 = vmatmul.msk.bf16.gmra.mxu0 %vm562_vm2, %v1631_v51  ;;  %v1833_v51 = vsel %vm1830_vm6, %v1831_v32, %v1832_v29  ;;  %v4061_v32 = vld [vmem:[%s4180_s9 + $0x18] sm:$0xff] }
 0x17e   : > { %3927 = vmatmul.msk.bf16.gmra.mxu3 %vm562_vm2, %v2453_v43  ;;  %v2797_v49 = vrot.slane %v2795_v27, 3  ;;  %v2460_v7 = vrot.slane %v2458_v33, 3  ;;  %v1834_v61 = vrot.slane %v4061_v32, 2 }
 0x17f   : > { %v1013_v62 = vpop.f32.mrf.mxu2 }
 0x180   : > { %v1076_v8 = vadd.f32 %v1013_v62, %v814_v54  ;;  %v815_v56 = vpop.f32.mrf.mxu1  ;;  %v2461_v62 = vor.u32 %v2460_v7, %v2457_v1 }
 0x182   : > { %v1437_v4 = vadd.f32 %v4662_v48, %v1076_v8  ;;  %v1745_v23 = vpop.f32.mrf.mxu0  ;;  %v816_v48 = vadd.f32 %v815_v56, %v4498_v47  ;;  %v1384_v45 = vpop.f32.mrf.mxu3  ;;  %v2799_v47 = vsel %vm2796_vm7, %v2797_v49, %v2798_v6 }
 0x184   : > { %v4719_v14 = vadd.f32 %v1743_v41, %v1437_v4  ;;  %v4739_v4 = vld [vmem:[%s4180_s9 + $0x30] sm:$0xff] }
 0x185   : > { %v2467_v5 = vshll.u32 %v4739_v4, 16 }
 0x187   : > { %v1015_v42 = vpop.f32.mrf.mxu2 }
 0x188   : > { %v1077_v40 = vadd.f32 %v1015_v42, %v816_v48  ;;  %v818_v41 = vpop.f32.mrf.mxu1 }
 0x189   : > { %v819_v8 = vadd.f32 %v818_v41, %v4396_v53  ;;  %v2464_v53 = vshrl.u32 %v4739_v4, 16  ;;  %v2196_v41 = vsel %vm1830_vm6, %v2193_v55, %v2195_v63 }
 0x18a   : > { %v1438_v54 = vadd.f32 %v4678_v28, %v1077_v40  ;;  %v1748_v52 = vpop.f32.mrf.mxu0  ;;  %v1386_v36 = vpop.f32.mrf.mxu3  ;;  %v2462_v28 = vsel %vm2427_vm5, %v2452_v19, %v2461_v62  ;;  %v2800_v19 = vrot.slane %v4682_v24, 3  ;;  %v1835_v40 = vsel %vm1830_vm6, %v1832_v29, %v1834_v61 }
 0x18b   : > { %3820 = vmatmul.msk.bf16.vlgmr.msra.gmra.mxu1 %vm562_vm2, %v1833_v51  ;;  %v2466_v51 = vrot.slane %v2464_v53, 2 }
 0x18c   : > { %3907 = vmatmul.msk.bf16.vlgmr.msra.gmra.mxu2 %vm562_vm2, %v2194_v58  ;;  %v4733_v21 = vadd.f32 %v1745_v23, %v1438_v54  ;;  %v2469_v58 = vrot.slane %v2467_v5, 3  ;;  %v2801_v54 = vsel %vm2796_vm7, %v2798_v6, %v2800_v19 }
 0x18d   : > { %3945 = vmatmul.msk.bf16.vlgmr.msra.gmra.mxu0 %vm562_vm2, %v2799_v47 }
 0x18e   : > { %3928 = vmatmul.msk.bf16.gmra.mxu3 %vm562_vm2, %v2462_v28  ;;  %v2470_v24 = vor.u32 %v2469_v58, %v2466_v51  ;;  %v4062_v28 = vld [vmem:[%s4180_s9 + $0x20] sm:$0xff] }
 0x18f   : > { %v1018_v57 = vpop.f32.mrf.mxu2 }
 0x190   : > { %v1078_v56 = vadd.f32 %v1018_v57, %v819_v8  ;;  %v820_v43 = vpop.f32.mrf.mxu1  ;;  %v4763_v57 = vld [vmem:[%s4180_s9 + $0x38] sm:$0xff] }
 0x191   : > { %v821_v33 = vadd.f32 %v820_v43, %v4405_v59  ;;  %v2476_v32 = vshll.u32 %v4763_v57, 16 }
 0x192   : > { %v1439_v20 = vadd.f32 %v4692_v22, %v1078_v56  ;;  %v1750_v27 = vpop.f32.mrf.mxu0  ;;  %v1389_v49 = vpop.f32.mrf.mxu3 }
 0x194   : > { %v4743_v23 = vadd.f32 %v1748_v52, %v1439_v20  ;;  %v1836_v20 = vrot.slane %v4062_v28, 2 }
 0x197   : > { %v1020_v48 = vpop.f32.mrf.mxu2 }
 0x198   : > { %v1079_v22 = vadd.f32 %v1020_v48, %v821_v33  ;;  %v823_v42 = vpop.f32.mrf.mxu1 }
 0x199   : > { %v824_v29 = vadd.f32 %v823_v42, %v4420_v16  ;;  %v2473_v16 = vshrl.u32 %v4763_v57, 16 }
 0x19a   : > { %v1440_v1 = vadd.f32 %v4706_v13, %v1079_v22  ;;  %v1753_v7 = vpop.f32.mrf.mxu0  ;;  %v1391_v52 = vpop.f32.mrf.mxu3  ;;  %v2471_v13 = vsel %vm2427_vm5, %v2461_v62, %v2470_v24  ;;  %v2802_v62 = vrot.slane %v4712_v2, 3  ;;  %v1837_v22 = vsel %vm1830_vm6, %v1834_v61, %v1836_v20 }
 0x19b   : > { %3821 = vmatmul.msk.bf16.gmra.mxu1 %vm562_vm2, %v1835_v40  ;;  %v2475_v40 = vrot.slane %v2473_v16, 2 }
 0x19c   : > { %3908 = vmatmul.msk.bf16.gmra.mxu2 %vm562_vm2, %v2196_v41  ;;  %v4757_v59 = vadd.f32 %v1750_v27, %v1440_v1  ;;  %v2197_v27 = vrot.slane %v4712_v2, 2  ;;  %v2478_v41 = vrot.slane %v2476_v32, 3  ;;  %v2803_v1 = vsel %vm2796_vm7, %v2800_v19, %v2802_v62 }
 0x19d   : > { %3946 = vmatmul.msk.bf16.gmra.mxu0 %vm562_vm2, %v2801_v54 }
 0x19e   : > { %3929 = vmatmul.msk.bf16.gmra.mxu3 %vm562_vm2, %v2471_v13  ;;  %v2198_v42 = vsel %vm1830_vm6, %v2195_v63, %v2197_v27  ;;  %v2479_v2 = vor.u32 %v2478_v41, %v2475_v40  ;;  %v4063_v13 = vld [vmem:[%s4180_s9 + $0x28] sm:$0xff] }
 0x19f   : > { %v1023_v55 = vpop.f32.mrf.mxu2 }
 0x1a0   : > { %v1080_v47 = vadd.f32 %v1023_v55, %v824_v29  ;;  %v825_v8 = vpop.f32.mrf.mxu1  ;;  %v4785_v55 = vld [vmem:[%s4180_s9 + $0x40] sm:$0xff] }
 0x1a1   : > { %v826_v53 = vadd.f32 %v825_v8, %v4431_v25  ;;  %v2485_v28 = vshll.u32 %v4785_v55, 16 }
 0x1a2   : > { %v1441_v6 = vadd.f32 %v1384_v45, %v1080_v47  ;;  %v1755_v56 = vpop.f32.mrf.mxu0  ;;  %v1394_v33 = vpop.f32.mrf.mxu3 }
 0x1a4   : > { %v4766_v43 = vadd.f32 %v1753_v7, %v1441_v6  ;;  %v1838_v6 = vrot.slane %v4063_v13, 2 }
 0x1a7   : > { %v1025_v5 = vpop.f32.mrf.mxu2 }
 0x1a8   : > { %v1081_v45 = vadd.f32 %v1025_v5, %v826_v53  ;;  %v828_v48 = vpop.f32.mrf.mxu1 }
 0x1a9   : > { %v829_v61 = vadd.f32 %v828_v48, %v4446_v39  ;;  %v2482_v39 = vshrl.u32 %v4785_v55, 16 }
 0x1aa   : > { %v1442_v51 = vadd.f32 %v1386_v36, %v1081_v45  ;;  %v1758_v58 = vpop.f32.mrf.mxu0  ;;  %v1396_v7 = vpop.f32.mrf.mxu3  ;;  %v2480_v36 = vsel %vm2427_vm5, %v2470_v24, %v2479_v2  ;;  %v2804_v24 = vrot.slane %v4739_v4, 3  ;;  %v1839_v45 = vsel %vm1830_vm6, %v1836_v20, %v1838_v6 }
 0x1ab   : > { %3822 = vmatmul.msk.bf16.gmra.mxu1 %vm562_vm2, %v1837_v22  ;;  %v2484_v22 = vrot.slane %v2482_v39, 2 }
 0x1ac   : > { %3909 = vmatmul.msk.bf16.gmra.mxu2 %vm562_vm2, %v2198_v42  ;;  %v4779_v25 = vadd.f32 %v1755_v56, %v1442_v51  ;;  %v2199_v56 = vrot.slane %v4739_v4, 2  ;;  %v2487_v42 = vrot.slane %v2485_v28, 3  ;;  %v2805_v51 = vsel %vm2796_vm7, %v2802_v62, %v2804_v24 }
 0x1ad   : > { %3947 = vmatmul.msk.bf16.gmra.mxu0 %vm562_vm2, %v2803_v1 }
 0x1ae   : > { %3930 = vmatmul.msk.bf16.gmra.mxu3 %vm562_vm2, %v2480_v36  ;;  %v2200_v48 = vsel %vm1830_vm6, %v2197_v27, %v2199_v56  ;;  %v2488_v4 = vor.u32 %v2487_v42, %v2484_v22  ;;  %v4064_v36 = vld [vmem:[%s4180_s9 + $0x30] sm:$0xff] }
 0x1af   : > { %v1028_v63 = vpop.f32.mrf.mxu2 }
 0x1b0   : > { %v1082_v54 = vadd.f32 %v1028_v63, %v829_v61  ;;  %v830_v29 = vpop.f32.mrf.mxu1  ;;  %v4807_v63 = vld [vmem:[%s4180_s9 + $0x48] sm:$0xff] }
 0x1b1   : > { %v831_v16 = vadd.f32 %v830_v29, %v4457_v50  ;;  %v2494_v13 = vshll.u32 %v4807_v63, 16 }
 0x1b2   : > { %v1443_v19 = vadd.f32 %v1389_v49, %v1082_v54  ;;  %v1760_v47 = vpop.f32.mrf.mxu0  ;;  %v1399_v53 = vpop.f32.mrf.mxu3 }
 0x1b4   : > { %v4788_v8 = vadd.f32 %v1758_v58, %v1443_v19  ;;  %v1840_v19 = vrot.slane %v4064_v36, 2  ;;  %v2203_v36 = vrot.slane %v4785_v55, 2 }
 0x1b7   : > { %v1030_v32 = vpop.f32.mrf.mxu2 }
 0x1b8   : > { %v1083_v49 = vadd.f32 %v1030_v32, %v831_v16  ;;  %v833_v5 = vpop.f32.mrf.mxu1 }
 0x1b9   : > { %v834_v20 = vadd.f32 %v833_v5, %v4472_v3  ;;  %v2491_v3 = vshrl.u32 %v4807_v63, 16 }
 0x1ba   : > { %v1444_v40 = vadd.f32 %v1391_v52, %v1083_v49  ;;  %v1763_v41 = vpop.f32.mrf.mxu0  ;;  %v1401_v58 = vpop.f32.mrf.mxu3  ;;  %v2489_v52 = vsel %vm2427_vm5, %v2479_v2, %v2488_v4  ;;  %v2806_v2 = vrot.slane %v4763_v57, 3  ;;  %v1841_v49 = vsel %vm1830_vm6, %v1838_v6, %v1840_v19  ;;  %v5429_v6 = vld [vmem:[#allocation8_spill] sm:$0xff] }
 0x1bb   : > { %3823 = vmatmul.msk.bf16.gmra.mxu1 %vm562_vm2, %v1839_v45  ;;  %v2493_v45 = vrot.slane %v2491_v3, 2 }
 0x1bc   : > { %3910 = vmatmul.msk.bf16.gmra.mxu2 %vm562_vm2, %v2200_v48  ;;  %v4801_v50 = vadd.f32 %v1760_v47, %v1444_v40  ;;  %v2201_v47 = vrot.slane %v4763_v57, 2  ;;  %v2496_v48 = vrot.slane %v2494_v13, 3  ;;  %v2807_v40 = vsel %vm2796_vm7, %v2804_v24, %v2806_v2 }
 0x1bd   : > { %3948 = vmatmul.msk.bf16.gmra.mxu0 %vm562_vm2, %v2805_v51 }
 0x1be   : > { %3931 = vmatmul.msk.bf16.gmra.mxu3 %vm562_vm2, %v2489_v52  ;;  %v2202_v5 = vsel %vm1830_vm6, %v2199_v56, %v2201_v47  ;;  %v2497_v57 = vor.u32 %v2496_v48, %v2493_v45  ;;  %v2204_v45 = vsel %vm1830_vm6, %v2201_v47, %v2203_v36 }
 0x1bf   : > { %v1033_v27 = vpop.f32.mrf.mxu2 }
 0x1c0   : > { %v1084_v1 = vadd.f32 %v1033_v27, %v834_v20  ;;  %v835_v61 = vpop.f32.mrf.mxu1 }
 0x1c1   : > { %v836_v39 = vadd.f32 %v835_v61, %v4483_v15 }
 0x1c2   : > { %v1445_v62 = vadd.f32 %v1394_v33, %v1084_v1  ;;  %v1765_v54 = vpop.f32.mrf.mxu0  ;;  %v1404_v16 = vpop.f32.mrf.mxu3  ;;  %v4829_v1 = vld [vmem:[%s4180_s9 + $0x50] sm:$0xff] }
 0x1c3   : > { %v2500_v3 = vshrl.u32 %v4829_v1, 16  ;;  %v2503_v13 = vshll.u32 %v4829_v1, 16 }
 0x1c4   : > { %v4810_v29 = vadd.f32 %v1763_v41, %v1445_v62  ;;  %v4065_v62 = vld [vmem:[%s4180_s9 + $0x38] sm:$0xff] }
 0x1c5   : > { %v2502_v48 = vrot.slane %v2500_v3, 2 }
 0x1c7   : > { %v1035_v28 = vpop.f32.mrf.mxu2 }
 0x1c8   : > { %v1085_v33 = vadd.f32 %v1035_v28, %v836_v39  ;;  %v838_v32 = vpop.f32.mrf.mxu1  ;;  %v5430_v39 = vld [vmem:[#allocation9_spill] sm:$0xff] }
 0x1c9   : > { %v839_v41 = vadd.f32 %v838_v32, %v5429_v6 }
 0x1ca   : > { %v1446_v22 = vadd.f32 %v1396_v7, %v1085_v33  ;;  %v1768_v42 = vpop.f32.mrf.mxu0  ;;  %v1406_v51 = vpop.f32.mrf.mxu3  ;;  %v2498_v7 = vsel %vm2427_vm5, %v2488_v4, %v2497_v57  ;;  %v2808_v4 = vrot.slane %v4785_v55, 3 }
 0x1cb   : > { %3824 = vmatmul.msk.bf16.gmra.mxu1 %vm562_vm2, %v1841_v49 }
 0x1cc   : > { %3911 = vmatmul.msk.bf16.gmra.mxu2 %vm562_vm2, %v2202_v5  ;;  %v4823_v15 = vadd.f32 %v1765_v54, %v1446_v22  ;;  %v1842_v54 = vrot.slane %v4065_v62, 2  ;;  %v2505_v22 = vrot.slane %v2503_v13, 3  ;;  %v2809_v6 = vsel %vm2796_vm7, %v2806_v2, %v2808_v4 }
 0x1cd   : > { %3949 = vmatmul.msk.bf16.gmra.mxu0 %vm562_vm2, %v2807_v40 }
 0x1ce   : > { %3932 = vmatmul.msk.bf16.gmra.mxu3 %vm562_vm2, %v2498_v7  ;;  %v1843_v5 = vsel %vm1830_vm6, %v1840_v19, %v1842_v54  ;;  %v5431_v19 = vld [vmem:[#allocation2_spill] sm:$0xff] }
 0x1cf   : > { %v1038_v56 = vpop.f32.mrf.mxu2 }
 0x1d0   : > { %v1086_v20 = vadd.f32 %v1038_v56, %v839_v41  ;;  %v840_v27 = vpop.f32.mrf.mxu1  ;;  %v2506_v41 = vor.u32 %v2505_v22, %v2502_v48 }
 0x1d1   : > { %v841_v28 = vadd.f32 %v840_v27, %v5430_v39  ;;  %v2205_v39 = vrot.slane %v4807_v63, 2 }
 0x1d2   : > { %v1447_v24 = vadd.f32 %v1399_v53, %v1086_v20  ;;  %v1770_v61 = vpop.f32.mrf.mxu0  ;;  %v1409_v32 = vpop.f32.mrf.mxu3 }
 0x1d4   : > { %v4832_v52 = vadd.f32 %v1768_v42, %v1447_v24  ;;  %v4851_v24 = vld [vmem:[%s4180_s9 + $0x58] sm:$0xff] }
 0x1d7   : > { %v1040_v33 = vpop.f32.mrf.mxu2 }
 0x1d8   : > { %v1087_v53 = vadd.f32 %v1040_v33, %v841_v28  ;;  %v843_v49 = vpop.f32.mrf.mxu1  ;;  %v2509_v28 = vshrl.u32 %v4851_v24, 16  ;;  %v2512_v33 = vshll.u32 %v4851_v24, 16 }
 0x1d9   : > { %v844_v56 = vadd.f32 %v843_v49, %v5431_v19 }
 0x1da   : > { %v1448_v42 = vadd.f32 %v1401_v58, %v1087_v53  ;;  %v1773_v40 = vpop.f32.mrf.mxu0  ;;  %v1411_v20 = vpop.f32.mrf.mxu3  ;;  %v2507_v58 = vsel %vm2427_vm5, %v2497_v57, %v2506_v41  ;;  %v5432_v53 = vld [vmem:[#allocation3_spill] sm:$0xff]  ;;  %v2810_v57 = vrot.slane %v4807_v63, 3 }
 0x1db   : > { %3825 = vmatmul.msk.bf16.gmra.mxu1 %vm562_vm2, %v1843_v5 }
 0x1dc   : > { %3912 = vmatmul.msk.bf16.gmra.mxu2 %vm562_vm2, %v2204_v45  ;;  %v4845_v55 = vadd.f32 %v1770_v61, %v1448_v42  ;;  %v4066_v61 = vld [vmem:[%s4180_s9 + $0x40] sm:$0xff]  ;;  %v2206_v42 = vsel %vm1830_vm6, %v2203_v36, %v2205_v39 }
 0x1dd   : > { %3950 = vmatmul.msk.bf16.gmra.mxu0 %vm562_vm2, %v2809_v6  ;;  %v1844_v13 = vrot.slane %v4066_v61, 2  ;;  %v2514_v6 = vrot.slane %v2512_v33, 3 }
 0x1de   : > { %3933 = vmatmul.msk.bf16.gmra.mxu3 %vm562_vm2, %v2507_v58 }
 0x1df   : > { %v1043_v47 = vpop.f32.mrf.mxu2  ;;  %v1845_v22 = vsel %vm1830_vm6, %v1842_v54, %v1844_v13  ;;  %v5433_v54 = vld [vmem:[#allocation4_spill] sm:$0xff] }
 0x1e0   : > { %v1088_v27 = vadd.f32 %v1043_v47, %v844_v56  ;;  %v845_v7 = vpop.f32.mrf.mxu1  ;;  %v2811_v47 = vsel %vm2796_vm7, %v2808_v4, %v2810_v57 }
 0x1e1   : > { %v846_v49 = vadd.f32 %v845_v7, %v5432_v53 }
 0x1e2   : > { %v1449_v2 = vadd.f32 %v1404_v16, %v1088_v27  ;;  %v1775_v62 = vpop.f32.mrf.mxu0  ;;  %v1414_v45 = vpop.f32.mrf.mxu3 }
 0x1e4   : > { %v4854_v3 = vadd.f32 %v1773_v40, %v1449_v2  ;;  %v2511_v40 = vrot.slane %v2509_v28, 2  ;;  %v4873_v28 = vld [vmem:[%s4180_s9 + $0x60] sm:$0xff] }
 0x1e6   : > { %v2515_v27 = vor.u32 %v2514_v6, %v2511_v40 }
 0x1e7   : > { %v1045_v5 = vpop.f32.mrf.mxu2 }
 0x1e8   : > { %v1089_v16 = vadd.f32 %v1045_v5, %v846_v49  ;;  %v848_v48 = vpop.f32.mrf.mxu1  ;;  %v2207_v5 = vrot.slane %v4829_v1, 2 }
 0x1e9   : > { %v849_v7 = vadd.f32 %v848_v48, %v5433_v54  ;;  %v2521_v48 = vshll.u32 %v4873_v28, 16 }
 0x1ea   : > { %v1450_v19 = vadd.f32 %v1406_v51, %v1089_v16  ;;  %v1778_v56 = vpop.f32.mrf.mxu0  ;;  %v1416_v58 = vpop.f32.mrf.mxu3  ;;  %v2516_v51 = vsel %vm2427_vm5, %v2506_v41, %v2515_v27  ;;  %v2518_v16 = vshrl.u32 %v4873_v28, 16  ;;  %v2812_v41 = vrot.slane %v4829_v1, 3 }
 0x1eb   : > { %3826 = vmatmul.msk.bf16.gmra.mxu1 %vm562_vm2, %v1845_v22  ;;  %v5434_v22 = vld [vmem:[#allocation5_spill] sm:$0xff] }
 0x1ec   : > { %3913 = vmatmul.msk.bf16.gmra.mxu2 %vm562_vm2, %v2206_v42  ;;  %v4867_v63 = vadd.f32 %v1775_v62, %v1450_v19  ;;  %v4067_v62 = vld [vmem:[%s4180_s9 + $0x48] sm:$0xff]  ;;  %v2520_v54 = vrot.slane %v2518_v16, 2 }
 0x1ed   : > { %3951 = vmatmul.msk.bf16.gmra.mxu0 %vm562_vm2, %v2811_v47  ;;  %v1846_v49 = vrot.slane %v4067_v62, 2 }
 0x1ee   : > { %3934 = vmatmul.msk.bf16.gmra.mxu3 %vm562_vm2, %v2516_v51  ;;  %v2813_v51 = vsel %vm2796_vm7, %v2810_v57, %v2812_v41 }
 0x1ef   : > { %v1048_v36 = vpop.f32.mrf.mxu2  ;;  %v1847_v47 = vsel %vm1830_vm6, %v1844_v13, %v1846_v49  ;;  %v5435_v13 = vld [vmem:[#allocation6_spill] sm:$0xff] }
 0x1f0   : > { %v1090_v2 = vadd.f32 %v1048_v36, %v849_v7  ;;  %v850_v61 = vpop.f32.mrf.mxu1  ;;  %v2523_v7 = vrot.slane %v2521_v48, 3 }
 0x1f1   : > { %v851_v42 = vadd.f32 %v850_v61, %v5434_v22  ;;  %v4895_v22 = vld [vmem:[%s4180_s9 + $0x68] sm:$0xff] }
 0x1f2   : > { %v1451_v4 = vadd.f32 %v1409_v32, %v1090_v2  ;;  %v1780_v33 = vpop.f32.mrf.mxu0  ;;  %v2664_v6 = vpop.f32.mrf.mxu3  ;;  %v2524_v61 = vor.u32 %v2523_v7, %v2520_v54  ;;  %v5436_v54 = vld [vmem:[#allocation7_spill] sm:$0xff] }
 0x1f4   : > { %v4876_v53 = vadd.f32 %v1778_v56, %v1451_v4  ;;  %v2208_v56 = vsel %vm1830_vm6, %v2205_v39, %v2207_v5 }
 0x1f7   : > { %v1050_v40 = vpop.f32.mrf.mxu2 }
 0x1f8   : > { %v1091_v32 = vadd.f32 %v1050_v40, %v851_v42  ;;  %v853_v19 = vpop.f32.mrf.mxu1 }
 0x1f9   : > { %v854_v4 = vadd.f32 %v853_v19, %v5435_v13  ;;  %v2527_v19 = vshrl.u32 %v4895_v22, 16 }
 0x1fa   : > { %v1452_v36 = vadd.f32 %v1411_v20, %v1091_v32  ;;  %v1783_v2 = vpop.f32.mrf.mxu0  ;;  %v2666_v62 = vpop.f32.mrf.mxu3  ;;  %v2525_v20 = vsel %vm2427_vm5, %v2515_v27, %v2524_v61  ;;  %v2814_v27 = vrot.slane %v4851_v24, 3 }
 0x1fb   : > { %3827 = vmatmul.msk.bf16.gmra.mxu1 %vm562_vm2, %v1847_v47  ;;  %v2209_v47 = vrot.slane %v4851_v24, 2 }
 0x1fc   : > { %3914 = vmatmul.msk.bf16.gmra.mxu2 %vm562_vm2, %v2208_v56  ;;  %v4889_v1 = vadd.f32 %v1780_v33, %v1452_v36  ;;  %v4068_v33 = vld [vmem:[%s4180_s9 + $0x50] sm:$0xff]  ;;  %v2530_v56 = vshll.u32 %v4895_v22, 16 }
 0x1fd   : > { %3952 = vmatmul.msk.bf16.gmra.mxu0 %vm562_vm2, %v2813_v51  ;;  %v1848_v32 = vrot.slane %v4068_v33, 2  ;;  %v2815_v33 = vsel %vm2796_vm7, %v2812_v41, %v2814_v27  ;;  %v4918_v41 = vld [vmem:[%s4180_s9 + $0x70] sm:$0xff] }
 0x1fe   : > { %3935 = vmatmul.msk.bf16.gmra.mxu3 %vm562_vm2, %v2525_v20 }
 0x1ff   : > { %v1053_v39 = vpop.f32.mrf.mxu2 }
 0x200   : > { %v1092_v16 = vadd.f32 %v1053_v39, %v854_v4  ;;  %v855_v48 = vpop.f32.mrf.mxu1  ;;  %v2210_v4 = vsel %vm1830_vm6, %v2207_v5, %v2209_v47  ;;  %v2529_v39 = vrot.slane %v2527_v19, 2 }
 0x201   : > { %v856_v7 = vadd.f32 %v855_v48, %v5436_v54 }
 0x202   : > { %v1453_v57 = vadd.f32 %v1414_v45, %v1092_v16  ;;  %v1785_v42 = vpop.f32.mrf.mxu0  ;;  %v2669_v51 = vpop.f32.mrf.mxu3  ;;  %v2532_v16 = vrot.slane %v2530_v56, 3 }
 0x204   : > { %v4898_v40 = vadd.f32 %v1783_v2, %v1453_v57  ;;  %v1849_v2 = vsel %vm1830_vm6, %v1846_v49, %v1848_v32  ;;  %v2533_v48 = vor.u32 %v2532_v16, %v2529_v39 }
 0x206   : > { %v2534_v54 = vsel %vm2427_vm5, %v2524_v61, %v2533_v48  ;;  %v2536_v61 = vshrl.u32 %v4918_v41, 16 }
 0x207   : > { %v1055_v36 = vpop.f32.mrf.mxu2 }
 0x208   : > { %v1093_v45 = vadd.f32 %v1055_v36, %v856_v7  ;;  %v1934_v13 = vpop.f32.mrf.mxu1 }
 0x209   : > { %v2024_v49 = vadd.f32 %v1934_v13, %v4517_v34  ;;  %v4069_v34 = vld [vmem:[%s4180_s9 + $0x58] sm:$0xff]  ;;  %v2211_v13 = vrot.slane %v4873_v28, 2 }
 0x20a   : > { %v1454_v20 = vadd.f32 %v1416_v58, %v1093_v45  ;;  %v2900_v57 = vpop.f32.mrf.mxu0  ;;  %v2671_v19 = vpop.f32.mrf.mxu3  ;;  %v1850_v45 = vrot.slane %v4069_v34, 2 }
 0x20b   : > { %3828 = vmatmul.msk.bf16.gmra.mxu1 %vm562_vm2, %v1849_v2  ;;  %v2539_v2 = vshll.u32 %v4918_v41, 16 }
 0x20c   : > { %3915 = vmatmul.msk.bf16.gmra.mxu2 %vm562_vm2, %v2210_v4  ;;  %v4911_v24 = vadd.f32 %v1785_v42, %v1454_v20  ;;  %v2816_v4 = vrot.slane %v4873_v28, 3 }
 0x20d   : > { %3953 = vmatmul.msk.bf16.gmra.mxu0 %vm562_vm2, %v2815_v33  ;;  %v1851_v33 = vsel %vm1830_vm6, %v1848_v32, %v1850_v45 }
 0x20e   : > { %3936 = vmatmul.msk.bf16.gmra.mxu3 %vm562_vm2, %v2534_v54  ;;  %v2817_v34 = vsel %vm2796_vm7, %v2814_v27, %v2816_v4 }
 0x20f   : > { %v2295_v5 = vpop.f32.mrf.mxu2 }
 0x210   : > { %v2385_v56 = vadd.f32 %v2295_v5, %v2024_v49  ;;  %v1936_v58 = vpop.f32.mrf.mxu1  ;;  %v2212_v49 = vsel %vm1830_vm6, %v2209_v47, %v2211_v13  ;;  %v2538_v5 = vrot.slane %v2536_v61, 2 }
 0x212   : > { %v2754_v7 = vadd.f32 %v2664_v6, %v2385_v56  ;;  %v2902_v36 = vpop.f32.mrf.mxu0  ;;  %v2025_v6 = vadd.f32 %v1936_v58, %v4527_v26  ;;  %v2674_v16 = vpop.f32.mrf.mxu3  ;;  %v2541_v56 = vrot.slane %v2539_v2, 3 }
 0x214   : > { %v4925_v42 = vadd.f32 %v2900_v57, %v2754_v7  ;;  %v2542_v26 = vor.u32 %v2541_v56, %v2538_v5 }
 0x216   : > { %5437 = vst [vmem:[#allocation8_spill] sm:$0xff] %v4925_v42  ;;  %v2543_v27 = vsel %vm2427_vm5, %v2533_v48, %v2542_v26 }
 0x217   : > { %3026 = vst [vmem:[%s4923_s27] sm:$0xff] %v4925_v42  ;;  %v2297_v39 = vpop.f32.mrf.mxu2 }
 0x218   : > { %v2386_v20 = vadd.f32 %v2297_v39, %v2025_v6  ;;  %v1939_v57 = vpop.f32.mrf.mxu1  ;;  %v4070_v39 = vld [vmem:[%s4180_s9 + $0x60] sm:$0xff] }
 0x219   : > { %v2026_v28 = vadd.f32 %v1939_v57, %v4533_v18 }
 0x21a   : > { %v2755_v54 = vadd.f32 %v2666_v62, %v2386_v20  ;;  %v2905_v7 = vpop.f32.mrf.mxu0  ;;  %v2676_v62 = vpop.f32.mrf.mxu3  ;;  %v1852_v20 = vrot.slane %v4070_v39, 2 }
 0x21b   : > { %3829 = vmatmul.msk.bf16.gmra.mxu1 %vm562_vm2, %v1851_v33  ;;  %v2213_v33 = vrot.slane %v4895_v22, 2 }
 0x21c   : > { %v4939_v42 = vadd.f32 %v2902_v36, %v2755_v54  ;;  %3916 = vmatmul.msk.bf16.gmra.mxu2 %vm562_vm2, %v2212_v49  ;;  %v4949_v36 = vld [vmem:[%s4180_s9 + $0x78] sm:$0xff]  ;;  %v2818_v49 = vrot.slane %v4895_v22, 3 }
 0x21d   : > { %3954 = vmatmul.msk.bf16.gmra.mxu0 %vm562_vm2, %v2817_v34  ;;  %v2545_v18 = vshrl.u32 %v4949_v36, 16  ;;  %v2548_v57 = vshll.u32 %v4949_v36, 16  ;;  %v2214_v34 = vsel %vm1830_vm6, %v2211_v13, %v2213_v33 }
 0x21e   : > { %3027 = vst [vmem:[%s4923_s27 + $0x8] sm:$0xff] %v4939_v42  ;;  %3937 = vmatmul.msk.bf16.gmra.mxu3 %vm562_vm2, %v2543_v27 }
 0x21f   : > { %v2300_v32 = vpop.f32.mrf.mxu2 }
 0x220   : > { %v2387_v47 = vadd.f32 %v2300_v32, %v2026_v28  ;;  %v1941_v58 = vpop.f32.mrf.mxu1  ;;  %v2547_v28 = vrot.slane %v2545_v18, 2  ;;  %v2550_v32 = vrot.slane %v2548_v57, 3 }
 0x221   : > { %v2027_v48 = vadd.f32 %v1941_v58, %v4543_v30 }
 0x222   : > { %v2756_v61 = vadd.f32 %v2669_v51, %v2387_v47  ;;  %v2907_v2 = vpop.f32.mrf.mxu0  ;;  %v2679_v5 = vpop.f32.mrf.mxu3  ;;  %v2551_v30 = vor.u32 %v2550_v32, %v2547_v28 }
 0x224   : > { %v4951_v6 = vadd.f32 %v2905_v7, %v2756_v61  ;;  %v1853_v7 = vsel %vm1830_vm6, %v1850_v45, %v1852_v20  ;;  %v2819_v61 = vsel %vm2796_vm7, %v2816_v4, %v2818_v49  ;;  %v2552_v4 = vsel %vm2427_vm5, %v2542_v26, %v2551_v30 }
 0x226   : > { %3028 = vst [vmem:[%s4923_s27 + $0x10] sm:$0xff] %v4951_v6 }
 0x227   : > { %v2302_v51 = vpop.f32.mrf.mxu2 }
 0x228   : > { %v2388_v56 = vadd.f32 %v2302_v51, %v2027_v48  ;;  %v1944_v54 = vpop.f32.mrf.mxu1  ;;  %v4071_v51 = vld [vmem:[%s4180_s9 + $0x68] sm:$0xff] }
 0x229   : > { %v2028_v22 = vadd.f32 %v1944_v54, %v4549_v60 }
 0x22a   : > { %v2757_v47 = vadd.f32 %v2671_v19, %v2388_v56  ;;  %v2910_v27 = vpop.f32.mrf.mxu0  ;;  %v2681_v19 = vpop.f32.mrf.mxu3  ;;  %v1854_v56 = vrot.slane %v4071_v51, 2 }
 0x22b   : > { %3830 = vmatmul.msk.bf16.gmra.mxu1 %vm562_vm2, %v1853_v7  ;;  %v2215_v7 = vrot.slane %v4918_v41, 2 }
 0x22c   : > { %v4965_v39 = vadd.f32 %v2907_v2, %v2757_v47  ;;  %3917 = vmatmul.msk.bf16.gmra.mxu2 %vm562_vm2, %v2214_v34  ;;  %v4975_v2 = vld [vmem:[%s4180_s9 + $0x80] sm:$0xff]  ;;  %v2820_v34 = vrot.slane %v4918_v41, 3 }
 0x22d   : > { %3955 = vmatmul.msk.bf16.gmra.mxu0 %vm562_vm2, %v2819_v61  ;;  %v2554_v60 = vshrl.u32 %v4975_v2, 16  ;;  %v2557_v54 = vshll.u32 %v4975_v2, 16  ;;  %v2216_v61 = vsel %vm1830_vm6, %v2213_v33, %v2215_v7 }
 0x22e   : > { %3029 = vst [vmem:[%s4923_s27 + $0x18] sm:$0xff] %v4965_v39  ;;  %3938 = vmatmul.msk.bf16.gmra.mxu3 %vm562_vm2, %v2552_v4 }
 0x22f   : > { %v2305_v45 = vpop.f32.mrf.mxu2 }
 0x230   : > { %v2389_v13 = vadd.f32 %v2305_v45, %v2028_v22  ;;  %v1946_v58 = vpop.f32.mrf.mxu1  ;;  %v2556_v22 = vrot.slane %v2554_v60, 2  ;;  %v2559_v45 = vrot.slane %v2557_v54, 3 }
 0x231   : > { %v2029_v26 = vadd.f32 %v1946_v58, %v4559_v37 }
 0x232   : > { %v2758_v18 = vadd.f32 %v2674_v16, %v2389_v13  ;;  %v2912_v57 = vpop.f32.mrf.mxu0  ;;  %v2684_v28 = vpop.f32.mrf.mxu3  ;;  %v2560_v37 = vor.u32 %v2559_v45, %v2556_v22 }
 0x234   : > { %v4977_v48 = vadd.f32 %v2910_v27, %v2758_v18  ;;  %v1855_v27 = vsel %vm1830_vm6, %v1852_v20, %v1854_v56  ;;  %v2821_v18 = vsel %vm2796_vm7, %v2818_v49, %v2820_v34  ;;  %v2561_v49 = vsel %vm2427_vm5, %v2551_v30, %v2560_v37 }
 0x236   : > { %3030 = vst [vmem:[%s4923_s27 + $0x20] sm:$0xff] %v4977_v48 }
 0x237   : > { %v2307_v16 = vpop.f32.mrf.mxu2 }
 0x238   : > { %v2390_v32 = vadd.f32 %v2307_v16, %v2029_v26  ;;  %v1949_v47 = vpop.f32.mrf.mxu1  ;;  %v4072_v16 = vld [vmem:[%s4180_s9 + $0x70] sm:$0xff] }
 0x239   : > { %v2030_v41 = vadd.f32 %v1949_v47, %v4565_v10 }
 0x23a   : > { %v2759_v13 = vadd.f32 %v2676_v62, %v2390_v32  ;;  %v2915_v4 = vpop.f32.mrf.mxu0  ;;  %v2686_v62 = vpop.f32.mrf.mxu3  ;;  %v1856_v32 = vrot.slane %v4072_v16, 2 }
 0x23b   : > { %3831 = vmatmul.msk.bf16.gmra.mxu1 %vm562_vm2, %v1855_v27  ;;  %v2217_v27 = vrot.slane %v4949_v36, 2 }
 0x23c   : > { %v4991_v51 = vadd.f32 %v2912_v57, %v2759_v13  ;;  %3918 = vmatmul.msk.bf16.gmra.mxu2 %vm562_vm2, %v2216_v61  ;;  %v5001_v57 = vld [vmem:[%s4180_s9 + $0x88] sm:$0xff]  ;;  %v2822_v61 = vrot.slane %v4949_v36, 3 }
 0x23d   : > { %3956 = vmatmul.msk.bf16.gmra.mxu0 %vm562_vm2, %v2821_v18  ;;  %v2563_v10 = vshrl.u32 %v5001_v57, 16  ;;  %v2566_v47 = vshll.u32 %v5001_v57, 16  ;;  %v2218_v18 = vsel %vm1830_vm6, %v2215_v7, %v2217_v27 }
 0x23e   : > { %3031 = vst [vmem:[%s4923_s27 + $0x28] sm:$0xff] %v4991_v51  ;;  %3939 = vmatmul.msk.bf16.gmra.mxu3 %vm562_vm2, %v2561_v49 }
 0x23f   : > { %v2310_v20 = vpop.f32.mrf.mxu2 }
 0x240   : > { %v2391_v33 = vadd.f32 %v2310_v20, %v2030_v41  ;;  %v1951_v58 = vpop.f32.mrf.mxu1  ;;  %v2565_v41 = vrot.slane %v2563_v10, 2  ;;  %v2568_v20 = vrot.slane %v2566_v47, 3 }
 0x241   : > { %v2031_v30 = vadd.f32 %v1951_v58, %v4575_v0 }
 0x242   : > { %v2760_v60 = vadd.f32 %v2679_v5, %v2391_v33  ;;  %v2917_v54 = vpop.f32.mrf.mxu0  ;;  %v2689_v22 = vpop.f32.mrf.mxu3  ;;  %v2569_v0 = vor.u32 %v2568_v20, %v2565_v41 }
 0x244   : > { %v5003_v26 = vadd.f32 %v2915_v4, %v2760_v60  ;;  %v1857_v4 = vsel %vm1830_vm6, %v1854_v56, %v1856_v32  ;;  %v2823_v60 = vsel %vm2796_vm7, %v2820_v34, %v2822_v61  ;;  %v2570_v34 = vsel %vm2427_vm5, %v2560_v37, %v2569_v0 }
 0x246   : > { %3032 = vst [vmem:[%s4923_s27 + $0x30] sm:$0xff] %v5003_v26 }
 0x247   : > { %v2312_v5 = vpop.f32.mrf.mxu2 }
 0x248   : > { %v2392_v45 = vadd.f32 %v2312_v5, %v2031_v30  ;;  %v1954_v13 = vpop.f32.mrf.mxu1  ;;  %v4073_v5 = vld [vmem:[%s4180_s9 + $0x78] sm:$0xff] }
 0x249   : > { %v2032_v36 = vadd.f32 %v1954_v13, %v4581_v11 }
 0x24a   : > { %v2761_v33 = vadd.f32 %v2681_v19, %v2392_v45  ;;  %v2920_v49 = vpop.f32.mrf.mxu0  ;;  %v2691_v19 = vpop.f32.mrf.mxu3  ;;  %v1858_v45 = vrot.slane %v4073_v5, 2 }
 0x24b   : > { %3832 = vmatmul.msk.bf16.gmra.mxu1 %vm562_vm2, %v1857_v4  ;;  %v2219_v4 = vrot.slane %v4975_v2, 2 }
 0x24c   : > { %v5017_v16 = vadd.f32 %v2917_v54, %v2761_v33  ;;  %3919 = vmatmul.msk.bf16.gmra.mxu2 %vm562_vm2, %v2218_v18  ;;  %v5027_v54 = vld [vmem:[%s4180_s9 + $0x90] sm:$0xff]  ;;  %v2824_v18 = vrot.slane %v4975_v2, 3 }
 0x24d   : > { %3957 = vmatmul.msk.bf16.gmra.mxu0 %vm562_vm2, %v2823_v60  ;;  %v2572_v11 = vshrl.u32 %v5027_v54, 16  ;;  %v2575_v13 = vshll.u32 %v5027_v54, 16  ;;  %v2220_v60 = vsel %vm1830_vm6, %v2217_v27, %v2219_v4 }
 0x24e   : > { %3033 = vst [vmem:[%s4923_s27 + $0x38] sm:$0xff] %v5017_v16  ;;  %3940 = vmatmul.msk.bf16.gmra.mxu3 %vm562_vm2, %v2570_v34 }
 0x24f   : > { %v2315_v56 = vpop.f32.mrf.mxu2 }
 0x250   : > { %v2393_v7 = vadd.f32 %v2315_v56, %v2032_v36  ;;  %v1956_v58 = vpop.f32.mrf.mxu1  ;;  %v2574_v36 = vrot.slane %v2572_v11, 2  ;;  %v2577_v56 = vrot.slane %v2575_v13, 3 }
 0x251   : > { %v2033_v37 = vadd.f32 %v1956_v58, %v4591_v17 }
 0x252   : > { %v2762_v10 = vadd.f32 %v2684_v28, %v2393_v7  ;;  %v2922_v47 = vpop.f32.mrf.mxu0  ;;  %v2694_v41 = vpop.f32.mrf.mxu3  ;;  %v2578_v17 = vor.u32 %v2577_v56, %v2574_v36 }
 0x254   : > { %v5029_v30 = vadd.f32 %v2920_v49, %v2762_v10  ;;  %v1859_v49 = vsel %vm1830_vm6, %v1856_v32, %v1858_v45  ;;  %v2825_v10 = vsel %vm2796_vm7, %v2822_v61, %v2824_v18  ;;  %v2579_v58 = vsel %vm2427_vm5, %v2569_v0, %v2578_v17 }
 0x256   : > { %3034 = vst [vmem:[%s4923_s27 + $0x40] sm:$0xff] %v5029_v30 }
 0x257   : > { %v2317_v28 = vpop.f32.mrf.mxu2 }
 0x258   : > { %v2394_v20 = vadd.f32 %v2317_v28, %v2033_v37  ;;  %v1959_v33 = vpop.f32.mrf.mxu1  ;;  %v4074_v28 = vld [vmem:[%s4180_s9 + $0x80] sm:$0xff] }
 0x259   : > { %v2034_v2 = vadd.f32 %v1959_v33, %v4597_v38  ;;  %v2221_v38 = vrot.slane %v5001_v57, 2 }
 0x25a   : > { %v2763_v7 = vadd.f32 %v2686_v62, %v2394_v20  ;;  %v2925_v34 = vpop.f32.mrf.mxu0  ;;  %v5051_v62 = vpop.f32.mrf.mxu3  ;;  %v1860_v20 = vrot.slane %v4074_v28, 2  ;;  %v2421_v28 = vld [vmem:[%s4180_s9 + $0xa0] sm:$0x7] }
 0x25b   : > { %3833 = vmatmul.msk.bf16.gmra.mxu1 %vm562_vm2, %v1859_v49 }
 0x25c   : > { %v5043_v5 = vadd.f32 %v2922_v47, %v2763_v7  ;;  %3920 = vmatmul.msk.bf16.gmra.mxu2 %vm562_vm2, %v2220_v60  ;;  %v5055_v47 = vld [vmem:[%s4180_s9 + $0x98] sm:$0xff] }
 0x25d   : > { %3958 = vmatmul.msk.bf16.gmra.mxu0 %vm562_vm2, %v2825_v10  ;;  %v2581_v33 = vshrl.u32 %v5055_v47, 16  ;;  %v2584_v49 = vshll.u32 %v5055_v47, 16  ;;  %v2222_v10 = vsel %vm1830_vm6, %v2219_v4, %v2221_v38 }
 0x25e   : > { %5438 = vst [vmem:[#allocation9_spill] sm:$0xff] %v5043_v5  ;;  %3941 = vmatmul.msk.bf16.gmra.mxu3 %vm562_vm2, %v2579_v58 }
 0x25f   : > { %3035 = vst [vmem:[%s4923_s27 + $0x48] sm:$0xff] %v5043_v5  ;;  %v2320_v32 = vpop.f32.mrf.mxu2 }
 0x260   : > { %v2395_v27 = vadd.f32 %v2320_v32, %v2034_v2  ;;  %v1961_v61 = vpop.f32.mrf.mxu1  ;;  %v2583_v2 = vrot.slane %v2581_v33, 2  ;;  %v2586_v32 = vrot.slane %v2584_v49, 3 }
 0x261   : > { %v2035_v0 = vadd.f32 %v1961_v61, %v4607_v31 }
 0x262   : > { %v2764_v11 = vadd.f32 %v2689_v22, %v2395_v27  ;;  %v2927_v13 = vpop.f32.mrf.mxu0  ;;  %v2826_v22 = vrot.slane %v5001_v57, 3  ;;  %v2699_v36 = vpop.f32.mrf.mxu3  ;;  %v2587_v31 = vor.u32 %v2586_v32, %v2583_v2  ;;  %v2425_v57 = vunpack.c.l.b16 %v2421_v28  ;;  %v5439_v2 = vld [vmem:[#allocation10_spill] sm:$0xff] }
 0x263   : > { %v2828_v32 = vrot.slane %v5027_v54, 3 }
 0x264   : > { %v5057_v37 = vadd.f32 %v2925_v34, %v2764_v11  ;;  %v1861_v34 = vsel %vm1830_vm6, %v1858_v45, %v1860_v20  ;;  %v2827_v11 = vsel %vm2796_vm7, %v2824_v18, %v2826_v22  ;;  %v5081_v33 = vpack.c.b16 %v2425_v57, %v2425_v57 }
 0x266   : > { %3036 = vst [vmem:[%s4923_s27 + $0x50] sm:$0xff] %v5057_v37 }
 0x267   : > { %v2322_v60 = vpop.f32.mrf.mxu2 }
 0x268   : > { %v2396_v56 = vadd.f32 %v2322_v60, %v2035_v0  ;;  %v1964_v7 = vpop.f32.mrf.mxu1 }
 0x269   : > { %v2036_v45 = vadd.f32 %v1964_v7, %v4616_v35  ;;  %v2590_v35 = vshrl.u32 %v5081_v33, 16  ;;  %v2593_v7 = vshll.u32 %v5081_v33, 16 }
 0x26a   : > { %v2765_v27 = vadd.f32 %v2691_v19, %v2396_v56  ;;  %v2930_v58 = vpop.f32.mrf.mxu0  ;;  %v2701_v4 = vpop.f32.mrf.mxu3  ;;  %v4075_v56 = vld [vmem:[%s4180_s9 + $0x88] sm:$0xff] }
 0x26b   : > { %3834 = vmatmul.msk.bf16.gmra.mxu1 %vm562_vm2, %v1861_v34  ;;  %v1862_v34 = vrot.slane %v4075_v56, 2 }
 0x26c   : > { %v5072_v5 = vadd.f32 %v2927_v13, %v2765_v27  ;;  %3921 = vmatmul.msk.bf16.gmra.mxu2 %vm562_vm2, %v2222_v10  ;;  %v2588_v13 = vsel %vm2427_vm5, %v2578_v17, %v2587_v31  ;;  %v2223_v10 = vrot.slane %v5027_v54, 2 }
 0x26d   : > { %3959 = vmatmul.msk.bf16.gmra.mxu0 %vm562_vm2, %v2827_v11  ;;  %v1863_v28 = vsel %vm1830_vm6, %v1860_v20, %v1862_v34  ;;  %v5440_v20 = vld [vmem:[#allocation11_spill] sm:$0xff] }
 0x26e   : > { %3037 = vst [vmem:[%s4923_s27 + $0x58] sm:$0xff] %v5072_v5  ;;  %3942 = vmatmul.msk.bf16.gmra.mxu3 %vm562_vm2, %v2588_v13  ;;  %v2224_v57 = vsel %vm1830_vm6, %v2221_v38, %v2223_v10 }
 0x26f   : > { %v2325_v19 = vpop.f32.mrf.mxu2 }
 0x270   : > { %v2397_v18 = vadd.f32 %v2325_v19, %v2036_v45  ;;  %v1966_v61 = vpop.f32.mrf.mxu1  ;;  %v2592_v45 = vrot.slane %v2590_v35, 2  ;;  %v2595_v19 = vrot.slane %v2593_v7, 3 }
 0x271   : > { %v2037_v17 = vadd.f32 %v1966_v61, %v5439_v2 }
 0x272   : > { %v2766_v49 = vadd.f32 %v2694_v41, %v2397_v18  ;;  %v2932_v0 = vpop.f32.mrf.mxu0  ;;  %v2704_v27 = vpop.f32.mrf.mxu3  ;;  %v2596_v54 = vor.u32 %v2595_v19, %v2592_v45 }
 0x274   : > { %v5083_v60 = vadd.f32 %v2930_v58, %v2766_v49  ;;  %v2829_v49 = vsel %vm2796_vm7, %v2826_v22, %v2828_v32  ;;  %v2597_v22 = vsel %vm2427_vm5, %v2587_v31, %v2596_v54 }
 0x276   : > { %3038 = vst [vmem:[%s4923_s27 + $0x60] sm:$0xff] %v5083_v60 }
 0x277   : > { %v2327_v41 = vpop.f32.mrf.mxu2 }
 0x278   : > { %v2398_v58 = vadd.f32 %v2327_v41, %v2037_v17  ;;  %v1969_v11 = vpop.f32.mrf.mxu1  ;;  %v4076_v41 = vld [vmem:[%s4180_s9 + $0x90] sm:$0xff] }
 0x279   : > { %v2038_v38 = vadd.f32 %v1969_v11, %v5440_v20 }
 0x27a   : > { %v2767_v18 = vadd.f32 %v5051_v62, %v2398_v58  ;;  %v2935_v13 = vpop.f32.mrf.mxu0  ;;  %v2706_v62 = vpop.f32.mrf.mxu3  ;;  %v1864_v58 = vrot.slane %v4076_v41, 2 }
 0x27b   : > { %3835 = vmatmul.msk.bf16.gmra.mxu1 %vm562_vm2, %v1863_v28  ;;  %v2225_v28 = vrot.slane %v5055_v47, 2 }
 0x27c   : > { %v5098_v56 = vadd.f32 %v2932_v0, %v2767_v18  ;;  %3922 = vmatmul.msk.bf16.gmra.mxu2 %vm562_vm2, %v2224_v57  ;;  %v2830_v57 = vrot.slane %v5055_v47, 3  ;;  %v1865_v18 = vsel %vm1830_vm6, %v1862_v34, %v1864_v58 }
 0x27d   : > { %3960 = vmatmul.msk.bf16.gmra.mxu0 %vm562_vm2, %v2829_v49 }
 0x27e   : > { %3039 = vst [vmem:[%s4923_s27 + $0x68] sm:$0xff] %v5098_v56  ;;  %3943 = vmatmul.msk.bf16.gmra.mxu3 %vm562_vm2, %v2597_v22  ;;  %v2831_v20 = vsel %vm2796_vm7, %v2828_v32, %v2830_v57 }
 0x27f   : > { %v2330_v61 = vpop.f32.mrf.mxu2 }
 0x280   : > { %v2399_v35 = vadd.f32 %v2330_v61, %v2038_v38  ;;  %v1971_v7 = vpop.f32.mrf.mxu1  ;;  %v2096_v38 = vld [vmem:[%s4180_s9 + $0xa0] sm:$0x3] }
 0x281   : > { %v2039_v11 = vadd.f32 %v1971_v7, %v4672_v44  ;;  %v2172_v44 = vunpack.c.l.b16 %v2096_v38 }
 0x282   : > { %v2768_v0 = vadd.f32 %v2699_v36, %v2399_v35  ;;  %v2937_v2 = vpop.f32.mrf.mxu0  ;;  %v2709_v31 = vpop.f32.mrf.mxu3 }
 0x283   : > { %v2191_v32 = vpack.c.b16 %v2172_v44, %v2172_v44 }
 0x284   : > { %v5107_v17 = vadd.f32 %v2935_v13, %v2768_v0  ;;  %v2226_v13 = vsel %vm1830_vm6, %v2223_v10, %v2225_v28 }
 0x285   : > { %v2227_v41 = vrot.slane %v2191_v32, 2 }
 0x286   : > { %3040 = vst [vmem:[%s4923_s27 + $0x70] sm:$0xff] %v5107_v17 }
 0x287   : > { %v2332_v45 = vpop.f32.mrf.mxu2 }
 0x288   : > { %v2400_v36 = vadd.f32 %v2332_v45, %v2039_v11  ;;  %v1974_v19 = vpop.f32.mrf.mxu1  ;;  %v2832_v45 = vrot.slane %v5081_v33, 3 }
 0x289   : > { %v2040_v47 = vadd.f32 %v1974_v19, %v4686_v9 }
 0x28a   : > { %v2769_v49 = vadd.f32 %v2701_v4, %v2400_v36  ;;  %v2940_v54 = vpop.f32.mrf.mxu0  ;;  %v2711_v4 = vpop.f32.mrf.mxu3 }
 0x28b   : > { %3836 = vmatmul.msk.bf16.gmra.mxu1 %vm562_vm2, %v1865_v18 }
 0x28c   : > { %v5120_v61 = vadd.f32 %v2937_v2, %v2769_v49  ;;  %3923 = vmatmul.msk.bf16.gmra.mxu2 %vm562_vm2, %v2226_v13  ;;  %v1866_v2 = vrot.slane %v4667_v12, 2  ;;  %v2833_v12 = vsel %vm2796_vm7, %v2830_v57, %v2832_v45 }
 0x28d   : > { %3961 = vmatmul.msk.bf16.gmra.mxu0 %vm562_vm2, %v2831_v20 }
 0x28e   : > { %3041 = vst [vmem:[%s4923_s27 + $0x78] sm:$0xff] %v5120_v61  ;;  %v1867_v13 = vsel %vm1830_vm6, %v1864_v58, %v1866_v2 }
 0x28f   : > { %v2335_v34 = vpop.f32.mrf.mxu2 }
 0x290   : > { %v2401_v10 = vadd.f32 %v2335_v34, %v2040_v47  ;;  %v1976_v35 = vpop.f32.mrf.mxu1 }
 0x291   : > { %v2041_v11 = vadd.f32 %v1976_v35, %v4702_v46 }
 0x292   : > { %v2770_v7 = vadd.f32 %v2704_v27, %v2401_v10  ;;  %v2942_v22 = vpop.f32.mrf.mxu0  ;;  %v2714_v36 = vpop.f32.mrf.mxu3  ;;  %v2228_v27 = vsel %vm1830_vm6, %v2225_v28, %v2227_v41 }
 0x294   : > { %v5128_v0 = vadd.f32 %v2940_v54, %v2770_v7 }
 0x296   : > { %3042 = vst [vmem:[%s4923_s27 + $0x80] sm:$0xff] %v5128_v0 }
 0x297   : > { %v2337_v9 = vpop.f32.mrf.mxu2 }
 0x298   : > { %v2402_v19 = vadd.f32 %v2337_v9, %v2041_v11  ;;  %v1979_v18 = vpop.f32.mrf.mxu1 }
 0x299   : > { %v2042_v46 = vadd.f32 %v1979_v18, %v4719_v14 }
 0x29a   : > { %v2771_v49 = vadd.f32 %v2706_v62, %v2402_v19  ;;  %v2945_v54 = vpop.f32.mrf.mxu0  ;;  %v2716_v58 = vpop.f32.mrf.mxu3 }
 0x29b   : > { %3837 = vmatmul.msk.bf16.gmra.mxu1 %vm562_vm2, %v1867_v13 }
 0x29c   : > { %v5138_v20 = vadd.f32 %v2942_v22, %v2771_v49  ;;  %3924 = vmatmul.msk.bf16.gmra.mxu2 %vm562_vm2, %v2228_v27 }
 0x29d   : > { %3962 = vmatmul.msk.bf16.gmra.mxu0 %vm562_vm2, %v2833_v12 }
 0x29e   : > { %3043 = vst [vmem:[%s4923_s27 + $0x88] sm:$0xff] %v5138_v20 }
 0x29f   : > { %v2340_v33 = vpop.f32.mrf.mxu2 }
 0x2a0   : > { %v2403_v62 = vadd.f32 %v2340_v33, %v2042_v46  ;;  %v1981_v28 = vpop.f32.mrf.mxu1 }
 0x2a1   : > { %v2043_v47 = vadd.f32 %v1981_v28, %v4733_v21 }
 0x2a2   : > { %v2772_v38 = vadd.f32 %v2709_v31, %v2403_v62  ;;  %v2947_v44 = vpop.f32.mrf.mxu0  ;;  %v2719_v10 = vpop.f32.mrf.mxu3 }
 0x2a4   : > { %v5146_v57 = vadd.f32 %v2945_v54, %v2772_v38 }
 0x2a6   : > { %3044 = vst [vmem:[%s4923_s27 + $0x90] sm:$0xff] %v5146_v57 }
 0x2a7   : > { %v2342_v34 = vpop.f32.mrf.mxu2 }
 0x2a8   : > { %v2404_v35 = vadd.f32 %v2342_v34, %v2043_v47  ;;  %v1984_v32 = vpop.f32.mrf.mxu1 }
 0x2a9   : > { %v2044_v31 = vadd.f32 %v1984_v32, %v4743_v23 }
 0x2aa   : > { %v2773_v7 = vadd.f32 %v2711_v4, %v2404_v35  ;;  %v2950_v14 = vpop.f32.mrf.mxu0  ;;  %v2721_v45 = vpop.f32.mrf.mxu3 }
 0x2ac   : > { %v5151_v22 = vadd.f32 %v2947_v44, %v2773_v7 }
 0x2ae   : > { %3045 = vst [vmem:[%s4923_s27 + $0x98] sm:$0xff] %v5151_v22 }
 0x2af   : > { %v2345_v2 = vpop.f32.mrf.mxu2 }
 0x2b0   : > { %v2405_v41 = vadd.f32 %v2345_v2, %v2044_v31  ;;  %v1986_v11 = vpop.f32.mrf.mxu1 }
 0x2b1   : > { %v2045_v4 = vadd.f32 %v1986_v11, %v4757_v59 }
 0x2b2   : > { %v2774_v9 = vadd.f32 %v2714_v36, %v2405_v41  ;;  %v2952_v21 = vpop.f32.mrf.mxu0  ;;  %v2724_v23 = vpop.f32.mrf.mxu3 }
 0x2b4   : > { %v5156_v19 = vadd.f32 %v2950_v14, %v2774_v9 }
 0x2b6   : > { %3046 = vst [vmem:[%s4923_s27 + $0xa0] sm:$0xff] %v5156_v19 }
 0x2b7   : > { %v2347_v18 = vpop.f32.mrf.mxu2 }
 0x2b8   : > { %v2406_v13 = vadd.f32 %v2347_v18, %v2045_v4  ;;  %v1989_v27 = vpop.f32.mrf.mxu1 }
 0x2b9   : > { %v2046_v36 = vadd.f32 %v1989_v27, %v4766_v43 }
 0x2ba   : > { %v2775_v49 = vadd.f32 %v2716_v58, %v2406_v13  ;;  %v2955_v54 = vpop.f32.mrf.mxu0  ;;  %v2726_v44 = vpop.f32.mrf.mxu3 }
 0x2bc   : > { %v5161_v12 = vadd.f32 %v2952_v21, %v2775_v49 }
 0x2be   : > { %3047 = vst [vmem:[%s4923_s27 + $0xa8] sm:$0xff] %v5161_v12 }
 0x2bf   : > { %v2350_v46 = vpop.f32.mrf.mxu2 }
 0x2c0   : > { %v2407_v33 = vadd.f32 %v2350_v46, %v2046_v36  ;;  %v1991_v62 = vpop.f32.mrf.mxu1 }
 0x2c1   : > { %v2047_v58 = vadd.f32 %v1991_v62, %v4779_v25 }
 0x2c2   : > { %v2776_v28 = vadd.f32 %v2719_v10, %v2407_v33  ;;  %v2957_v38 = vpop.f32.mrf.mxu0  ;;  %v2729_v31 = vpop.f32.mrf.mxu3 }
 0x2c4   : > { %v5166_v59 = vadd.f32 %v2955_v54, %v2776_v28 }
 0x2c6   : > { %3048 = vst [vmem:[%s4923_s27 + $0xb0] sm:$0xff] %v5166_v59 }
 0x2c7   : > { %v2352_v47 = vpop.f32.mrf.mxu2 }
 0x2c8   : > { %v2408_v34 = vadd.f32 %v2352_v47, %v2047_v58  ;;  %v1994_v35 = vpop.f32.mrf.mxu1 }
 0x2c9   : > { %v2048_v10 = vadd.f32 %v1994_v35, %v4788_v8 }
 0x2ca   : > { %v2777_v32 = vadd.f32 %v2721_v45, %v2408_v34  ;;  %v2960_v7 = vpop.f32.mrf.mxu0  ;;  %v2731_v13 = vpop.f32.mrf.mxu3 }
 0x2cc   : > { %v5171_v43 = vadd.f32 %v2957_v38, %v2777_v32 }
 0x2ce   : > { %3049 = vst [vmem:[%s4923_s27 + $0xb8] sm:$0xff] %v5171_v43 }
 0x2cf   : > { %v2355_v14 = vpop.f32.mrf.mxu2 }
 0x2d0   : > { %v2409_v2 = vadd.f32 %v2355_v14, %v2048_v10  ;;  %v1996_v41 = vpop.f32.mrf.mxu1 }
 0x2d1   : > { %v2049_v45 = vadd.f32 %v1996_v41, %v4801_v50 }
 0x2d2   : > { %v2778_v11 = vadd.f32 %v2724_v23, %v2409_v2  ;;  %v2962_v9 = vpop.f32.mrf.mxu0  ;;  %v2734_v50 = vpop.f32.mrf.mxu3 }
 0x2d4   : > { %v5176_v25 = vadd.f32 %v2960_v7, %v2778_v11 }
 0x2d6   : > { %3050 = vst [vmem:[%s4923_s27 + $0xc0] sm:$0xff] %v5176_v25 }
 0x2d7   : > { %v2357_v21 = vpop.f32.mrf.mxu2 }
 0x2d8   : > { %v2410_v4 = vadd.f32 %v2357_v21, %v2049_v45  ;;  %v1999_v18 = vpop.f32.mrf.mxu1 }
 0x2d9   : > { %v2050_v54 = vadd.f32 %v1999_v18, %v4810_v29 }
 0x2da   : > { %v2779_v27 = vadd.f32 %v2726_v44, %v2410_v4  ;;  %v2965_v8 = vpop.f32.mrf.mxu0  ;;  %v2736_v32 = vpop.f32.mrf.mxu3 }
 0x2dc   : > { %v5181_v49 = vadd.f32 %v2962_v9, %v2779_v27 }
 0x2de   : > { %3051 = vst [vmem:[%s4923_s27 + $0xc8] sm:$0xff] %v5181_v49 }
 0x2df   : > { %v2360_v23 = vpop.f32.mrf.mxu2 }
 0x2e0   : > { %v2411_v36 = vadd.f32 %v2360_v23, %v2050_v54  ;;  %v2001_v46 = vpop.f32.mrf.mxu1 }
 0x2e1   : > { %v2051_v38 = vadd.f32 %v2001_v46, %v4823_v15 }
 0x2e2   : > { %v2780_v33 = vadd.f32 %v2729_v31, %v2411_v36  ;;  %v2967_v62 = vpop.f32.mrf.mxu0  ;;  %v2739_v45 = vpop.f32.mrf.mxu3 }
 0x2e4   : > { %v5186_v28 = vadd.f32 %v2965_v8, %v2780_v33 }
 0x2e6   : > { %3052 = vst [vmem:[%s4923_s27 + $0xd0] sm:$0xff] %v5186_v28 }
 0x2e7   : > { %v2362_v44 = vpop.f32.mrf.mxu2 }
 0x2e8   : > { %v2412_v58 = vadd.f32 %v2362_v44, %v2051_v38  ;;  %v2004_v47 = vpop.f32.mrf.mxu1 }
 0x2e9   : > { %v2052_v7 = vadd.f32 %v2004_v47, %v4832_v52 }
 0x2ea   : > { %v2781_v34 = vadd.f32 %v2731_v13, %v2412_v58  ;;  %v2970_v35 = vpop.f32.mrf.mxu0  ;;  %v2741_v36 = vpop.f32.mrf.mxu3 }
 0x2ec   : > { %v5191_v29 = vadd.f32 %v2967_v62, %v2781_v34 }
 0x2ee   : > { %3053 = vst [vmem:[%s4923_s27 + $0xd8] sm:$0xff] %v5191_v29 }
 0x2ef   : > { %v2365_v10 = vpop.f32.mrf.mxu2 }
 0x2f0   : > { %v2413_v14 = vadd.f32 %v2365_v10, %v2052_v7  ;;  %v2006_v31 = vpop.f32.mrf.mxu1 }
 0x2f1   : > { %v2053_v11 = vadd.f32 %v2006_v31, %v4845_v55 }
 0x2f2   : > { %v2782_v2 = vadd.f32 %v2734_v50, %v2413_v14  ;;  %v2972_v41 = vpop.f32.mrf.mxu0  ;;  %v2744_v47 = vpop.f32.mrf.mxu3 }
 0x2f4   : > { %v5196_v15 = vadd.f32 %v2970_v35, %v2782_v2 }
 0x2f6   : > { %3054 = vst [vmem:[%s4923_s27 + $0xe0] sm:$0xff] %v5196_v15 }
 0x2f7   : > { %v2367_v9 = vpop.f32.mrf.mxu2 }
 0x2f8   : > { %v2414_v21 = vadd.f32 %v2367_v9, %v2053_v11  ;;  %v2009_v4 = vpop.f32.mrf.mxu1 }
 0x2f9   : > { %v2054_v27 = vadd.f32 %v2009_v4, %v4854_v3 }
 0x2fa   : > { %v2783_v18 = vadd.f32 %v2736_v32, %v2414_v21  ;;  %v2975_v13 = vpop.f32.mrf.mxu0 }
 0x2fc   : > { %v5201_v52 = vadd.f32 %v2972_v41, %v2783_v18 }
 0x2fe   : > { %3055 = vst [vmem:[%s4923_s27 + $0xe8] sm:$0xff] %v5201_v52 }
 0x2ff   : > { %v2370_v8 = vpop.f32.mrf.mxu2 }
 0x300   : > { %v2415_v54 = vadd.f32 %v2370_v8, %v2054_v27  ;;  %v2011_v23 = vpop.f32.mrf.mxu1 }
 0x301   : > { %v2055_v62 = vadd.f32 %v2011_v23, %v4867_v63  ;;  %v2746_v63 = vpop.f32.mrf.mxu3 }
 0x302   : > { %v2784_v46 = vadd.f32 %v2739_v45, %v2415_v54  ;;  %v2977_v55 = vpop.f32.mrf.mxu0 }
 0x304   : > { %v5206_v33 = vadd.f32 %v2975_v13, %v2784_v46 }
 0x306   : > { %3056 = vst [vmem:[%s4923_s27 + $0xf0] sm:$0xff] %v5206_v33 }
 0x307   : > { %v2372_v50 = vpop.f32.mrf.mxu2 }
 0x308   : > { %v2416_v38 = vadd.f32 %v2372_v50, %v2055_v62  ;;  %v2014_v44 = vpop.f32.mrf.mxu1 }
 0x309   : > { %v2056_v35 = vadd.f32 %v2014_v44, %v4876_v53  ;;  %v2749_v18 = vpop.f32.mrf.mxu3 }
 0x30a   : > { %v2785_v58 = vadd.f32 %v2741_v36, %v2416_v38  ;;  %v2980_v34 = vpop.f32.mrf.mxu0 }
 0x30c   : > { %v5211_v3 = vadd.f32 %v2977_v55, %v2785_v58 }
 0x30e   : > { %3057 = vst [vmem:[%s4923_s27 + $0xf8] sm:$0xff] %v5211_v3 }
 0x30f   : > { %v2375_v32 = vpop.f32.mrf.mxu2 }
 0x310   : > { %v2417_v7 = vadd.f32 %v2375_v32, %v2056_v35  ;;  %v2016_v10 = vpop.f32.mrf.mxu1 }
 0x311   : > { %v2057_v2 = vadd.f32 %v2016_v10, %v4889_v1  ;;  %v2751_v62 = vpop.f32.mrf.mxu3 }
 0x312   : > { %v2786_v14 = vadd.f32 %v2744_v47, %v2417_v7  ;;  %v2982_v41 = vpop.f32.mrf.mxu0 }
 0x314   : > { %v5216_v31 = vadd.f32 %v2980_v34, %v2786_v14 }
 0x316   : > { %3058 = vst [vmem:[%s4923_s27 + $0x100] sm:$0xff] %v5216_v31 }
 0x317   : > { %v2377_v11 = vpop.f32.mrf.mxu2 }
 0x318   : > { %v2418_v9 = vadd.f32 %v2377_v11, %v2057_v2  ;;  %v2019_v45 = vpop.f32.mrf.mxu1 }
 0x319   : > { %v2058_v53 = vadd.f32 %v2019_v45, %v4898_v40 }
 0x31a   : > { %v2787_v21 = vadd.f32 %v2746_v63, %v2418_v9  ;;  %v2985_v8 = vpop.f32.mrf.mxu0 }
 0x31c   : > { %v5221_v4 = vadd.f32 %v2982_v41, %v2787_v21 }
 0x31e   : > { %3059 = vst [vmem:[%s4923_s27 + $0x108] sm:$0xff] %v5221_v4 }
 0x31f   : > { %v2380_v13 = vpop.f32.mrf.mxu2 }
 0x320   : > { %v2419_v27 = vadd.f32 %v2380_v13, %v2058_v53  ;;  %v2021_v23 = vpop.f32.mrf.mxu1 }
 0x321   : > { %v2059_v36 = vadd.f32 %v2021_v23, %v4911_v24 }
 0x322   : > { %v2788_v54 = vadd.f32 %v2749_v18, %v2419_v27  ;;  %v2987_v38 = vpop.f32.mrf.mxu0 }
 0x324   : > { %v5226_v1 = vadd.f32 %v2985_v8, %v2788_v54 }
 0x326   : > { %3060 = vst [vmem:[%s4923_s27 + $0x110] sm:$0xff] %v5226_v1 }
 0x327   : > { %v2382_v46 = vpop.f32.mrf.mxu2 }
 0x328   : > { %v2420_v55 = vadd.f32 %v2382_v46, %v2059_v36 }
 0x32a   : > { %v2789_v50 = vadd.f32 %v2751_v62, %v2420_v55  ;;  %3065 = sbr.rel (%p3963_p5) target bundleno = 818 (0x332), region = 36 }
 0x32c   : > { %v5231_v44 = vadd.f32 %v2987_v38, %v2789_v50 }
 0x32e   : > { %3061 = vst [vmem:[%s4923_s27 + $0x118] sm:$0xff] %v5231_v44 }
 0x32f   : > { %v4104_v40 = vmov 0.0  }
 0x330   : > { %3066 = vst [vmem:[%s5411_s4] sm:$0x1] %v4104_v40 }
 0x331   : > { %3067 = vst [vmem:[%s5412_s5] sm:$0x1] %v4104_v40 }
 0x332 PF: > { %v3072_v24 = vld [vmem:[%s5409_s2 + $0x20] sm:$0xff]  ;;  %v3070_v58 = vld [vmem:[%s5409_s2 + $0x10] sm:$0xff]  ;;  %v4105_v34 = vmov 0   ;;  %v3073_v35 = vld [vmem:[%s5409_s2 + $0x28] sm:$0xff] }
 0x333   : > { %v3068_v47 = vld [vmem:[%s5409_s2] sm:$0xff]  ;;  %4079 = vset.pattern.permute.xlu2 %v4105_v34  ;;  %4078 = vset.pattern.permute.xlu1 %v4105_v34  ;;  %v3071_v32 = vld [vmem:[%s5409_s2 + $0x18] sm:$0xff]  ;;  %v3069_v7 = vld [vmem:[%s5409_s2 + $0x8] sm:$0xff] }
 0x334   : > { %4077 = vset.pattern.permute.xlu0 %v4105_v34  ;;  %3126 = vperm.xlu2 %4079, %v3072_v24   ;;  %v3076_v10 = vld [vmem:[%s5409_s2 + $0x40] sm:$0xff]  ;;  %v3075_v14 = vld [vmem:[%s5409_s2 + $0x38] sm:$0xff]  ;;  %v3074_v63 = vld [vmem:[%s5409_s2 + $0x30] sm:$0xff] }
 0x335   : > { %3116 = vperm.xlu1 %4078, %v3070_v58   ;;  %3106 = vperm.xlu0 %4077, %v3068_v47   ;;  %v3079_v2 = vld [vmem:[%s5409_s2 + $0x58] sm:$0xff]  ;;  %v3078_v41 = vld [vmem:[%s5409_s2 + $0x50] sm:$0xff]  ;;  %v3077_v11 = vld [vmem:[%s5409_s2 + $0x48] sm:$0xff] }
 0x336   : > { %v3082_v9 = vld [vmem:[%s5409_s2 + $0x70] sm:$0xff]  ;;  %v3081_v45 = vld [vmem:[%s5409_s2 + $0x68] sm:$0xff]  ;;  %v3080_v21 = vld [vmem:[%s5409_s2 + $0x60] sm:$0xff] }
 0x337   : > { %v3085_v53 = vld [vmem:[%s5409_s2 + $0x88] sm:$0xff]  ;;  %v3084_v18 = vld [vmem:[%s5409_s2 + $0x80] sm:$0xff]  ;;  %v3083_v13 = vld [vmem:[%s5409_s2 + $0x78] sm:$0xff] }
 0x338   : > { %v3088_v27 = vld [vmem:[%s5409_s2 + $0xa0] sm:$0xff]  ;;  %v3087_v8 = vld [vmem:[%s5409_s2 + $0x98] sm:$0xff]  ;;  %v3086_v54 = vld [vmem:[%s5409_s2 + $0x90] sm:$0xff] }
 0x339   : > { %v3091_v23 = vld [vmem:[%s5409_s2 + $0xb8] sm:$0xff]  ;;  %v3090_v36 = vld [vmem:[%s5409_s2 + $0xb0] sm:$0xff]  ;;  %v3089_v46 = vld [vmem:[%s5409_s2 + $0xa8] sm:$0xff] }
 0x33a   : > { %v3094_v55 = vld [vmem:[%s5409_s2 + $0xd0] sm:$0xff]  ;;  %v3093_v62 = vld [vmem:[%s5409_s2 + $0xc8] sm:$0xff]  ;;  %v3092_v50 = vld [vmem:[%s5409_s2 + $0xc0] sm:$0xff] }
 0x33b   : > { %v3097_v38 = vld [vmem:[%s5409_s2 + $0xe8] sm:$0xff]  ;;  %v3096_v40 = vld [vmem:[%s5409_s2 + $0xe0] sm:$0xff]  ;;  %v3095_v24 = vld [vmem:[%s5409_s2 + $0xd8] sm:$0xff] }
 0x33c   : > { %3131 = vperm.xlu2 %4079, %v3073_v35   ;;  %v3100_v58 = vld [vmem:[%s5409_s2 + $0x100] sm:$0xff]  ;;  %v3099_v47 = vld [vmem:[%s5409_s2 + $0xf8] sm:$0xff]  ;;  %v3098_v34 = vld [vmem:[%s5409_s2 + $0xf0] sm:$0xff] }
 0x33d   : > { %3121 = vperm.xlu1 %4078, %v3071_v32   ;;  %3111 = vperm.xlu0 %4077, %v3069_v7   ;;  %v3103_v35 = vld [vmem:[%s5409_s2 + $0x118] sm:$0xff]  ;;  %v3102_v32 = vld [vmem:[%s5409_s2 + $0x110] sm:$0xff]  ;;  %v3101_v7 = vld [vmem:[%s5409_s2 + $0x108] sm:$0xff] }
 0x344   : > { %3146 = vperm.xlu2 %4079, %v3076_v10  }
 0x345   : > { %3141 = vperm.xlu1 %4078, %v3075_v14   ;;  %3136 = vperm.xlu0 %4077, %v3074_v63  }
 0x34c   : > { %3161 = vperm.xlu2 %4079, %v3079_v2  }
 0x34d   : > { %3156 = vperm.xlu1 %4078, %v3078_v41   ;;  %3151 = vperm.xlu0 %4077, %v3077_v11  }
 0x354   : > { %3176 = vperm.xlu2 %4079, %v3082_v9   ;;  %v5441_v9 = vld [vmem:[#allocation8_spill] sm:$0xff] }
 0x355   : > { %3171 = vperm.xlu1 %4078, %v3081_v45   ;;  %3166 = vperm.xlu0 %4077, %v3080_v21  }
 0x35c   : > { %3191 = vperm.xlu2 %4079, %v3085_v53  }
 0x35d   : > { %3186 = vperm.xlu1 %4078, %v3084_v18   ;;  %3181 = vperm.xlu0 %4077, %v3083_v13  }
 0x364   : > { %3206 = vperm.xlu2 %4079, %v3088_v27  }
 0x365   : > { %3201 = vperm.xlu1 %4078, %v3087_v8   ;;  %3196 = vperm.xlu0 %4077, %v3086_v54  }
 0x36c   : > { %3221 = vperm.xlu2 %4079, %v3091_v23  }
 0x36d   : > { %3216 = vperm.xlu1 %4078, %v3090_v36   ;;  %3211 = vperm.xlu0 %4077, %v3089_v46  }
 0x374   : > { %3236 = vperm.xlu2 %4079, %v3094_v55  }
 0x375   : > { %3231 = vperm.xlu1 %4078, %v3093_v62   ;;  %3226 = vperm.xlu0 %4077, %v3092_v50  }
 0x37c   : > { %3251 = vperm.xlu2 %4079, %v3097_v38  }
 0x37d   : > { %3246 = vperm.xlu1 %4078, %v3096_v40   ;;  %3241 = vperm.xlu0 %4077, %v3095_v24  }
 0x384   : > { %3266 = vperm.xlu2 %4079, %v3100_v58  }
 0x385   : > { %3261 = vperm.xlu1 %4078, %v3099_v47   ;;  %3256 = vperm.xlu0 %4077, %v3098_v34  }
 0x38c   : > { %3281 = vperm.xlu2 %4079, %v3103_v35  }
 0x38d   : > { %3276 = vperm.xlu1 %4078, %v3102_v32   ;;  %3271 = vperm.xlu0 %4077, %v3101_v7  }
 0x38e   : > { %v3127_v10 = vpop.permute.xlu2 %3126 }
 0x38f   : > { %v3288_v36 = vmul.f32 %v3127_v10, %v4977_v48 }
 0x396   : > { %v3132_v14 = vpop.permute.xlu2 %3131 }
 0x397   : > { %v3289_v50 = vmul.f32 %v3132_v14, %v4991_v51 }
 0x399   : > { %v3370_v32 = vmul.f32 %v3289_v50, %v3289_v50 }
 0x39e   : > { %v3147_v63 = vpop.permute.xlu2 %3146 }
 0x3a6   : > { %v3162_v11 = vpop.permute.xlu2 %3161 }
 0x3a7   : > { %v3117_v2 = vpop.permute.xlu1 %3116  ;;  %v3107_v41 = vpop.permute.xlu0 %3106 }
 0x3a8   : > { %v3284_v45 = vmul.f32 %v3107_v41, %v5441_v9  ;;  %v3286_v18 = vmul.f32 %v3117_v2, %v4951_v6  ;;  %v3369_v6 = vmul.f32 %v3288_v36, %v3288_v36  ;;  %v3292_v2 = vmul.f32 %v3147_v63, %v5029_v30 }
 0x3a9   : > { %v3295_v30 = vmul.f32 %v3162_v11, %v5072_v5 }
 0x3aa   : > { %v3365_v27 = vmul.f32 %v3284_v45, %v3284_v45  ;;  %v3367_v46 = vmul.f32 %v3286_v18, %v3286_v18 }
 0x3ae   : > { %v3177_v34 = vpop.permute.xlu2 %3176 }
 0x3af   : > { %v3122_v21 = vpop.permute.xlu1 %3121  ;;  %v3112_v53 = vpop.permute.xlu0 %3111 }
 0x3b0   : > { %v3285_v13 = vmul.f32 %v3112_v53, %v4939_v42  ;;  %v3287_v8 = vmul.f32 %v3122_v21, %v4965_v39  ;;  %v3373_v53 = vmul.f32 %v3292_v2, %v3292_v2 }
 0x3b2   : > { %v3321_v54 = vadd.f32 %v3285_v13, %v3284_v45  ;;  %v3366_v23 = vmul.f32 %v3285_v13, %v3285_v13  ;;  %v3368_v38 = vmul.f32 %v3287_v8, %v3287_v8 }
 0x3b4   : > { %v3322_v55 = vadd.f32 %v3321_v54, %v3286_v18  ;;  %v3401_v62 = vadd.f32 %v3366_v23, %v3365_v27  ;;  %v5442_v54 = vld [vmem:[#allocation9_spill] sm:$0xff] }
 0x3b6   : > { %v3323_v40 = vadd.f32 %v3322_v55, %v3287_v8  ;;  %v3402_v24 = vadd.f32 %v3401_v62, %v3367_v46 }
 0x3b7   : > { %v3142_v58 = vpop.permute.xlu1 %3141  ;;  %v3137_v47 = vpop.permute.xlu0 %3136 }
 0x3b8   : > { %v3403_v42 = vadd.f32 %v3402_v24, %v3368_v38  ;;  %v3324_v35 = vadd.f32 %v3323_v40, %v3288_v36  ;;  %v3290_v39 = vmul.f32 %v3137_v47, %v5003_v26  ;;  %v3291_v7 = vmul.f32 %v3142_v58, %v5017_v16  ;;  %v3192_v16 = vpop.permute.xlu2 %3191 }
 0x3b9   : > { %v3376_v58 = vmul.f32 %v3295_v30, %v3295_v30 }
 0x3ba   : > { %v3325_v48 = vadd.f32 %v3324_v35, %v3289_v50  ;;  %v3404_v10 = vadd.f32 %v3403_v42, %v3369_v6  ;;  %v3371_v14 = vmul.f32 %v3290_v39, %v3290_v39  ;;  %v3372_v9 = vmul.f32 %v3291_v7, %v3291_v7 }
 0x3bc   : > { %v3405_v41 = vadd.f32 %v3404_v10, %v3370_v32  ;;  %v3326_v51 = vadd.f32 %v3325_v48, %v3290_v39  ;;  %v3298_v32 = vmul.f32 %v3177_v34, %v5107_v17 }
 0x3be   : > { %v3327_v45 = vadd.f32 %v3326_v51, %v3291_v7  ;;  %v3406_v21 = vadd.f32 %v3405_v41, %v3371_v14  ;;  %v3379_v51 = vmul.f32 %v3298_v32, %v3298_v32 }
 0x3bf   : > { %v3157_v18 = vpop.permute.xlu1 %3156  ;;  %v3152_v13 = vpop.permute.xlu0 %3151 }
 0x3c0   : > { %v3407_v27 = vadd.f32 %v3406_v21, %v3372_v9  ;;  %v3294_v8 = vmul.f32 %v3157_v18, %v5057_v37  ;;  %v3328_v26 = vadd.f32 %v3327_v45, %v3292_v2  ;;  %v3293_v23 = vmul.f32 %v3152_v13, %v5442_v54  ;;  %v3207_v7 = vpop.permute.xlu2 %3206 }
 0x3c2   : > { %v3408_v36 = vadd.f32 %v3407_v27, %v3373_v53  ;;  %v3329_v46 = vadd.f32 %v3328_v26, %v3293_v23  ;;  %v3374_v55 = vmul.f32 %v3293_v23, %v3293_v23  ;;  %v3375_v63 = vmul.f32 %v3294_v8, %v3294_v8 }
 0x3c3   : > { %v3301_v53 = vmul.f32 %v3192_v16, %v5138_v20 }
 0x3c4   : > { %v3330_v62 = vadd.f32 %v3329_v46, %v3294_v8  ;;  %v3409_v50 = vadd.f32 %v3408_v36, %v3374_v55 }
 0x3c5   : > { %v3382_v54 = vmul.f32 %v3301_v53, %v3301_v53 }
 0x3c6   : > { %v3410_v38 = vadd.f32 %v3409_v50, %v3375_v63  ;;  %v3331_v6 = vadd.f32 %v3330_v62, %v3295_v30  ;;  %v3304_v30 = vmul.f32 %v3207_v7, %v5156_v19 }
 0x3c7   : > { %v3172_v40 = vpop.permute.xlu1 %3171  ;;  %v3167_v24 = vpop.permute.xlu0 %3166 }
 0x3c8   : > { %v3297_v47 = vmul.f32 %v3172_v40, %v5098_v56  ;;  %v3296_v37 = vmul.f32 %v3167_v24, %v5083_v60  ;;  %v3411_v42 = vadd.f32 %v3410_v38, %v3376_v58  ;;  %v3222_v13 = vpop.permute.xlu2 %3221  ;;  %v3385_v40 = vmul.f32 %v3304_v30, %v3304_v30 }
 0x3ca   : > { %v3332_v35 = vadd.f32 %v3331_v6, %v3296_v37  ;;  %v3377_v39 = vmul.f32 %v3296_v37, %v3296_v37  ;;  %v3378_v48 = vmul.f32 %v3297_v47, %v3297_v47 }
 0x3cc   : > { %v3333_v5 = vadd.f32 %v3332_v35, %v3297_v47  ;;  %v3412_v11 = vadd.f32 %v3411_v42, %v3377_v39  ;;  %v3307_v42 = vmul.f32 %v3222_v13, %v5171_v43 }
 0x3ce   : > { %v3413_v10 = vadd.f32 %v3412_v11, %v3378_v48  ;;  %v3334_v9 = vadd.f32 %v3333_v5, %v3298_v32  ;;  %v3388_v5 = vmul.f32 %v3307_v42, %v3307_v42 }
 0x3cf   : > { %v3187_v2 = vpop.permute.xlu1 %3186  ;;  %v3182_v41 = vpop.permute.xlu0 %3181 }
 0x3d0   : > { %v3300_v14 = vmul.f32 %v3187_v2, %v5128_v0  ;;  %v3299_v56 = vmul.f32 %v3182_v41, %v5120_v61  ;;  %v3414_v45 = vadd.f32 %v3413_v10, %v3379_v51  ;;  %v3237_v24 = vpop.permute.xlu2 %3236 }
 0x3d2   : > { %v3335_v60 = vadd.f32 %v3334_v9, %v3299_v56  ;;  %v3380_v21 = vmul.f32 %v3299_v56, %v3299_v56  ;;  %v3381_v18 = vmul.f32 %v3300_v14, %v3300_v14 }
 0x3d4   : > { %v3336_v17 = vadd.f32 %v3335_v60, %v3300_v14  ;;  %v3415_v34 = vadd.f32 %v3414_v45, %v3380_v21  ;;  %v3310_v14 = vmul.f32 %v3237_v24, %v5186_v28 }
 0x3d6   : > { %v3416_v27 = vadd.f32 %v3415_v34, %v3381_v18  ;;  %v3337_v36 = vadd.f32 %v3336_v17, %v3301_v53  ;;  %v3391_v53 = vmul.f32 %v3310_v14, %v3310_v14 }
 0x3d7   : > { %v3202_v8 = vpop.permute.xlu1 %3201  ;;  %v3197_v26 = vpop.permute.xlu0 %3196 }
 0x3d8   : > { %v3303_v23 = vmul.f32 %v3202_v8, %v5151_v22  ;;  %v3302_v0 = vmul.f32 %v3197_v26, %v5146_v57  ;;  %v3417_v46 = vadd.f32 %v3416_v27, %v3382_v54  ;;  %v3252_v2 = vpop.permute.xlu2 %3251 }
 0x3d9   : > { %v3313_v27 = vmul.f32 %v3252_v2, %v5201_v52 }
 0x3da   : > { %v3338_v61 = vadd.f32 %v3337_v36, %v3302_v0  ;;  %v3383_v55 = vmul.f32 %v3302_v0, %v3302_v0  ;;  %v3384_v63 = vmul.f32 %v3303_v23, %v3303_v23 }
 0x3dc   : > { %v3339_v20 = vadd.f32 %v3338_v61, %v3303_v23  ;;  %v3418_v16 = vadd.f32 %v3417_v46, %v3383_v55  ;;  %v3394_v46 = vmul.f32 %v3313_v27, %v3313_v27 }
 0x3de   : > { %v3419_v62 = vadd.f32 %v3418_v16, %v3384_v63  ;;  %v3340_v47 = vadd.f32 %v3339_v20, %v3304_v30 }
 0x3df   : > { %v3217_v50 = vpop.permute.xlu1 %3216  ;;  %v3212_v38 = vpop.permute.xlu0 %3211 }
 0x3e0   : > { %v3306_v58 = vmul.f32 %v3217_v50, %v5166_v59  ;;  %v3305_v22 = vmul.f32 %v3212_v38, %v5161_v12  ;;  %v3420_v6 = vadd.f32 %v3419_v62, %v3385_v40  ;;  %v3267_v8 = vpop.permute.xlu2 %3266 }
 0x3e1   : > { %v3316_v20 = vmul.f32 %v3267_v8, %v5216_v31 }
 0x3e2   : > { %v3341_v57 = vadd.f32 %v3340_v47, %v3305_v22  ;;  %v3386_v37 = vmul.f32 %v3305_v22, %v3305_v22  ;;  %v3387_v35 = vmul.f32 %v3306_v58, %v3306_v58 }
 0x3e4   : > { %v3342_v19 = vadd.f32 %v3341_v57, %v3306_v58  ;;  %v3421_v39 = vadd.f32 %v3420_v6, %v3386_v37  ;;  %v3397_v58 = vmul.f32 %v3316_v20, %v3316_v20 }
 0x3e6   : > { %v3422_v32 = vadd.f32 %v3421_v39, %v3387_v35  ;;  %v3343_v10 = vadd.f32 %v3342_v19, %v3307_v42 }
 0x3e7   : > { %v3232_v7 = vpop.permute.xlu1 %3231  ;;  %v3227_v48 = vpop.permute.xlu0 %3226 }
 0x3e8   : > { %v3309_v11 = vmul.f32 %v3232_v7, %v5181_v49  ;;  %v3308_v59 = vmul.f32 %v3227_v48, %v5176_v25  ;;  %v3423_v41 = vadd.f32 %v3422_v32, %v3388_v5  ;;  %v3282_v50 = vpop.permute.xlu2 %3281 }
 0x3ea   : > { %v3344_v12 = vadd.f32 %v3343_v10, %v3308_v59  ;;  %v3389_v51 = vmul.f32 %v3308_v59, %v3308_v59  ;;  %v3390_v9 = vmul.f32 %v3309_v11, %v3309_v11 }
 0x3ec   : > { %v3345_v43 = vadd.f32 %v3344_v12, %v3309_v11  ;;  %v3424_v56 = vadd.f32 %v3423_v41, %v3389_v51 }
 0x3ee   : > { %v3425_v45 = vadd.f32 %v3424_v56, %v3390_v9  ;;  %v3346_v17 = vadd.f32 %v3345_v43, %v3310_v14  ;;  %v3364_v14 = vld [vmem:[%s5412_s5] sm:$0x1] }
 0x3ef   : > { %v3247_v60 = vpop.permute.xlu1 %3246  ;;  %v3242_v21 = vpop.permute.xlu0 %3241 }
 0x3f0   : > { %v3312_v18 = vmul.f32 %v3247_v60, %v5196_v15  ;;  %v3311_v49 = vmul.f32 %v3242_v21, %v5191_v29  ;;  %v3426_v34 = vadd.f32 %v3425_v45, %v3391_v53 }
 0x3f2   : > { %v3347_v25 = vadd.f32 %v3346_v17, %v3311_v49  ;;  %v3392_v13 = vmul.f32 %v3311_v49, %v3311_v49  ;;  %v3393_v26 = vmul.f32 %v3312_v18, %v3312_v18 }
 0x3f4   : > { %v3348_v28 = vadd.f32 %v3347_v25, %v3312_v18  ;;  %v3427_v54 = vadd.f32 %v3426_v34, %v3392_v13 }
 0x3f6   : > { %v3428_v23 = vadd.f32 %v3427_v54, %v3393_v26  ;;  %v3349_v55 = vadd.f32 %v3348_v28, %v3313_v27 }
 0x3f7   : > { %v3262_v36 = vpop.permute.xlu1 %3261  ;;  %v3257_v0 = vpop.permute.xlu0 %3256 }
 0x3f8   : > { %v3315_v61 = vmul.f32 %v3262_v36, %v5211_v3  ;;  %v3314_v15 = vmul.f32 %v3257_v0, %v5206_v33  ;;  %v3429_v30 = vadd.f32 %v3428_v23, %v3394_v46  ;;  %v3319_v33 = vmul.f32 %v3282_v50, %v5231_v44  ;;  %v3320_v44 = vld [vmem:[%s5411_s4] sm:$0x1] }
 0x3fa   : > { %v3350_v29 = vadd.f32 %v3349_v55, %v3314_v15  ;;  %v3395_v63 = vmul.f32 %v3314_v15, %v3314_v15  ;;  %v3396_v16 = vmul.f32 %v3315_v61, %v3315_v61  ;;  %v3400_v19 = vmul.f32 %v3319_v33, %v3319_v33 }
 0x3fc   : > { %v3351_v52 = vadd.f32 %v3350_v29, %v3315_v61  ;;  %v3430_v62 = vadd.f32 %v3429_v30, %v3395_v63 }
 0x3fe   : > { %v3431_v38 = vadd.f32 %v3430_v62, %v3396_v16  ;;  %v3352_v22 = vadd.f32 %v3351_v52, %v3316_v20 }
 0x3ff   : > { %v3277_v40 = vpop.permute.xlu1 %3276  ;;  %v3272_v24 = vpop.permute.xlu0 %3271 }
 0x400   : > { %v3318_v47 = vmul.f32 %v3277_v40, %v5226_v1  ;;  %v3317_v3 = vmul.f32 %v3272_v24, %v5221_v4  ;;  %v3432_v6 = vadd.f32 %v3431_v38, %v3397_v58 }
 0x402   : > { %v3353_v57 = vadd.f32 %v3352_v22, %v3317_v3  ;;  %v3398_v37 = vmul.f32 %v3317_v3, %v3317_v3  ;;  %v3399_v42 = vmul.f32 %v3318_v47, %v3318_v47 }
 0x404   : > { %v3354_v31 = vadd.f32 %v3353_v57, %v3318_v47  ;;  %v3433_v35 = vadd.f32 %v3432_v6, %v3398_v37 }
 0x406   : > { %v3355_v39 = vadd.f32 %v3354_v31, %v3319_v33  ;;  %v3434_v32 = vadd.f32 %v3433_v35, %v3399_v42 }
 0x408   : > { %v3356_v7 = vrot.slane %v3355_v39, 4  ;;  %v3435_v48 = vadd.f32 %v3434_v32, %v3400_v19 }
 0x40a   : > { %v3357_v5 = vadd.f32 %v3356_v7, %v3355_v39  ;;  %v3436_v11 = vrot.slane %v3435_v48, 4 }
 0x40c   : > { %v3358_v10 = vrot.slane %v3357_v5, 2  ;;  %v3437_v1 = vadd.f32 %v3436_v11, %v3435_v48 }
 0x40e   : > { %v3359_v59 = vadd.f32 %v3358_v10, %v3357_v5  ;;  %v3438_v2 = vrot.slane %v3437_v1, 2 }
 0x410   : > { %v3360_v4 = vrot.slane %v3359_v59, 1  ;;  %v3439_v41 = vadd.f32 %v3438_v2, %v3437_v1 }
 0x412   : > { %v3361_v12 = vadd.f32 %v3360_v4, %v3359_v59  ;;  %v3440_v51 = vrot.slane %v3439_v41, 1 }
 0x414   : > { %v3362_v9 = vadd.f32 %v3361_v12, %v3320_v44  ;;  %v3441_v43 = vadd.f32 %v3440_v51, %v3439_v41 }
 0x416   : > { %3363 = vst [vmem:[%s5411_s4] sm:$0x1] %v3362_v9  ;;  %v3442_v56 = vadd.f32 %v3441_v43, %v3364_v14 }
 0x418   : > { %3443 = vst [vmem:[%s5412_s5] sm:$0x1] %v3442_v56 }
 0x419 PF: > { %s16_s20 = sadd.s32 1, %s4102_s20   ;;  %s5443_s18 = smov %s4098_s19 }
 0x41a   : > { %p13_p6 = scmp.ge.s32.totalorder %s16_s20, 4   ;;  %s5444_s19 = smov %s5446_s21 }
 0x41c   :  { %15 = sbr.rel (!%p13_p6) target bundleno = 2 (0x2), region = 101 }

</bundles_post_ra>
